<compile_context>
chip_gen: v5e
topology: v5e:2x2
jax: 0.10.0
libtpu: 0.0.40
codegen_flags: <defaults>
</compile_context>

<pallas_src>
import numpy as np
import jax
import jax.numpy as jnp
from jax.experimental import pallas as pl
from jax.experimental.pallas import tpu as pltpu


TB_MAX = 128   # max batch rows per grid step (fits default scoped VMEM on v5e/v6e/v7x)
SUB = 8        # samples per in-kernel sub-chunk (bounds live vector values)


def _round_up(n, m):
    return ((n + m - 1) // m) * m


# ---------------------------------------------------------------------------
# Fused kernel: conv1+pool1 -> conv2+pool2 -> fc1 -> fc2 -> fc3
# ---------------------------------------------------------------------------
def _lenet_kernel(xcol_ref, t1_ref, t2_ref, fc1_ref, fc2_ref, fc3_ref, b_ref,
                  o_ref, p1_ref, p2_ref, tmp_ref):
    f32 = jnp.float32
    bf16 = jnp.bfloat16
    tb = o_ref.shape[0]
    nsub = tb // SUB

    # p1's 8 tail pad rows are read (by the unit-stride ki slices below) only
    # for don't-care conv2 rows of the last sample; zero them so every read is
    # defined.  Invariant used throughout: valid conv2 rows i2 < 10 with
    # ki <= 4 read pooled rows i2 + ki <= 13 < 16, i.e. never cross a sample's
    # 16-row pooled slab.
    p1_ref[pl.ds(tb * 16, 8), :] = jnp.zeros((8, 128), f32)

    # ---- conv1 + pool1 ------------------------------------------------------
    # One bf16 MXU matmul per 8-sample sub-chunk:
    #   M = 8*32 rows (b, i),  K = 5*32 (ki-stacked im2col),  N = 2*128 (parity).
    t1w = t1_ref[...]
    for sub in range(nsub):
        xs = xcol_ref[pl.ds(sub * SUB * 32, SUB * 32), :]             # (256,160) bf16
        a1 = jnp.dot(xs, t1w, preferred_element_type=f32)             # (256,256) f32
        # horizontal half of pool1 = max over the two parity lane blocks
        tmp_ref[...] = jnp.maximum(a1[:, :128], a1[:, 128:])
        # vertical half of pool1: one pair of stride-2 reads, materialized once
        p1_ref[pl.ds(sub * SUB * 16, SUB * 16), :] = jnp.maximum(
            tmp_ref[pl.ds(0, SUB * 16, 2), :],
            tmp_ref[pl.ds(1, SUB * 16, 2), :])

    # ---- conv2 + pool2 ------------------------------------------------------
    #   M = 8*16 rows (b, i2),  K = 5*128 (ki-stacked),  N = 2*128 (parity).
    t2w = t2_ref[...]
    for sub in range(nsub):
        base = sub * SUB * 16
        ys = jnp.concatenate(
            [p1_ref[pl.ds(base + ki, SUB * 16), :].astype(bf16) for ki in range(5)],
            axis=1)                                                   # (128,640) bf16
        a2 = jnp.dot(ys, t2w, preferred_element_type=f32)             # (128,256) f32
        tmp_ref[pl.ds(0, SUB * 16), :] = jnp.maximum(a2[:, :128], a2[:, 128:])
        p2_ref[pl.ds(sub * SUB * 8, SUB * 8), :] = jnp.maximum(
            tmp_ref[pl.ds(0, SUB * 8, 2), :],
            tmp_ref[pl.ds(1, SUB * 8, 2), :])

    # ---- fc1 -> fc2 -> fc3 on the whole batch tile --------------------------
    # fc1 is ONE K=640 matmul: pooled row ip of each sample lives in lane
    # block [ip*128, (ip+1)*128).  conv biases are pre-folded into b_ref[0].
    h1in = jnp.concatenate(
        [p2_ref[pl.ds(ip, tb, 8), :].astype(bf16) for ip in range(5)], axis=1)
    h1 = jnp.dot(h1in, fc1_ref[...], preferred_element_type=f32) + b_ref[0:1, :]
    h2 = jnp.dot(h1.astype(bf16), fc2_ref[...],
                 preferred_element_type=f32) + b_ref[1:2, :]
    o_ref[...] = (jnp.dot(h2.astype(bf16), fc3_ref[...],
                          preferred_element_type=f32) + b_ref[2:3, :])


# ---------------------------------------------------------------------------
# Forward wrapper (one pallas_call, grid over batch tiles)
# ---------------------------------------------------------------------------
def lenet_forward(kparams, x):
    """x: (B, 1, 32, 32) float32 (NCHW, as in the PyTorch module) -> (B, 10)."""
    B = x.shape[0]
    tb = min(TB_MAX, _round_up(B, SUB))
    bp = _round_up(B, tb)

    # conv1 im2col (K-stack the 5 kernel-row shifts along lanes): (bp*32, 160).
    xs = x.reshape(B, 32, 32).astype(jnp.float32)
    xpad = jnp.pad(xs, ((0, bp - B), (0, 4), (0, 0)))                 # (bp, 36, 32)
    xcol = jnp.concatenate([xpad[:, ki:ki + 32, :] for ki in range(5)], axis=2)
    xcol = xcol.reshape(bp * 32, 5 * 32).astype(jnp.bfloat16)

    out = pl.pallas_call(
        _lenet_kernel,
        out_shape=jax.ShapeDtypeStruct((bp, 128), jnp.float32),
        grid=(bp // tb,),
        in_specs=[
            pl.BlockSpec((tb * 32, 160), lambda i: (i, 0)),   # im2col input tile
            pl.BlockSpec((160, 256), lambda i: (0, 0)),       # conv1 banded W (bf16)
            pl.BlockSpec((640, 256), lambda i: (0, 0)),       # conv2 banded W (bf16)
            pl.BlockSpec((640, 128), lambda i: (0, 0)),       # fc1 (K-stacked, bf16)
            pl.BlockSpec((128, 128), lambda i: (0, 0)),       # fc2 (padded, bf16)
            pl.BlockSpec((128, 128), lambda i: (0, 0)),       # fc3 (padded, bf16)
            pl.BlockSpec((8, 128), lambda i: (0, 0)),         # packed f32 biases
        ],
        out_specs=pl.BlockSpec((tb, 128), lambda i: (i, 0)),
        scratch_shapes=[
            pltpu.VMEM((tb * 16 + 8, 128), jnp.float32),   # pooled conv1 activations
            pltpu.VMEM((tb * 8, 128), jnp.float32),        # pooled conv2 activations
            pltpu.VMEM((SUB * 32, 128), jnp.float32),      # per-sub-chunk pool temp
        ],
        compiler_params=pltpu.CompilerParams(
            dimension_semantics=("parallel",)),
    )(xcol, kparams["t1"], kparams["t2"], kparams["fc1s"],
      kparams["fc2p"], kparams["fc3p"], kparams["b_all"])
    return out[:B, :10]


# ---------------------------------------------------------------------------
# Parameters: PyTorch-style init + one-time host-side repacking
# ---------------------------------------------------------------------------
def init_lenet_params(seed=0):
    keys = jax.random.split(jax.random.PRNGKey(seed), 10)

    def uinit(key, shape, fan_in):
        bound = 1.0 / float(np.sqrt(fan_in))
        return jax.random.uniform(key, shape, jnp.float32, -bound, bound)

    return {
        "conv1_w": uinit(keys[0], (6, 1, 5, 5), 1 * 5 * 5),
        "conv1_b": uinit(keys[1], (6,), 1 * 5 * 5),
        "conv2_w": uinit(keys[2], (16, 6, 5, 5), 6 * 5 * 5),
        "conv2_b": uinit(keys[3], (16,), 6 * 5 * 5),
        "fc1_w": uinit(keys[4], (120, 16 * 5 * 5), 16 * 5 * 5),
        "fc1_b": uinit(keys[5], (120,), 16 * 5 * 5),
        "fc2_w": uinit(keys[6], (84, 120), 120),
        "fc2_b": uinit(keys[7], (84,), 120),
        "fc3_w": uinit(keys[8], (10, 84), 84),
        "fc3_b": uinit(keys[9], (10,), 84),
    }


def prepare_lenet_params(params):
    """One-time host-side repack (outside jit) into the kernel's operands."""
    w1 = np.asarray(params["conv1_w"], np.float32)   # (6, 1, 5, 5)
    b1 = np.asarray(params["conv1_b"], np.float32)
    w2 = np.asarray(params["conv2_w"], np.float32)   # (16, 6, 5, 5)
    b2 = np.asarray(params["conv2_b"], np.float32)
    fw1 = np.asarray(params["fc1_w"], np.float32)    # (120, 400)
    fb1 = np.asarray(params["fc1_b"], np.float32)
    fw2 = np.asarray(params["fc2_w"], np.float32)    # (84, 120)
    fb2 = np.asarray(params["fc2_b"], np.float32)
    fw3 = np.asarray(params["fc3_w"], np.float32)    # (10, 84)
    fb3 = np.asarray(params["fc3_b"], np.float32)

    # conv1 banded weights.  Row = ki*32 + input col (ki-stacked K); column
    # = par*128 + (o*14 + jp) (parity-stacked N).  Output lane (par, o, jp)
    # holds conv1 output at spatial column 2*jp + par; max over par = pool-h.
    t1 = np.zeros((5 * 32, 256), np.float32)
    for par in range(2):
        for ki in range(5):
            for o in range(6):
                for jp in range(14):
                    for kj in range(5):
                        t1[ki * 32 + 2 * jp + par + kj,
                           par * 128 + o * 14 + jp] = w1[o, 0, ki, kj]

    # conv2 banded weights.  K row = ki*128 + (c*14 + pooled col); N column
    # = par*128 + (o*5 + jp).
    t2 = np.zeros((5 * 128, 256), np.float32)
    for par in range(2):
        for ki in range(5):
            for o in range(16):
                for c in range(6):
                    for jp in range(5):
                        for kj in range(5):
                            t2[ki * 128 + c * 14 + 2 * jp + par + kj,
                               par * 128 + o * 5 + jp] = w2[o, c, ki, kj]

    # fc1: K block ip*128 + (o*5 + jp)  <->  PyTorch flatten index o*25 + ip*5 + jp.
    fc1s = np.zeros((5 * 128, 128), np.float32)
    for ip in range(5):
        for o in range(16):
            for jp in range(5):
                fc1s[ip * 128 + o * 5 + jp, :120] = fw1[:, o * 25 + ip * 5 + jp]

    fc2p = np.zeros((128, 128), np.float32)
    fc2p[:120, :84] = fw2.T
    fc3p = np.zeros((128, 128), np.float32)
    fc3p[:84, :10] = fw3.T

    # Fold conv biases downstream (exact): pool commutes with a per-channel
    # constant and conv/fc are linear, so
    #   bias2[o]     = b2[o] + sum_{c,ki,kj} b1[c] * w2[o,c,ki,kj]
    #   b_fc1_eff[n] = fb1[n] + sum_{o,ip,jp} bias2[o] * fw1[n, o*25+ip*5+jp]
    bias2 = b2 + w2.sum(axis=(2, 3)) @ b1               # (16,)
    b_fc1_eff = fb1 + fw1 @ np.repeat(bias2, 25)        # (120,)

    b_all = np.zeros((8, 128), np.float32)
    b_all[0, :120] = b_fc1_eff
    b_all[1, :84] = fb2
    b_all[2, :10] = fb3

    return {
        "t1": jnp.asarray(t1, jnp.bfloat16),
        "t2": jnp.asarray(t2, jnp.bfloat16),
        "fc1s": jnp.asarray(fc1s, jnp.bfloat16),
        "fc2p": jnp.asarray(fc2p, jnp.bfloat16),
        "fc3p": jnp.asarray(fc3p, jnp.bfloat16),
        "b_all": jnp.asarray(b_all, jnp.float32),
    }


# ---------------------------------------------------------------------------
# Independent float64 numpy reference (mirrors the PyTorch module exactly)
# ---------------------------------------------------------------------------
def _reference_forward(params, x):
    p = {k: np.asarray(v, np.float64) for k, v in params.items()}
    h = np.asarray(x, np.float64).reshape(x.shape[0], 1, 32, 32)

    def conv(h, w, b):
        bsz, _, hh, ww = h.shape
        ho, wo = hh - 4, ww - 4
        out = np.zeros((bsz, w.shape[0], ho, wo), np.float64)
        for ki in range(5):
            for kj in range(5):
                out += np.einsum("bchw,oc->bohw",
                                 h[:, :, ki:ki + ho, kj:kj + wo], w[:, :, ki, kj])
        return out + b.reshape(1, -1, 1, 1)

    def pool(h):
        bsz, c, hh, ww = h.shape
        return h.reshape(bsz, c, hh // 2, 2, ww // 2, 2).max(axis=(3, 5))

    h = pool(conv(h, p["conv1_w"], p["conv1_b"]))
    h = pool(conv(h, p["conv2_w"], p["conv2_b"]))
    h = h.reshape(h.shape[0], -1)
    h = h @ p["fc1_w"].T + p["fc1_b"]
    h = h @ p["fc2_w"].T + p["fc2_b"]
    h = h @ p["fc3_w"].T + p["fc3_b"]
    return h


if __name__ == "__main__":
    params = init_lenet_params(seed=0)
    kparams = prepare_lenet_params(params)   # one-time repack, outside jit

    # LeNet's 16*5*5 flatten implies a 32x32 single-channel input.
    x = jax.random.normal(jax.random.PRNGKey(0), (2, 1, 32, 32), jnp.float32)

    fwd = jax.jit(lenet_forward)
    out = fwd(kparams, x)
    jax.block_until_ready(out)
    assert out.shape == (2, 10) and out.dtype == jnp.float32

    ref = _reference_forward(params, x)
    np.testing.assert_allclose(np.asarray(out, np.float64), ref,
                               rtol=2e-2, atol=2e-2)

    # Also exercise the multi-sub-chunk (tb > 8) path once.
    x2 = jax.random.normal(jax.random.PRNGKey(1), (16, 1, 32, 32), jnp.float32)
    out2 = jax.block_until_ready(fwd(kparams, x2))
    np.testing.assert_allclose(np.asarray(out2, np.float64),
                               _reference_forward(params, x2),
                               rtol=2e-2, atol=2e-2)

    print("KERNEL_OK")
</pallas_src>

<mosaic_0001>
module attributes {stable_mosaic.version = 11 : i64} {
  func.func @_lenet_kernel(%arg0: i32, %arg1: memref<256x160xbf16, #tpu.memory_space<vmem>>, %arg2: memref<160x256xbf16, #tpu.memory_space<vmem>>, %arg3: memref<640x256xbf16, #tpu.memory_space<vmem>>, %arg4: memref<640x128xbf16, #tpu.memory_space<vmem>>, %arg5: memref<128x128xbf16, #tpu.memory_space<vmem>>, %arg6: memref<128x128xbf16, #tpu.memory_space<vmem>>, %arg7: memref<8x128xf32, #tpu.memory_space<vmem>>, %arg8: memref<8x128xf32, #tpu.memory_space<vmem>>, %arg9: memref<136x128xf32, #tpu.memory_space<vmem>>, %arg10: memref<64x128xf32, #tpu.memory_space<vmem>>, %arg11: memref<256x128xf32, #tpu.memory_space<vmem>>) attributes {dimension_semantics = [#tpu.dimension_semantics<parallel>], iteration_bounds = array<i64: 1>, scalar_prefetch = 0 : i64, scratch_operands = 3 : i64, tpu.core_type = #tpu.core_type<tc>, window_params = [{transform_indices = @transform_0, window_bounds = array<i64: 256, 160>}, {pipeline_mode = #tpu.pipeline_mode<synchronous>, transform_indices = @transform_1, window_bounds = array<i64: 160, 256>}, {pipeline_mode = #tpu.pipeline_mode<synchronous>, transform_indices = @transform_2, window_bounds = array<i64: 640, 256>}, {pipeline_mode = #tpu.pipeline_mode<synchronous>, transform_indices = @transform_3, window_bounds = array<i64: 640, 128>}, {pipeline_mode = #tpu.pipeline_mode<synchronous>, transform_indices = @transform_4, window_bounds = array<i64: 128, 128>}, {pipeline_mode = #tpu.pipeline_mode<synchronous>, transform_indices = @transform_5, window_bounds = array<i64: 128, 128>}, {pipeline_mode = #tpu.pipeline_mode<synchronous>, transform_indices = @transform_6, window_bounds = array<i64: 8, 128>}, {transform_indices = @transform_7, window_bounds = array<i64: 8, 128>}]} {
    %cst = arith.constant 0.000000e+00 : f32
    %0 = vector.broadcast %cst : f32 to vector<8x128xf32>
    %c128 = arith.constant 128 : index
    %c0 = arith.constant 0 : index
    %1 = vector.load %arg9[%c128, %c0] : memref<136x128xf32, #tpu.memory_space<vmem>>, vector<8x128xf32>
    tpu.vector_store %arg9[%c128, %c0], %0 {strides = array<i32>} : memref<136x128xf32, #tpu.memory_space<vmem>>, vector<8x128xf32>,
    %c0_0 = arith.constant 0 : index
    %c0_1 = arith.constant 0 : index
    %2 = vector.load %arg2[%c0_0, %c0_1] : memref<160x256xbf16, #tpu.memory_space<vmem>>, vector<160x256xbf16>
    %c0_2 = arith.constant 0 : index
    %c0_3 = arith.constant 0 : index
    %3 = vector.load %arg1[%c0_2, %c0_3] : memref<256x160xbf16, #tpu.memory_space<vmem>>, vector<256x160xbf16>
    %cst_4 = arith.constant dense<0.000000e+00> : vector<256x256xf32>
    %4 = tpu.matmul %3, %2, %cst_4 {dimension_numbers = #tpu.dot_dimension_numbers<[1], [0], [0], [1], [0, 0, 1, 1], [], []>} : vector<256x160xbf16>, vector<160x256xbf16>, vector<256x256xf32> -> vector<256x256xf32>
    %5 = vector.extract_strided_slice %4 {offsets = [0, 0], sizes = [256, 128], strides = [1, 1]} : vector<256x256xf32> to vector<256x128xf32>
    %6 = vector.extract_strided_slice %4 {offsets = [0, 128], sizes = [256, 128], strides = [1, 1]} : vector<256x256xf32> to vector<256x128xf32>
    %7 = arith.maximumf %5, %6 : vector<256x128xf32>
    %c0_5 = arith.constant 0 : index
    %c0_6 = arith.constant 0 : index
    %8 = vector.load %arg11[%c0_5, %c0_6] : memref<256x128xf32, #tpu.memory_space<vmem>>, vector<256x128xf32>
    tpu.vector_store %arg11[%c0_5, %c0_6], %7 {strides = array<i32>} : memref<256x128xf32, #tpu.memory_space<vmem>>, vector<256x128xf32>,
    %c0_7 = arith.constant 0 : index
    %c0_8 = arith.constant 0 : index
    %9 = tpu.strided_load %arg11[%c0_7, %c0_8] {strides = array<i32: 2, 1>} : memref<256x128xf32, #tpu.memory_space<vmem>>, vector<128x128xf32>
    %c1 = arith.constant 1 : index
    %c0_9 = arith.constant 0 : index
    %10 = tpu.strided_load %arg11[%c1, %c0_9] {strides = array<i32: 2, 1>} : memref<256x128xf32, #tpu.memory_space<vmem>>, vector<128x128xf32>
    %11 = arith.maximumf %9, %10 : vector<128x128xf32>
    %c0_10 = arith.constant 0 : index
    %c0_11 = arith.constant 0 : index
    %12 = vector.load %arg9[%c0_10, %c0_11] : memref<136x128xf32, #tpu.memory_space<vmem>>, vector<128x128xf32>
    tpu.vector_store %arg9[%c0_10, %c0_11], %11 {strides = array<i32>} : memref<136x128xf32, #tpu.memory_space<vmem>>, vector<128x128xf32>,
    %c0_12 = arith.constant 0 : index
    %c0_13 = arith.constant 0 : index
    %13 = vector.load %arg3[%c0_12, %c0_13] : memref<640x256xbf16, #tpu.memory_space<vmem>>, vector<640x256xbf16>
    %c0_14 = arith.constant 0 : index
    %c0_15 = arith.constant 0 : index
    %14 = vector.load %arg9[%c0_14, %c0_15] : memref<136x128xf32, #tpu.memory_space<vmem>>, vector<128x128xf32>
    %15 = arith.truncf %14 : vector<128x128xf32> to vector<128x128xbf16>
    %c1_16 = arith.constant 1 : index
    %c0_17 = arith.constant 0 : index
    %16 = vector.load %arg9[%c1_16, %c0_17] : memref<136x128xf32, #tpu.memory_space<vmem>>, vector<128x128xf32>
    %17 = arith.truncf %16 : vector<128x128xf32> to vector<128x128xbf16>
    %c2 = arith.constant 2 : index
    %c0_18 = arith.constant 0 : index
    %18 = vector.load %arg9[%c2, %c0_18] : memref<136x128xf32, #tpu.memory_space<vmem>>, vector<128x128xf32>
    %19 = arith.truncf %18 : vector<128x128xf32> to vector<128x128xbf16>
    %c3 = arith.constant 3 : index
    %c0_19 = arith.constant 0 : index
    %20 = vector.load %arg9[%c3, %c0_19] : memref<136x128xf32, #tpu.memory_space<vmem>>, vector<128x128xf32>
    %21 = arith.truncf %20 : vector<128x128xf32> to vector<128x128xbf16>
    %c4 = arith.constant 4 : index
    %c0_20 = arith.constant 0 : index
    %22 = vector.load %arg9[%c4, %c0_20] : memref<136x128xf32, #tpu.memory_space<vmem>>, vector<128x128xf32>
    %23 = arith.truncf %22 : vector<128x128xf32> to vector<128x128xbf16>
    %24 = tpu.concatenate %15, %17, %19, %21, %23 in 1 : vector<128x128xbf16>, vector<128x128xbf16>, vector<128x128xbf16>, vector<128x128xbf16>, vector<128x128xbf16> -> vector<128x640xbf16>
    %cst_21 = arith.constant dense<0.000000e+00> : vector<128x256xf32>
    %25 = tpu.matmul %24, %13, %cst_21 {dimension_numbers = #tpu.dot_dimension_numbers<[1], [0], [0], [1], [0, 0, 1, 1], [], []>} : vector<128x640xbf16>, vector<640x256xbf16>, vector<128x256xf32> -> vector<128x256xf32>
    %26 = vector.extract_strided_slice %25 {offsets = [0, 0], sizes = [128, 128], strides = [1, 1]} : vector<128x256xf32> to vector<128x128xf32>
    %27 = vector.extract_strided_slice %25 {offsets = [0, 128], sizes = [128, 128], strides = [1, 1]} : vector<128x256xf32> to vector<128x128xf32>
    %28 = arith.maximumf %26, %27 : vector<128x128xf32>
    %c0_22 = arith.constant 0 : index
    %c0_23 = arith.constant 0 : index
    %29 = vector.load %arg11[%c0_22, %c0_23] : memref<256x128xf32, #tpu.memory_space<vmem>>, vector<128x128xf32>
    tpu.vector_store %arg11[%c0_22, %c0_23], %28 {strides = array<i32>} : memref<256x128xf32, #tpu.memory_space<vmem>>, vector<128x128xf32>,
    %c0_24 = arith.constant 0 : index
    %c0_25 = arith.constant 0 : index
    %30 = tpu.strided_load %arg11[%c0_24, %c0_25] {strides = array<i32: 2, 1>} : memref<256x128xf32, #tpu.memory_space<vmem>>, vector<64x128xf32>
    %c1_26 = arith.constant 1 : index
    %c0_27 = arith.constant 0 : index
    %31 = tpu.strided_load %arg11[%c1_26, %c0_27] {strides = array<i32: 2, 1>} : memref<256x128xf32, #tpu.memory_space<vmem>>, vector<64x128xf32>
    %32 = arith.maximumf %30, %31 : vector<64x128xf32>
    %c0_28 = arith.constant 0 : index
    %c0_29 = arith.constant 0 : index
    %33 = vector.load %arg10[%c0_28, %c0_29] : memref<64x128xf32, #tpu.memory_space<vmem>>, vector<64x128xf32>
    tpu.vector_store %arg10[%c0_28, %c0_29], %32 {strides = array<i32>} : memref<64x128xf32, #tpu.memory_space<vmem>>, vector<64x128xf32>,
    %c0_30 = arith.constant 0 : index
    %c0_31 = arith.constant 0 : index
    %34 = tpu.strided_load %arg10[%c0_30, %c0_31] {strides = array<i32: 8, 1>} : memref<64x128xf32, #tpu.memory_space<vmem>>, vector<8x128xf32>
    %35 = arith.truncf %34 : vector<8x128xf32> to vector<8x128xbf16>
    %c1_32 = arith.constant 1 : index
    %c0_33 = arith.constant 0 : index
    %36 = tpu.strided_load %arg10[%c1_32, %c0_33] {strides = array<i32: 8, 1>} : memref<64x128xf32, #tpu.memory_space<vmem>>, vector<8x128xf32>
    %37 = arith.truncf %36 : vector<8x128xf32> to vector<8x128xbf16>
    %c2_34 = arith.constant 2 : index
    %c0_35 = arith.constant 0 : index
    %38 = tpu.strided_load %arg10[%c2_34, %c0_35] {strides = array<i32: 8, 1>} : memref<64x128xf32, #tpu.memory_space<vmem>>, vector<8x128xf32>
    %39 = arith.truncf %38 : vector<8x128xf32> to vector<8x128xbf16>
    %c3_36 = arith.constant 3 : index
    %c0_37 = arith.constant 0 : index
    %40 = tpu.strided_load %arg10[%c3_36, %c0_37] {strides = array<i32: 8, 1>} : memref<64x128xf32, #tpu.memory_space<vmem>>, vector<8x128xf32>
    %41 = arith.truncf %40 : vector<8x128xf32> to vector<8x128xbf16>
    %c4_38 = arith.constant 4 : index
    %c0_39 = arith.constant 0 : index
    %42 = tpu.strided_load %arg10[%c4_38, %c0_39] {strides = array<i32: 8, 1>} : memref<64x128xf32, #tpu.memory_space<vmem>>, vector<8x128xf32>
    %43 = arith.truncf %42 : vector<8x128xf32> to vector<8x128xbf16>
    %44 = tpu.concatenate %35, %37, %39, %41, %43 in 1 : vector<8x128xbf16>, vector<8x128xbf16>, vector<8x128xbf16>, vector<8x128xbf16>, vector<8x128xbf16> -> vector<8x640xbf16>
    %c0_40 = arith.constant 0 : index
    %c0_41 = arith.constant 0 : index
    %45 = vector.load %arg4[%c0_40, %c0_41] : memref<640x128xbf16, #tpu.memory_space<vmem>>, vector<640x128xbf16>
    %cst_42 = arith.constant dense<0.000000e+00> : vector<8x128xf32>
    %46 = tpu.matmul %44, %45, %cst_42 {dimension_numbers = #tpu.dot_dimension_numbers<[1], [0], [0], [1], [0, 0, 1, 1], [], []>} : vector<8x640xbf16>, vector<640x128xbf16>, vector<8x128xf32> -> vector<8x128xf32>
    %c0_43 = arith.constant 0 : index
    %c0_44 = arith.constant 0 : index
    %47 = vector.load %arg7[%c0_43, %c0_44] : memref<8x128xf32, #tpu.memory_space<vmem>>, vector<1x128xf32>
    %48 = vector.broadcast %47 : vector<1x128xf32> to vector<8x128xf32>
    %49 = arith.addf %46, %48 : vector<8x128xf32>
    %50 = arith.truncf %49 : vector<8x128xf32> to vector<8x128xbf16>
    %c0_45 = arith.constant 0 : index
    %c0_46 = arith.constant 0 : index
    %51 = vector.load %arg5[%c0_45, %c0_46] : memref<128x128xbf16, #tpu.memory_space<vmem>>, vector<128x128xbf16>
    %cst_47 = arith.constant dense<0.000000e+00> : vector<8x128xf32>
    %52 = tpu.matmul %50, %51, %cst_47 {dimension_numbers = #tpu.dot_dimension_numbers<[1], [0], [0], [1], [0, 0, 1, 1], [], []>} : vector<8x128xbf16>, vector<128x128xbf16>, vector<8x128xf32> -> vector<8x128xf32>
    %c1_48 = arith.constant 1 : index
    %c0_49 = arith.constant 0 : index
    %53 = vector.load %arg7[%c1_48, %c0_49] : memref<8x128xf32, #tpu.memory_space<vmem>>, vector<1x128xf32>
    %54 = vector.broadcast %53 : vector<1x128xf32> to vector<8x128xf32>
    %55 = arith.addf %52, %54 : vector<8x128xf32>
    %56 = arith.truncf %55 : vector<8x128xf32> to vector<8x128xbf16>
    %c0_50 = arith.constant 0 : index
    %c0_51 = arith.constant 0 : index
    %57 = vector.load %arg6[%c0_50, %c0_51] : memref<128x128xbf16, #tpu.memory_space<vmem>>, vector<128x128xbf16>
    %cst_52 = arith.constant dense<0.000000e+00> : vector<8x128xf32>
    %58 = tpu.matmul %56, %57, %cst_52 {dimension_numbers = #tpu.dot_dimension_numbers<[1], [0], [0], [1], [0, 0, 1, 1], [], []>} : vector<8x128xbf16>, vector<128x128xbf16>, vector<8x128xf32> -> vector<8x128xf32>
    %c2_53 = arith.constant 2 : index
    %c0_54 = arith.constant 0 : index
    %59 = vector.load %arg7[%c2_53, %c0_54] : memref<8x128xf32, #tpu.memory_space<vmem>>, vector<1x128xf32>
    %60 = vector.broadcast %59 : vector<1x128xf32> to vector<8x128xf32>
    %61 = arith.addf %58, %60 : vector<8x128xf32>
    %c0_55 = arith.constant 0 : index
    %c0_56 = arith.constant 0 : index
    %62 = vector.load %arg8[%c0_55, %c0_56] : memref<8x128xf32, #tpu.memory_space<vmem>>, vector<8x128xf32>
    tpu.vector_store %arg8[%c0_55, %c0_56], %61 {strides = array<i32>} : memref<8x128xf32, #tpu.memory_space<vmem>>, vector<8x128xf32>,
    return
  }
  func.func @transform_0(%arg0: i32) -> (i32, i32) {
    %c0_i32 = arith.constant 0 : i32
    %c0_i32_0 = arith.constant 0 : i32
    return %arg0, %c0_i32 : i32, i32
  }
  func.func @transform_1(%arg0: i32) -> (i32, i32) {
    %c0_i32 = arith.constant 0 : i32
    %c0_i32_0 = arith.constant 0 : i32
    %c0_i32_1 = arith.constant 0 : i32
    return %c0_i32, %c0_i32_0 : i32, i32
  }
  func.func @transform_2(%arg0: i32) -> (i32, i32) {
    %c0_i32 = arith.constant 0 : i32
    %c0_i32_0 = arith.constant 0 : i32
    %c0_i32_1 = arith.constant 0 : i32
    return %c0_i32, %c0_i32_0 : i32, i32
  }
  func.func @transform_3(%arg0: i32) -> (i32, i32) {
    %c0_i32 = arith.constant 0 : i32
    %c0_i32_0 = arith.constant 0 : i32
    %c0_i32_1 = arith.constant 0 : i32
    return %c0_i32, %c0_i32_0 : i32, i32
  }
  func.func @transform_4(%arg0: i32) -> (i32, i32) {
    %c0_i32 = arith.constant 0 : i32
    %c0_i32_0 = arith.constant 0 : i32
    %c0_i32_1 = arith.constant 0 : i32
    return %c0_i32, %c0_i32_0 : i32, i32
  }
  func.func @transform_5(%arg0: i32) -> (i32, i32) {
    %c0_i32 = arith.constant 0 : i32
    %c0_i32_0 = arith.constant 0 : i32
    %c0_i32_1 = arith.constant 0 : i32
    return %c0_i32, %c0_i32_0 : i32, i32
  }
  func.func @transform_6(%arg0: i32) -> (i32, i32) {
    %c0_i32 = arith.constant 0 : i32
    %c0_i32_0 = arith.constant 0 : i32
    %c0_i32_1 = arith.constant 0 : i32
    return %c0_i32, %c0_i32_0 : i32, i32
  }
  func.func @transform_7(%arg0: i32) -> (i32, i32) {
    %c0_i32 = arith.constant 0 : i32
    %c0_i32_0 = arith.constant 0 : i32
    return %arg0, %c0_i32 : i32, i32
  }
}

</mosaic_0001>

<bundles_post_ra>
// kernel: lenet_forward.1
= control target key start
LH: loop header
LB: loop body
LE: loop exit
PB: predicated region body
PF: predicated region fallthrough
CT: control target
= control target key end

     0   :  { %vm324_vm0 = vcmask 261120   ;;  %s5484_s1 = inlined_call_operand.vmem [shape: bf16[160,256], index: 1, kind: input, shape index: {}]   ;;  %s5485_s0 = inlined_call_operand.vmem [shape: bf16[256,160], index: 0, kind: input, shape index: {}]   ;;  %s5486_s2 = inlined_call_operand.vmem [shape: bf16[640,256], index: 2, kind: input, shape index: {}]   ;;  %s5487_s3 = inlined_call_operand.vmem [shape: bf16[640,128], index: 3, kind: input, shape index: {}]   ;;  %s5488_s6 = inlined_call_operand.vmem [shape: f32[8,128], index: 6, kind: input, shape index: {}]   ;;  %s5489_s4 = inlined_call_operand.vmem [shape: bf16[128,128], index: 4, kind: input, shape index: {}]   ;;  %s5490_s5 = inlined_call_operand.vmem [shape: bf16[128,128], index: 5, kind: input, shape index: {}]   ;;  %s5491_s7 = inlined_call_operand.vmem [shape: f32[8,128], index: 7, kind: output, shape index: {}]  }
   0x1   :  { %v3091_v0 = vld [vmem:[%s5484_s1 + $0x70] sm:$0xf]  ;;  %v3704_v1 = vld [vmem:[%s5484_s1 + $0x74] sm:$0xf0]  ;;  %v3703_v5 = vld [vmem:[%s5484_s1 + $0x74] sm:$0xf] }
   0x2   :  { %v3107_v2 = vld [vmem:[%s5484_s1 + $0x90] sm:$0xf]  ;;  %v3092_v3 = vor.u32 %v3704_v1, %v3091_v0  ;;  %v3708_v4 = vld [vmem:[%s5484_s1 + $0x94] sm:$0xf0]  ;;  %v3093_v6 = vld [vmem:[%s5484_s1 + $0x78] sm:$0xf0] }
   0x3   :  { %v3108_v7 = vor.u32 %v3708_v4, %v3107_v2  ;;  %v3096_v8 = vor.u32 %v3703_v5, %v3093_v6  ;;  %v3707_v9 = vld [vmem:[%s5484_s1 + $0x94] sm:$0xf]  ;;  %v3109_v10 = vld [vmem:[%s5484_s1 + $0x98] sm:$0xf0]  ;;  %v3083_v11 = vld [vmem:[%s5484_s1 + $0x60] sm:$0xf] }
   0x4   :  { %373 = vmatpush.bf16.msra.mxu0 %v3092_v3  ;;  %v3112_v12 = vor.u32 %v3707_v9, %v3109_v10  ;;  %v3702_v13 = vld [vmem:[%s5484_s1 + $0x64] sm:$0xf0]  ;;  %v3099_v14 = vld [vmem:[%s5484_s1 + $0x80] sm:$0xf]  ;;  %v3701_v18 = vld [vmem:[%s5484_s1 + $0x64] sm:$0xf] }
   0x5   :  { %v3706_v15 = vld [vmem:[%s5484_s1 + $0x84] sm:$0xf0]  ;;  %468 = vmatpush.bf16.msra.mxu1 %v3108_v7  ;;  %551 = vmatpush.bf16.msra.mxu2 %v3096_v8  ;;  %v3084_v16 = vor.u32 %v3702_v13, %v3083_v11  ;;  %v3085_v19 = vld [vmem:[%s5484_s1 + $0x68] sm:$0xf0]  ;;  %v3705_v20 = vld [vmem:[%s5484_s1 + $0x84] sm:$0xf] }
   0x6   :  { %v3100_v17 = vor.u32 %v3706_v15, %v3099_v14  ;;  %646 = vmatpush.bf16.msra.mxu3 %v3112_v12  ;;  %v3088_v21 = vor.u32 %v3701_v18, %v3085_v19  ;;  %v3101_v22 = vld [vmem:[%s5484_s1 + $0x88] sm:$0xf0]  ;;  %v3709_v23 = vld [vmem:[%s5485_s0 + $0x4] sm:$0xf]  ;;  %v3075_v26 = vld [vmem:[%s5484_s1 + $0x50] sm:$0xf] }
   0x7   :  { %v2909_v24 = vld [vmem:[%s5485_s0 + $0x8] sm:$0xf0]  ;;  %v3104_v25 = vor.u32 %v3705_v20, %v3101_v22  ;;  %v3700_v27 = vld [vmem:[%s5484_s1 + $0x54] sm:$0xf0]  ;;  %v3699_v28 = vld [vmem:[%s5484_s1 + $0x54] sm:$0xf] }
   0x8   :  { %374 = vmatpush.bf16.msra.mxu0 %v3084_v16  ;;  %v2912_v29 = vor.u32 %v3709_v23, %v2909_v24  ;;  %v3076_v30 = vor.u32 %v3700_v27, %v3075_v26  ;;  %v3077_v31 = vld [vmem:[%s5484_s1 + $0x58] sm:$0xf0]  ;;  %v3067_v33 = vld [vmem:[%s5484_s1 + $0x40] sm:$0xf]  ;;  %v3698_v34 = vld [vmem:[%s5484_s1 + $0x44] sm:$0xf0] }
   0x9   :  { %469 = vmatpush.bf16.msra.mxu1 %v3100_v17  ;;  %552 = vmatpush.bf16.msra.mxu2 %v3088_v21  ;;  %v3080_v32 = vor.u32 %v3699_v28, %v3077_v31  ;;  %v3697_v35 = vld [vmem:[%s5484_s1 + $0x44] sm:$0xf]  ;;  %v3069_v36 = vld [vmem:[%s5484_s1 + $0x48] sm:$0xf0]  ;;  %v3068_v37 = vor.u32 %v3698_v34, %v3067_v33  ;;  %v3059_v39 = vld [vmem:[%s5484_s1 + $0x30] sm:$0xf] }
   0xa   :  { %647 = vmatpush.bf16.msra.mxu3 %v3104_v25  ;;  %v3072_v38 = vor.u32 %v3697_v35, %v3069_v36  ;;  %v3696_v40 = vld [vmem:[%s5484_s1 + $0x34] sm:$0xf0]  ;;  %v3695_v41 = vld [vmem:[%s5484_s1 + $0x34] sm:$0xf]  ;;  %v3061_v42 = vld [vmem:[%s5484_s1 + $0x38] sm:$0xf0] }
   0xb   :  { %v3060_v43 = vor.u32 %v3696_v40, %v3059_v39  ;;  %v3064_v44 = vor.u32 %v3695_v41, %v3061_v42  ;;  %v3051_v45 = vld [vmem:[%s5484_s1 + $0x20] sm:$0xf]  ;;  %v3694_v46 = vld [vmem:[%s5484_s1 + $0x24] sm:$0xf0]  ;;  %v3693_v47 = vld [vmem:[%s5484_s1 + $0x24] sm:$0xf] }
   0xc   :  { %3113 = vmatmul.msk.bf16.vlgmr.msra.gmra.mxu1 %vm324_vm0, %v2912_v29  ;;  %375 = vmatpush.bf16.msra.mxu0 %v3076_v30  ;;  %v3053_v48 = vld [vmem:[%s5484_s1 + $0x28] sm:$0xf0]  ;;  %v3052_v49 = vor.u32 %v3694_v46, %v3051_v45  ;;  %v3711_v50 = vld [vmem:[%s5485_s0 + $0x14] sm:$0xf]  ;;  %v2917_v52 = vld [vmem:[%s5485_s0 + $0x18] sm:$0xf0] }
   0xd   :  { %3129 = vmatmul.msk.bf16.vlgmr.msra.gmra.mxu3 %vm324_vm0, %v2912_v29  ;;  %553 = vmatpush.bf16.msra.mxu2 %v3080_v32  ;;  %v3056_v51 = vor.u32 %v3693_v47, %v3053_v48  ;;  %v3043_v53 = vld [vmem:[%s5484_s1 + $0x10] sm:$0xf]  ;;  %v3692_v54 = vld [vmem:[%s5484_s1 + $0x14] sm:$0xf0]  ;;  %v3691_v55 = vld [vmem:[%s5484_s1 + $0x14] sm:$0xf]  ;;  %v2920_v57 = vor.u32 %v3711_v50, %v2917_v52 }
   0xe   :  { %v3045_v56 = vld [vmem:[%s5484_s1 + $0x18] sm:$0xf0]  ;;  %v3044_v58 = vor.u32 %v3692_v54, %v3043_v53  ;;  %v3035_v60 = vld [vmem:[%s5484_s1] sm:$0xf]  ;;  %v3690_v61 = vld [vmem:[%s5484_s1 + $0x4] sm:$0xf0] }
   0xf   :  { %v3048_v59 = vor.u32 %v3691_v55, %v3045_v56  ;;  %v3689_v62 = vld [vmem:[%s5484_s1 + $0x4] sm:$0xf]  ;;  %v3037_v63 = vld [vmem:[%s5484_s1 + $0x8] sm:$0xf0]  ;;  %v3036_v0 = vor.u32 %v3690_v61, %v3035_v60  ;;  %v2907_v1 = vld [vmem:[%s5485_s0] sm:$0xf] }
  0x10   :  { %376 = vmatpush.bf16.msra.mxu0 %v3068_v37  ;;  %v3710_v2 = vld [vmem:[%s5485_s0 + $0x4] sm:$0xf0]  ;;  %v3040_v3 = vor.u32 %v3689_v62, %v3037_v63  ;;  %v3713_v5 = vld [vmem:[%s5485_s0 + $0x24] sm:$0xf]  ;;  %v2925_v6 = vld [vmem:[%s5485_s0 + $0x28] sm:$0xf0] }
  0x11   :  { %554 = vmatpush.bf16.msra.mxu2 %v3072_v38  ;;  %v2908_v4 = vor.u32 %v3710_v2, %v2907_v1  ;;  %v2928_v7 = vor.u32 %v3713_v5, %v2925_v6  ;;  %v2915_v8 = vld [vmem:[%s5485_s0 + $0x10] sm:$0xf]  ;;  %v3712_v9 = vld [vmem:[%s5485_s0 + $0x14] sm:$0xf0]  ;;  %v3715_v17 = vld [vmem:[%s5485_s0 + $0x34] sm:$0xf] }
  0x12   :  { %v3267_v10 = vld [vmem:[%s5486_s2 + $0xf0] sm:$0xf]  ;;  %v3772_v11 = vld [vmem:[%s5486_s2 + $0xf4] sm:$0xf0]  ;;  %v2916_v15 = vor.u32 %v3712_v9, %v2915_v8  ;;  %v2933_v18 = vld [vmem:[%s5485_s0 + $0x38] sm:$0xf0] }
  0x13   :  { %v3203_v12 = vld [vmem:[%s5486_s2 + $0x70] sm:$0xf]  ;;  %v3268_v13 = vor.u32 %v3772_v11, %v3267_v10  ;;  %v3756_v14 = vld [vmem:[%s5486_s2 + $0x74] sm:$0xf0]  ;;  %v2936_v19 = vor.u32 %v3715_v17, %v2933_v18  ;;  %v2923_v20 = vld [vmem:[%s5485_s0 + $0x20] sm:$0xf] }
  0x14   :  { %377 = vmatpush.bf16.msra.mxu0 %v3060_v43  ;;  %v3204_v16 = vor.u32 %v3756_v14, %v3203_v12  ;;  %v3714_v21 = vld [vmem:[%s5485_s0 + $0x24] sm:$0xf0]  ;;  %v3717_v23 = vld [vmem:[%s5485_s0 + $0x44] sm:$0xf]  ;;  %v2941_v24 = vld [vmem:[%s5485_s0 + $0x48] sm:$0xf0] }
  0x15   :  { %555 = vmatpush.bf16.msra.mxu2 %v3064_v44  ;;  %1817 = vmatpush.bf16.msrb.mxu3 %v3268_v13  ;;  %v2924_v22 = vor.u32 %v3714_v21, %v2923_v20  ;;  %v2944_v25 = vor.u32 %v3717_v23, %v2941_v24  ;;  %v2931_v26 = vld [vmem:[%s5485_s0 + $0x30] sm:$0xf]  ;;  %v3716_v27 = vld [vmem:[%s5485_s0 + $0x34] sm:$0xf0]  ;;  %v3259_v28 = vld [vmem:[%s5486_s2 + $0xe0] sm:$0xf] }
  0x16   :  { %1768 = vmatpush.bf16.msrb.mxu1 %v3204_v16  ;;  %v3770_v29 = vld [vmem:[%s5486_s2 + $0xe4] sm:$0xf0]  ;;  %v3195_v30 = vld [vmem:[%s5486_s2 + $0x60] sm:$0xf]  ;;  %v2932_v33 = vor.u32 %v3716_v27, %v2931_v26  ;;  %v3719_v35 = vld [vmem:[%s5485_s0 + $0x54] sm:$0xf] }
  0x17   :  { %v3260_v31 = vor.u32 %v3770_v29, %v3259_v28  ;;  %v3754_v32 = vld [vmem:[%s5486_s2 + $0x64] sm:$0xf0]  ;;  %v2949_v36 = vld [vmem:[%s5485_s0 + $0x58] sm:$0xf0]  ;;  %v2939_v38 = vld [vmem:[%s5485_s0 + $0x40] sm:$0xf] }
  0x18   :  { %378 = vmatpush.bf16.msra.mxu0 %v3052_v49  ;;  %v3196_v34 = vor.u32 %v3754_v32, %v3195_v30  ;;  %v2952_v37 = vor.u32 %v3719_v35, %v2949_v36  ;;  %v3718_v39 = vld [vmem:[%s5485_s0 + $0x44] sm:$0xf0]  ;;  %v3721_v41 = vld [vmem:[%s5485_s0 + $0x64] sm:$0xf]  ;;  %v2957_v42 = vld [vmem:[%s5485_s0 + $0x68] sm:$0xf0] }
  0x19   :  { %556 = vmatpush.bf16.msra.mxu2 %v3056_v51  ;;  %1818 = vmatpush.bf16.msrb.mxu3 %v3260_v31  ;;  %v2940_v40 = vor.u32 %v3718_v39, %v2939_v38  ;;  %v2960_v43 = vor.u32 %v3721_v41, %v2957_v42  ;;  %v2947_v44 = vld [vmem:[%s5485_s0 + $0x50] sm:$0xf]  ;;  %v3720_v45 = vld [vmem:[%s5485_s0 + $0x54] sm:$0xf0]  ;;  %v3723_v53 = vld [vmem:[%s5485_s0 + $0x74] sm:$0xf] }
  0x1a   :  { %1769 = vmatpush.bf16.msrb.mxu1 %v3196_v34  ;;  %v3251_v46 = vld [vmem:[%s5486_s2 + $0xd0] sm:$0xf]  ;;  %v3768_v47 = vld [vmem:[%s5486_s2 + $0xd4] sm:$0xf0]  ;;  %v2948_v49 = vor.u32 %v3720_v45, %v2947_v44  ;;  %v2965_v54 = vld [vmem:[%s5485_s0 + $0x78] sm:$0xf0] }
  0x1b   :  { %v3252_v48 = vor.u32 %v3768_v47, %v3251_v46  ;;  %v3187_v50 = vld [vmem:[%s5486_s2 + $0x50] sm:$0xf]  ;;  %v3752_v51 = vld [vmem:[%s5486_s2 + $0x54] sm:$0xf0]  ;;  %v2968_v55 = vor.u32 %v3723_v53, %v2965_v54  ;;  %v2955_v56 = vld [vmem:[%s5485_s0 + $0x60] sm:$0xf] }
  0x1c   :  { %3114 = vmatmul.msk.bf16.gmra.mxu1 %vm324_vm0, %v2920_v57  ;;  %379 = vmatpush.bf16.msra.mxu0 %v3044_v58  ;;  %v3188_v52 = vor.u32 %v3752_v51, %v3187_v50  ;;  %v2973_v60 = vld [vmem:[%s5485_s0 + $0x88] sm:$0xf0]  ;;  %v2963_v63 = vld [vmem:[%s5485_s0 + $0x70] sm:$0xf]  ;;  %v3243_v1 = vld [vmem:[%s5486_s2 + $0xc0] sm:$0xf] }
  0x1d   :  { %3130 = vmatmul.msk.bf16.gmra.mxu3 %vm324_vm0, %v2920_v57  ;;  %557 = vmatpush.bf16.msra.mxu2 %v3048_v59  ;;  %v3722_v57 = vld [vmem:[%s5485_s0 + $0x64] sm:$0xf0]  ;;  %v3725_v59 = vld [vmem:[%s5485_s0 + $0x84] sm:$0xf]  ;;  %v2981_v8 = vld [vmem:[%s5485_s0 + $0x98] sm:$0xf0] }
  0x1e   :  { %1819 = vmatpush.bf16.msrb.mxu3 %v3252_v48  ;;  %1770 = vmatpush.bf16.msrb.mxu1 %v3188_v52  ;;  %v2956_v58 = vor.u32 %v3722_v57, %v2955_v56  ;;  %v2976_v61 = vor.u32 %v3725_v59, %v2973_v60  ;;  %v3766_v2 = vld [vmem:[%s5486_s2 + $0xc4] sm:$0xf0]  ;;  %v2971_v12 = vld [vmem:[%s5485_s0 + $0x80] sm:$0xf]  ;;  %v3729_v21 = vld [vmem:[%s5485_s0 + $0xa4] sm:$0xf] }
  0x1f   :  { %v3726_v13 = vld [vmem:[%s5485_s0 + $0x84] sm:$0xf0]  ;;  %v3179_v14 = vld [vmem:[%s5486_s2 + $0x40] sm:$0xf]  ;;  %v2979_v31 = vld [vmem:[%s5485_s0 + $0x90] sm:$0xf] }
  0x20   :  { %380 = vmatpush.bf16.msra.mxu0 %v3036_v0  ;;  %v3724_v0 = vld [vmem:[%s5485_s0 + $0x74] sm:$0xf0]  ;;  %v2972_v16 = vor.u32 %v3726_v13, %v2971_v12  ;;  %v3235_v35 = vld [vmem:[%s5486_s2 + $0xb0] sm:$0xf]  ;;  %v3731_v50 = vld [vmem:[%s5485_s0 + $0xb4] sm:$0xf] }
  0x21   :  { %558 = vmatpush.bf16.msra.mxu2 %v3040_v3  ;;  %v3244_v3 = vor.u32 %v3766_v2, %v3243_v1  ;;  %v3728_v32 = vld [vmem:[%s5485_s0 + $0x94] sm:$0xf0]  ;;  %v2997_v51 = vld [vmem:[%s5485_s0 + $0xb8] sm:$0xf0]  ;;  %v3171_v1 = vld [vmem:[%s5486_s2 + $0x30] sm:$0xf] }
  0x22   :  { %v3804_v34 = vld [vmem:[%s5486_s2 + $0x1f4] sm:$0xf0]  ;;  %v3000_v57 = vor.u32 %v3731_v50, %v2997_v51  ;;  %v3733_v12 = vld [vmem:[%s5485_s0 + $0xc4] sm:$0xf]  ;;  %v3005_v13 = vld [vmem:[%s5485_s0 + $0xc8] sm:$0xf0] }
  0x23   :  { %381 = vmatmul.bf16.vlgmr.msra.gmra.mxu0 %v2908_v4  ;;  %1820 = vmatpush.bf16.msrb.mxu3 %v3244_v3  ;;  %v3764_v39 = vld [vmem:[%s5486_s2 + $0xb4] sm:$0xf0] }
  0x24   :  { %559 = vmatmul.bf16.vlgmr.msra.gmra.mxu2 %v2908_v4  ;;  %v2964_v4 = vor.u32 %v3724_v0, %v2963_v63  ;;  %v3788_v41 = vld [vmem:[%s5486_s2 + $0x174] sm:$0xf0]  ;;  %v3236_v46 = vor.u32 %v3764_v39, %v3235_v35  ;;  %v2987_v63 = vld [vmem:[%s5485_s0 + $0xa0] sm:$0xf]  ;;  %v3730_v0 = vld [vmem:[%s5485_s0 + $0xa4] sm:$0xf0] }
  0x25   :  { %v3748_v2 = vld [vmem:[%s5486_s2 + $0x34] sm:$0xf0] }
  0x27   :  { %1821 = vmatpush.bf16.msrb.mxu3 %v3236_v46 }
  0x2c   :  { %3115 = vmatmul.msk.bf16.gmra.mxu1 %vm324_vm0, %v2928_v7 }
  0x2d   :  { %3131 = vmatmul.msk.bf16.gmra.mxu3 %vm324_vm0, %v2928_v7  ;;  %v3727_v7 = vld [vmem:[%s5485_s0 + $0x94] sm:$0xf] }
  0x2e   :  { %v2984_v10 = vor.u32 %v3727_v7, %v2981_v8 }
  0x33   :  { %386 = vmatmul.bf16.gmra.mxu0 %v2916_v15 }
  0x34   :  { %564 = vmatmul.bf16.gmra.mxu2 %v2916_v15  ;;  %v3750_v15 = vld [vmem:[%s5486_s2 + $0x44] sm:$0xf0] }
  0x35   :  { %v3180_v17 = vor.u32 %v3750_v15, %v3179_v14 }
  0x37   :  { %1771 = vmatpush.bf16.msrb.mxu1 %v3180_v17 }
  0x3c   :  { %3116 = vmatmul.msk.bf16.gmra.mxu1 %vm324_vm0, %v2936_v19 }
  0x3d   :  { %3132 = vmatmul.msk.bf16.gmra.mxu3 %vm324_vm0, %v2936_v19 }
  0x43   :  { %391 = vmatmul.bf16.gmra.mxu0 %v2924_v22 }
  0x44   :  { %569 = vmatmul.bf16.gmra.mxu2 %v2924_v22  ;;  %v2989_v22 = vld [vmem:[%s5485_s0 + $0xa8] sm:$0xf0] }
  0x45   :  { %v2992_v28 = vor.u32 %v3729_v21, %v2989_v22 }
  0x4c   :  { %3117 = vmatmul.msk.bf16.gmra.mxu1 %vm324_vm0, %v2944_v25 }
  0x4d   :  { %3133 = vmatmul.msk.bf16.gmra.mxu3 %vm324_vm0, %v2944_v25 }
  0x53   :  { %396 = vmatmul.bf16.gmra.mxu0 %v2932_v33 }
  0x54   :  { %574 = vmatmul.bf16.gmra.mxu2 %v2932_v33  ;;  %v3395_v33 = vld [vmem:[%s5486_s2 + $0x1f0] sm:$0xf] }
  0x55   :  { %v3396_v38 = vor.u32 %v3804_v34, %v3395_v33  ;;  %v3762_v33 = vld [vmem:[%s5486_s2 + $0xa4] sm:$0xf0]  ;;  %v3323_v34 = vld [vmem:[%s5486_s2 + $0x160] sm:$0xf] }
  0x57   :  { %1915 = vmatpush.bf16.msrb.mxu2 %v3396_v38 }
  0x5c   :  { %3118 = vmatmul.msk.bf16.gmra.mxu1 %vm324_vm0, %v2952_v37 }
  0x5d   :  { %3134 = vmatmul.msk.bf16.gmra.mxu3 %vm324_vm0, %v2952_v37  ;;  %v2980_v37 = vor.u32 %v3728_v32, %v2979_v31  ;;  %v3227_v32 = vld [vmem:[%s5486_s2 + $0xa0] sm:$0xf] }
  0x5e   :  { %v3228_v39 = vor.u32 %v3762_v33, %v3227_v32 }
  0x60   :  { %1822 = vmatpush.bf16.msrb.mxu3 %v3228_v39  ;;  %v3784_v39 = vld [vmem:[%s5486_s2 + $0x154] sm:$0xf0] }
  0x63   :  { %401 = vmatmul.bf16.gmra.mxu0 %v2940_v40 }
  0x64   :  { %579 = vmatmul.bf16.gmra.mxu2 %v2940_v40  ;;  %v3331_v40 = vld [vmem:[%s5486_s2 + $0x170] sm:$0xf] }
  0x65   :  { %v3332_v47 = vor.u32 %v3788_v41, %v3331_v40  ;;  %v3786_v40 = vld [vmem:[%s5486_s2 + $0x164] sm:$0xf0] }
  0x67   :  { %1866 = vmatpush.bf16.msrb.mxu0 %v3332_v47 }
  0x6c   :  { %3119 = vmatmul.msk.bf16.gmra.mxu1 %vm324_vm0, %v2960_v43 }
  0x6d   :  { %3135 = vmatmul.msk.bf16.gmra.mxu3 %vm324_vm0, %v2960_v43 }
  0x73   :  { %406 = vmatmul.bf16.gmra.mxu0 %v2948_v49 }
  0x74   :  { %584 = vmatmul.bf16.gmra.mxu2 %v2948_v49 }
  0x7c   :  { %3120 = vmatmul.msk.bf16.gmra.mxu1 %vm324_vm0, %v2968_v55 }
  0x7d   :  { %3136 = vmatmul.msk.bf16.gmra.mxu3 %vm324_vm0, %v2968_v55 }
  0x83   :  { %411 = vmatmul.bf16.gmra.mxu0 %v2956_v58 }
  0x84   :  { %589 = vmatmul.bf16.gmra.mxu2 %v2956_v58 }
  0x89   :  { %v471_v62 = vpop.f32.mrf.mxu1 }
  0x8c   :  { %3121 = vmatmul.msk.bf16.gmra.mxu1 %vm324_vm0, %v2976_v61 }
  0x8d   :  { %3137 = vmatmul.msk.bf16.gmra.mxu3 %vm324_vm0, %v2976_v61 }
  0x90   :  { %v649_v5 = vpop.f32.mrf.mxu3 }
  0x91   :  { %v473_v6 = vpop.f32.mrf.mxu1 }
  0x93   :  { %416 = vmatmul.bf16.gmra.mxu0 %v2964_v4 }
  0x94   :  { %594 = vmatmul.bf16.gmra.mxu2 %v2964_v4  ;;  %v2988_v4 = vor.u32 %v3730_v0, %v2987_v63 }
  0x98   :  { %v651_v9 = vpop.f32.mrf.mxu3 }
  0x99   :  { %v476_v11 = vpop.f32.mrf.mxu1 }
  0x9c   :  { %3122 = vmatmul.msk.bf16.gmra.mxu1 %vm324_vm0, %v2984_v10 }
  0x9d   :  { %3138 = vmatmul.msk.bf16.gmra.mxu3 %vm324_vm0, %v2984_v10 }
  0xa0   :  { %v654_v18 = vpop.f32.mrf.mxu3  ;;  %v382_v19 = vpop.f32.mrf.mxu0 }
  0xa1   :  { %v4224_v20 = vpop.f32.mrf.mxu1  ;;  %v472_v23 = vadd.f32 %v471_v62, %v382_v19  ;;  %v3008_v19 = vor.u32 %v3733_v12, %v3005_v13  ;;  %v3737_v12 = vld [vmem:[%s5485_s0 + $0xe4] sm:$0xf]  ;;  %v3021_v13 = vld [vmem:[%s5485_s0 + $0xe8] sm:$0xf0] }
  0xa3   :  { %421 = vmatmul.bf16.gmra.mxu0 %v2972_v16 }
  0xa4   :  { %599 = vmatmul.bf16.gmra.mxu2 %v2972_v16 }
  0xa7   :  { %v560_v24 = vpop.f32.mrf.mxu2 }
  0xa8   :  { %v650_v25 = vadd.f32 %v649_v5, %v560_v24  ;;  %v656_v26 = vpop.f32.mrf.mxu3  ;;  %v384_v27 = vpop.f32.mrf.mxu0  ;;  %v3172_v5 = vor.u32 %v3748_v2, %v3171_v1 }
  0xa9   :  { %v4232_v29 = vpop.f32.mrf.mxu1  ;;  %v474_v42 = vadd.f32 %v473_v6, %v384_v27  ;;  %v3387_v27 = vld [vmem:[%s5486_s2 + $0x1e0] sm:$0xf] }
  0xaa   :  { %v729_v30 = vmax.f32 %v472_v23, %v650_v25  ;;  %1772 = vmatpush.bf16.msrb.mxu1 %v3172_v5  ;;  %v2995_v25 = vld [vmem:[%s5485_s0 + $0xb0] sm:$0xf] }
  0xac   :  { %761 = vst [vmem:[#allocation4] sm:$0xff] %v729_v30  ;;  %3123 = vmatmul.msk.bf16.gmra.mxu1 %vm324_vm0, %v2992_v28 }
  0xad   :  { %3139 = vmatmul.msk.bf16.gmra.mxu3 %vm324_vm0, %v2992_v28  ;;  %v3802_v28 = vld [vmem:[%s5486_s2 + $0x1e4] sm:$0xf0] }
  0xae   :  { %v3388_v31 = vor.u32 %v3802_v28, %v3387_v27 }
  0xaf   :  { %v562_v36 = vpop.f32.mrf.mxu2 }
  0xb0   :  { %v652_v43 = vadd.f32 %v651_v9, %v562_v36  ;;  %v659_v44 = vpop.f32.mrf.mxu3  ;;  %v387_v45 = vpop.f32.mrf.mxu0  ;;  %1916 = vmatpush.bf16.msrb.mxu2 %v3388_v31  ;;  %v3736_v31 = vld [vmem:[%s5485_s0 + $0xd4] sm:$0xf0] }
  0xb1   :  { %v4260_v48 = vpop.f32.mrf.mxu1  ;;  %v477_v52 = vadd.f32 %v476_v11, %v387_v45  ;;  %v3013_v45 = vld [vmem:[%s5485_s0 + $0xd8] sm:$0xf0] }
  0xb2   :  { %v730_v49 = vmax.f32 %v474_v42, %v652_v43  ;;  %v3324_v42 = vor.u32 %v3786_v40, %v3323_v34  ;;  %v3379_v34 = vld [vmem:[%s5486_s2 + $0x1d0] sm:$0xf] }
  0xb3   :  { %426 = vmatmul.bf16.gmra.mxu0 %v2980_v37 }
  0xb4   :  { %762 = vst [vmem:[#allocation4 + $0x8] sm:$0xff] %v730_v49  ;;  %604 = vmatmul.bf16.gmra.mxu2 %v2980_v37  ;;  %1867 = vmatpush.bf16.msrb.mxu0 %v3324_v42 }
  0xb7   :  { %v565_v53 = vpop.f32.mrf.mxu2 }
  0xb8   :  { %v655_v54 = vadd.f32 %v654_v18, %v565_v53  ;;  %v661_v55 = vpop.f32.mrf.mxu3  ;;  %v389_v56 = vpop.f32.mrf.mxu0 }
  0xb9   :  { %v4268_v58 = vpop.f32.mrf.mxu1  ;;  %v479_v6 = vadd.f32 %v4224_v20, %v389_v56 }
  0xba   :  { %v731_v59 = vmax.f32 %v477_v52, %v655_v54 }
  0xbb   :  { %v793_v60 = vld [vmem:[#allocation4] ss:$2 sm:$0xff]  ;;  %v825_v61 = vld [vmem:[#allocation4 + $0x1] ss:$2 sm:$0xff] }
  0xbc   :  { %v4270_v62 = vmax.f32 %v793_v60, %v825_v61  ;;  %763 = vst [vmem:[#allocation4 + $0x10] sm:$0xff] %v731_v59  ;;  %3124 = vmatmul.msk.bf16.gmra.mxu1 %vm324_vm0, %v3000_v57  ;;  %v3163_v59 = vld [vmem:[%s5486_s2 + $0x20] sm:$0xf]  ;;  %v3746_v60 = vld [vmem:[%s5486_s2 + $0x24] sm:$0xf0] }
  0xbd   :  { %3140 = vmatmul.msk.bf16.gmra.mxu3 %vm324_vm0, %v3000_v57  ;;  %v3003_v57 = vld [vmem:[%s5485_s0 + $0xc0] sm:$0xf]  ;;  %v3164_v0 = vor.u32 %v3746_v60, %v3163_v59  ;;  %v3363_v59 = vld [vmem:[%s5486_s2 + $0x1b0] sm:$0xf] }
  0xbe   :  { %872 = vst [vmem:[#allocation2] sm:$0xff] %v4270_v62 }
  0xbf   :  { %v567_v3 = vpop.f32.mrf.mxu2  ;;  %1773 = vmatpush.bf16.msrb.mxu1 %v3164_v0  ;;  %v3029_v0 = vld [vmem:[%s5485_s0 + $0xf8] sm:$0xf0] }
  0xc0   :  { %v657_v7 = vadd.f32 %v656_v26, %v567_v3  ;;  %v664_v8 = vpop.f32.mrf.mxu3  ;;  %v392_v9 = vpop.f32.mrf.mxu0  ;;  %v3732_v26 = vld [vmem:[%s5485_s0 + $0xb4] sm:$0xf0] }
  0xc1   :  { %v4288_v10 = vpop.f32.mrf.mxu1  ;;  %v482_v14 = vadd.f32 %v4232_v29, %v392_v9  ;;  %v2996_v30 = vor.u32 %v3732_v26, %v2995_v25  ;;  %v3219_v9 = vld [vmem:[%s5486_s2 + $0x90] sm:$0xf]  ;;  %v3758_v26 = vld [vmem:[%s5486_s2 + $0x84] sm:$0xf0] }
  0xc2   :  { %v732_v11 = vmax.f32 %v479_v6, %v657_v7  ;;  %v3155_v7 = vld [vmem:[%s5486_s2 + $0x10] sm:$0xf] }
  0xc3   :  { %431 = vmatmul.bf16.gmra.mxu0 %v2988_v4 }
  0xc4   :  { %764 = vst [vmem:[#allocation4 + $0x18] sm:$0xff] %v732_v11  ;;  %609 = vmatmul.bf16.gmra.mxu2 %v2988_v4  ;;  %v3760_v11 = vld [vmem:[%s5486_s2 + $0x94] sm:$0xf0] }
  0xc7   :  { %v570_v15 = vpop.f32.mrf.mxu2 }
  0xc8   :  { %v660_v16 = vadd.f32 %v659_v44, %v570_v15  ;;  %v666_v17 = vpop.f32.mrf.mxu3  ;;  %v394_v18 = vpop.f32.mrf.mxu0  ;;  %v3735_v44 = vld [vmem:[%s5485_s0 + $0xd4] sm:$0xf] }
  0xc9   :  { %v4297_v20 = vpop.f32.mrf.mxu1  ;;  %v484_v35 = vadd.f32 %v4260_v48, %v394_v18  ;;  %v3016_v51 = vor.u32 %v3735_v44, %v3013_v45  ;;  %v3742_v18 = vld [vmem:[%s5486_s2 + $0x4] sm:$0xf0]  ;;  %v3307_v44 = vld [vmem:[%s5486_s2 + $0x140] sm:$0xf] }
  0xca   :  { %v733_v21 = vmax.f32 %v482_v14, %v660_v16  ;;  %v3220_v14 = vor.u32 %v3760_v11, %v3219_v9  ;;  %v3782_v45 = vld [vmem:[%s5486_s2 + $0x144] sm:$0xf0] }
  0xcb   :  { %v795_v22 = vld [vmem:[#allocation4 + $0x10] ss:$2 sm:$0xff]  ;;  %v827_v23 = vld [vmem:[#allocation4 + $0x11] ss:$2 sm:$0xff] }
  0xcc   :  { %v4299_v24 = vmax.f32 %v795_v22, %v827_v23  ;;  %765 = vst [vmem:[#allocation4 + $0x20] sm:$0xff] %v733_v21  ;;  %3125 = vmatmul.msk.bf16.gmra.mxu1 %vm324_vm0, %v3008_v19  ;;  %1823 = vmatpush.bf16.msrb.mxu3 %v3220_v14 }
  0xcd   :  { %3141 = vmatmul.msk.bf16.gmra.mxu3 %vm324_vm0, %v3008_v19  ;;  %v3211_v19 = vld [vmem:[%s5486_s2 + $0x80] sm:$0xf] }
  0xce   :  { %873 = vst [vmem:[#allocation2 + $0x8] sm:$0xff] %v4299_v24  ;;  %v3212_v28 = vor.u32 %v3758_v26, %v3211_v19 }
  0xcf   :  { %v572_v29 = vpop.f32.mrf.mxu2 }
  0xd0   :  { %v662_v36 = vadd.f32 %v661_v55, %v572_v29  ;;  %v669_v37 = vpop.f32.mrf.mxu3  ;;  %v397_v38 = vpop.f32.mrf.mxu0  ;;  %1824 = vmatpush.bf16.msrb.mxu3 %v3212_v28  ;;  %v3792_v28 = vld [vmem:[%s5486_s2 + $0x194] sm:$0xf0] }
  0xd1   :  { %v4329_v41 = vpop.f32.mrf.mxu1  ;;  %v487_v46 = vadd.f32 %v4268_v58, %v397_v38  ;;  %v3734_v58 = vld [vmem:[%s5485_s0 + $0xc4] sm:$0xf0] }
  0xd2   :  { %v734_v43 = vmax.f32 %v484_v35, %v662_v36  ;;  %v3004_v63 = vor.u32 %v3734_v58, %v3003_v57  ;;  %v3800_v36 = vld [vmem:[%s5486_s2 + $0x1d4] sm:$0xf0] }
  0xd3   :  { %436 = vmatmul.bf16.gmra.mxu0 %v2996_v30  ;;  %v3380_v38 = vor.u32 %v3800_v36, %v3379_v34  ;;  %v3339_v34 = vld [vmem:[%s5486_s2 + $0x180] sm:$0xf] }
  0xd4   :  { %766 = vst [vmem:[#allocation4 + $0x28] sm:$0xff] %v734_v43  ;;  %614 = vmatmul.bf16.gmra.mxu2 %v2996_v30  ;;  %v3011_v30 = vld [vmem:[%s5485_s0 + $0xd0] sm:$0xf] }
  0xd5   :  { %v3012_v43 = vor.u32 %v3736_v31, %v3011_v30  ;;  %1917 = vmatpush.bf16.msrb.mxu2 %v3380_v38 }
  0xd7   :  { %v575_v47 = vpop.f32.mrf.mxu2 }
  0xd8   :  { %v665_v48 = vadd.f32 %v664_v8, %v575_v47  ;;  %v4338_v49 = vpop.f32.mrf.mxu3  ;;  %v399_v50 = vpop.f32.mrf.mxu0  ;;  %v3744_v8 = vld [vmem:[%s5486_s2 + $0x14] sm:$0xf0] }
  0xd9   :  { %v4340_v52 = vpop.f32.mrf.mxu1  ;;  %v489_v1 = vadd.f32 %v4288_v10, %v399_v50  ;;  %v3156_v10 = vor.u32 %v3744_v8, %v3155_v7  ;;  %v3778_v7 = vld [vmem:[%s5486_s2 + $0x124] sm:$0xf0]  ;;  %v3355_v8 = vld [vmem:[%s5486_s2 + $0x1a0] sm:$0xf] }
  0xda   :  { %v735_v53 = vmax.f32 %v487_v46, %v665_v48  ;;  %v3371_v46 = vld [vmem:[%s5486_s2 + $0x1c0] sm:$0xf] }
  0xdb   :  { %v797_v54 = vld [vmem:[#allocation4 + $0x20] ss:$2 sm:$0xff]  ;;  %v829_v55 = vld [vmem:[#allocation4 + $0x21] ss:$2 sm:$0xff]  ;;  %1774 = vmatpush.bf16.msrb.mxu1 %v3156_v10 }
  0xdc   :  { %v4342_v56 = vmax.f32 %v797_v54, %v829_v55  ;;  %767 = vst [vmem:[#allocation4 + $0x30] sm:$0xff] %v735_v53  ;;  %3126 = vmatmul.msk.bf16.gmra.mxu1 %vm324_vm0, %v3016_v51  ;;  %v3308_v53 = vor.u32 %v3782_v45, %v3307_v44  ;;  %v3798_v54 = vld [vmem:[%s5486_s2 + $0x1c4] sm:$0xf0] }
  0xdd   :  { %3142 = vmatmul.msk.bf16.gmra.mxu3 %vm324_vm0, %v3016_v51  ;;  %v3372_v57 = vor.u32 %v3798_v54, %v3371_v46 }
  0xde   :  { %874 = vst [vmem:[#allocation2 + $0x10] sm:$0xff] %v4342_v56 }
  0xdf   :  { %v577_v61 = vpop.f32.mrf.mxu2  ;;  %1918 = vmatpush.bf16.msrb.mxu2 %v3372_v57 }
  0xe0   :  { %v667_v2 = vadd.f32 %v666_v17, %v577_v61  ;;  %v4360_v3 = vpop.f32.mrf.mxu3  ;;  %v402_v4 = vpop.f32.mrf.mxu0  ;;  %v3147_v17 = vld [vmem:[%s5486_s2] sm:$0xf]  ;;  %v3796_v61 = vld [vmem:[%s5486_s2 + $0x1b4] sm:$0xf0] }
  0xe1   :  { %v4362_v5 = vpop.f32.mrf.mxu1  ;;  %v492_v15 = vadd.f32 %v4297_v20, %v402_v4  ;;  %v3024_v20 = vor.u32 %v3737_v12, %v3021_v13  ;;  %v3148_v25 = vor.u32 %v3742_v18, %v3147_v17  ;;  %v3794_v13 = vld [vmem:[%s5486_s2 + $0x1a4] sm:$0xf0]  ;;  %v3019_v17 = vld [vmem:[%s5485_s0 + $0xe0] sm:$0xf] }
  0xe2   :  { %v736_v6 = vmax.f32 %v489_v1, %v667_v2  ;;  %v3364_v1 = vor.u32 %v3796_v61, %v3363_v59 }
  0xe3   :  { %441 = vmatmul.bf16.gmra.mxu0 %v3004_v63  ;;  %1775 = vmatpush.bf16.msrb.mxu1 %v3148_v25  ;;  %v3347_v25 = vld [vmem:[%s5486_s2 + $0x190] sm:$0xf] }
  0xe4   :  { %768 = vst [vmem:[#allocation4 + $0x38] sm:$0xff] %v736_v6  ;;  %619 = vmatmul.bf16.gmra.mxu2 %v3004_v63  ;;  %v3739_v63 = vld [vmem:[%s5485_s0 + $0xf4] sm:$0xf]  ;;  %v3291_v6 = vld [vmem:[%s5486_s2 + $0x120] sm:$0xf] }
  0xe5   :  { %1919 = vmatpush.bf16.msrb.mxu2 %v3364_v1  ;;  %v3292_v12 = vor.u32 %v3778_v7, %v3291_v6 }
  0xe7   :  { %v580_v16 = vpop.f32.mrf.mxu2 }
  0xe8   :  { %v670_v21 = vadd.f32 %v669_v37, %v580_v16  ;;  %v4392_v22 = vpop.f32.mrf.mxu3  ;;  %v404_v23 = vpop.f32.mrf.mxu0  ;;  %v3315_v37 = vld [vmem:[%s5486_s2 + $0x150] sm:$0xf] }
  0xe9   :  { %v4397_v27 = vpop.f32.mrf.mxu1  ;;  %v3316_v40 = vor.u32 %v3784_v39, %v3315_v37  ;;  %v494_v47 = vadd.f32 %v4329_v41, %v404_v23  ;;  %v3299_v41 = vld [vmem:[%s5486_s2 + $0x130] sm:$0xf] }
  0xea   :  { %v737_v29 = vmax.f32 %v492_v15, %v670_v21  ;;  %v3356_v15 = vor.u32 %v3794_v13, %v3355_v8  ;;  %v3283_v21 = vld [vmem:[%s5486_s2 + $0x110] sm:$0xf] }
  0xeb   :  { %v799_v32 = vld [vmem:[#allocation4 + $0x30] ss:$2 sm:$0xff]  ;;  %v831_v33 = vld [vmem:[#allocation4 + $0x31] ss:$2 sm:$0xff]  ;;  %1868 = vmatpush.bf16.msrb.mxu0 %v3316_v40  ;;  %v1001_v40 = vld [vmem:[#allocation2 + $0x9] sm:$0xff] }
  0xec   :  { %v4408_v35 = vmax.f32 %v799_v32, %v831_v33  ;;  %769 = vst [vmem:[#allocation4 + $0x40] sm:$0xff] %v737_v29  ;;  %3127 = vmatmul.msk.bf16.gmra.mxu1 %vm324_vm0, %v3024_v20  ;;  %1920 = vmatpush.bf16.msrb.mxu2 %v3356_v15  ;;  %v3348_v29 = vor.u32 %v3792_v28, %v3347_v25  ;;  %v3275_v32 = vld [vmem:[%s5486_s2 + $0x100] sm:$0xf]  ;;  %v3774_v33 = vld [vmem:[%s5486_s2 + $0x104] sm:$0xf0] }
  0xed   :  { %3143 = vmatmul.msk.bf16.gmra.mxu3 %vm324_vm0, %v3024_v20  ;;  %v3776_v20 = vld [vmem:[%s5486_s2 + $0x114] sm:$0xf0] }
  0xee   :  { %875 = vst [vmem:[#allocation2 + $0x18] sm:$0xff] %v4408_v35  ;;  %v3284_v26 = vor.u32 %v3776_v20, %v3283_v21  ;;  %v1033_v21 = vld [vmem:[#allocation2 + $0xa] sm:$0xff] }
  0xef   :  { %v582_v42 = vpop.f32.mrf.mxu2  ;;  %1869 = vmatpush.bf16.msrb.mxu0 %v3308_v53 }
  0xf0   :  { %v672_v48 = vadd.f32 %v4338_v49, %v582_v42  ;;  %v4433_v50 = vpop.f32.mrf.mxu3  ;;  %v407_v51 = vpop.f32.mrf.mxu0  ;;  %v3780_v49 = vld [vmem:[%s5486_s2 + $0x134] sm:$0xf0]  ;;  %1921 = vmatpush.bf16.msrb.mxu2 %v3348_v29  ;;  %v3276_v42 = vor.u32 %v3774_v33, %v3275_v32 }
  0xf1   :  { %v4438_v55 = vpop.f32.mrf.mxu1  ;;  %v3300_v60 = vor.u32 %v3780_v49, %v3299_v41  ;;  %v497_v2 = vadd.f32 %v4340_v52, %v407_v51  ;;  %v3032_v52 = vor.u32 %v3739_v63, %v3029_v0 }
  0xf2   :  { %v738_v58 = vmax.f32 %v494_v47, %v672_v48  ;;  %v1000_v47 = vld [vmem:[#allocation2 + $0x1] sm:$0xff]  ;;  %v984_v48 = vpack.c.bf16 %v4270_v62, %v4270_v62 }
  0xf3   :  { %446 = vmatmul.bf16.gmra.mxu0 %v3012_v43  ;;  %v1016_v51 = vpack.c.bf16 %v1000_v47, %v1000_v47 }
  0xf4   :  { %770 = vst [vmem:[#allocation4 + $0x48] sm:$0xff] %v738_v58  ;;  %624 = vmatmul.bf16.gmra.mxu2 %v3012_v43  ;;  %1870 = vmatpush.bf16.msrb.mxu0 %v3300_v60  ;;  %v3790_v43 = vld [vmem:[%s5486_s2 + $0x184] sm:$0xf0]  ;;  %v1144_v59 = vunpack.c.l.b16 %v984_v48 }
  0xf5   :  { %v3340_v45 = vor.u32 %v3790_v43, %v3339_v34  ;;  %v1192_v61 = vunpack.c.l.b16 %v1016_v51  ;;  %v1049_v34 = vpack.c.bf16 %v1033_v21, %v1033_v21 }
  0xf7   :  { %v585_v4 = vpop.f32.mrf.mxu2  ;;  %1922 = vmatpush.bf16.msrb.mxu2 %v3340_v45 }
  0xf8   :  { %v675_v9 = vadd.f32 %v4360_v3, %v585_v4  ;;  %v4469_v10 = vpop.f32.mrf.mxu3  ;;  %v409_v11 = vpop.f32.mrf.mxu0  ;;  %v3738_v3 = vld [vmem:[%s5485_s0 + $0xe4] sm:$0xf0]  ;;  %1871 = vmatpush.bf16.msrb.mxu0 %v3292_v12  ;;  %v3740_v4 = vld [vmem:[%s5485_s0 + $0xf4] sm:$0xf0] }
  0xf9   :  { %v4474_v14 = vpop.f32.mrf.mxu1  ;;  %v3020_v31 = vor.u32 %v3738_v3, %v3019_v17  ;;  %v499_v36 = vadd.f32 %v4362_v5, %v409_v11  ;;  %v985_v5 = vpack.c.bf16 %v4299_v24, %v4299_v24  ;;  %v1002_v17 = vld [vmem:[#allocation2 + $0x11] sm:$0xff] }
  0xfa   :  { %v739_v16 = vmax.f32 %v497_v2, %v675_v9 }
  0xfb   :  { %v801_v18 = vld [vmem:[#allocation4 + $0x40] ss:$2 sm:$0xff]  ;;  %v833_v19 = vld [vmem:[#allocation4 + $0x41] ss:$2 sm:$0xff]  ;;  %v1145_v54 = vunpack.c.l.b16 %v985_v5 }
  0xfc   :  { %v4485_v23 = vmax.f32 %v801_v18, %v833_v19  ;;  %771 = vst [vmem:[#allocation4 + $0x50] sm:$0xff] %v739_v16  ;;  %3128 = vmatmul.msk.bf16.gmra.mxu1 %vm324_vm0, %v3032_v52  ;;  %1872 = vmatpush.bf16.msrb.mxu0 %v3284_v26  ;;  %v987_v16 = vpack.c.bf16 %v4408_v35, %v4408_v35  ;;  %v1065_v26 = vld [vmem:[#allocation2 + $0xb] sm:$0xff] }
  0xfd   :  { %3144 = vmatmul.msk.bf16.gmra.mxu3 %vm324_vm0, %v3032_v52  ;;  %v4527_v0 = vpack.c.b16 %v1145_v54, %v1144_v59  ;;  %v1018_v18 = vpack.c.bf16 %v1002_v17, %v1002_v17  ;;  %v1034_v17 = vld [vmem:[#allocation2 + $0x12] sm:$0xff] }
  0xfe   :  { %876 = vst [vmem:[#allocation2 + $0x20] sm:$0xff] %v4485_v23  ;;  %v1147_v19 = vunpack.c.l.b16 %v987_v16 }
  0xff   :  { %v587_v30 = vpop.f32.mrf.mxu2  ;;  %v1194_v33 = vunpack.c.l.b16 %v1018_v18 }
 0x100   :  { %v677_v37 = vadd.f32 %v4392_v22, %v587_v30  ;;  %v4510_v38 = vpop.f32.mrf.mxu3  ;;  %v412_v39 = vpop.f32.mrf.mxu0  ;;  %v1017_v22 = vpack.c.bf16 %v1001_v40, %v1001_v40  ;;  %1873 = vmatpush.bf16.msrb.mxu0 %v3276_v42 }
 0x101   :  { %v4515_v44 = vpop.f32.mrf.mxu1  ;;  %v502_v53 = vadd.f32 %v4397_v27, %v412_v39 }
 0x102   :  { %v740_v46 = vmax.f32 %v499_v36, %v677_v37  ;;  %v1193_v58 = vunpack.c.l.b16 %v1017_v22 }
 0x103   :  { %451 = vmatmul.bf16.gmra.mxu0 %v3020_v31 }
 0x104   :  { %772 = vst [vmem:[#allocation4 + $0x58] sm:$0xff] %v740_v46  ;;  %629 = vmatmul.bf16.gmra.mxu2 %v3020_v31  ;;  %v4529_v2 = vpack.c.b16 %v1193_v58, %v1192_v61  ;;  %v1032_v31 = vld [vmem:[#allocation2 + $0x2] sm:$0xff]  ;;  %v1241_v46 = vunpack.c.l.b16 %v1049_v34 }
 0x105   :  { %v1003_v12 = vld [vmem:[#allocation2 + $0x19] sm:$0xff]  ;;  %v1048_v43 = vpack.c.bf16 %v1032_v31, %v1032_v31 }
 0x106   :  { %v1019_v3 = vpack.c.bf16 %v1003_v12, %v1003_v12  ;;  %v3205_v31 = vld [vmem:[%s5486_s2 + $0x78] sm:$0xf0] }
 0x107   :  { %v590_v57 = vpop.f32.mrf.mxu2  ;;  %v1240_v22 = vunpack.c.l.b16 %v1048_v43 }
 0x108   :  { %v680_v41 = vadd.f32 %v4433_v50, %v590_v57  ;;  %v4523_v49 = vpop.f32.mrf.mxu3  ;;  %v414_v24 = vpop.f32.mrf.mxu0  ;;  %v3027_v50 = vld [vmem:[%s5485_s0 + $0xf0] sm:$0xf]  ;;  %v1195_v25 = vunpack.c.l.b16 %v1019_v3 }
 0x109   :  { %v4525_v60 = vpop.f32.mrf.mxu1  ;;  %v3028_v7 = vor.u32 %v3740_v4, %v3027_v50  ;;  %v504_v8 = vadd.f32 %v4438_v55, %v414_v24  ;;  %v986_v55 = vpack.c.bf16 %v4342_v56, %v4342_v56  ;;  %v1064_v56 = vld [vmem:[#allocation2 + $0x3] sm:$0xff] }
 0x10a   :  { %v741_v63 = vmax.f32 %v502_v53, %v680_v41  ;;  %v4560_v42 = vpack.c.b16 %v1195_v25, %v1194_v33  ;;  %v1080_v45 = vpack.c.bf16 %v1064_v56, %v1064_v56  ;;  %v4573_v41 = vpack.c.b16 %v1241_v46, %v1240_v22 }
 0x10b   :  { %v803_v62 = vld [vmem:[#allocation4 + $0x50] ss:$2 sm:$0xff]  ;;  %v835_v1 = vld [vmem:[#allocation4 + $0x51] ss:$2 sm:$0xff]  ;;  %v1146_v30 = vunpack.c.l.b16 %v986_v55 }
 0x10c   :  { %v4531_v27 = vmax.f32 %v803_v62, %v835_v1  ;;  %773 = vst [vmem:[#allocation4 + $0x60] sm:$0xff] %v741_v63  ;;  %1776 = vmatmul.bf16.vlgmr.msrb.gmra.mxu1 %v4527_v0  ;;  %v1288_v57 = vunpack.c.l.b16 %v1080_v45  ;;  %v1066_v55 = vld [vmem:[#allocation2 + $0x13] sm:$0xff] }
 0x10d   :  { %1825 = vmatmul.bf16.vlgmr.msrb.gmra.mxu3 %v4529_v2  ;;  %v4558_v37 = vpack.c.b16 %v1147_v19, %v1146_v30  ;;  %v3755_v30 = vld [vmem:[%s5486_s2 + $0x74] sm:$0xf] }
 0x10e   :  { %877 = vst [vmem:[#allocation2 + $0x28] sm:$0xff] %v4531_v27  ;;  %v989_v63 = vpack.c.bf16 %v4531_v27, %v4531_v27  ;;  %v3208_v56 = vor.u32 %v3755_v30, %v3205_v31 }
 0x10f   :  { %v592_v6 = vpop.f32.mrf.mxu2 }
 0x110   :  { %v682_v9 = vadd.f32 %v4469_v10, %v592_v6  ;;  %v4544_v11 = vpop.f32.mrf.mxu3  ;;  %v417_v52 = vpop.f32.mrf.mxu0  ;;  %v1149_v50 = vunpack.c.l.b16 %v989_v63  ;;  %v1035_v6 = vld [vmem:[#allocation2 + $0x1a] sm:$0xff]  ;;  %2013 = vmatpush.bf16.msra.mxu3 %v3208_v56 }
 0x111   :  { %v4546_v13 = vpop.f32.mrf.mxu1  ;;  %v507_v10 = vadd.f32 %v4474_v14, %v417_v52  ;;  %v1081_v14 = vpack.c.bf16 %v1065_v26, %v1065_v26  ;;  %v1082_v26 = vpack.c.bf16 %v1066_v55, %v1066_v55 }
 0x112   :  { %v742_v15 = vmax.f32 %v504_v8, %v682_v9  ;;  %v1067_v8 = vld [vmem:[#allocation2 + $0x1b] sm:$0xff] }
 0x113   :  { %456 = vmatmul.bf16.gmra.mxu0 %v3028_v7  ;;  %v1289_v5 = vunpack.c.l.b16 %v1081_v14  ;;  %v1083_v19 = vpack.c.bf16 %v1067_v8, %v1067_v8  ;;  %v1290_v43 = vunpack.c.l.b16 %v1082_v26 }
 0x114   :  { %774 = vst [vmem:[#allocation4 + $0x68] sm:$0xff] %v742_v15  ;;  %634 = vmatmul.bf16.gmra.mxu2 %v3028_v7 }
 0x115   :  { %v1004_v24 = vld [vmem:[#allocation2 + $0x21] sm:$0xff]  ;;  %v4575_v61 = vpack.c.b16 %v1289_v5, %v1288_v57 }
 0x117   :  { %v595_v20 = vpop.f32.mrf.mxu2 }
 0x118   :  { %v685_v28 = vadd.f32 %v4510_v38, %v595_v20  ;;  %v4554_v29 = vpop.f32.mrf.mxu3  ;;  %v419_v35 = vpop.f32.mrf.mxu0 }
 0x119   :  { %v4556_v32 = vpop.f32.mrf.mxu1  ;;  %v509_v48 = vadd.f32 %v4515_v44, %v419_v35  ;;  %v988_v44 = vpack.c.bf16 %v4485_v23, %v4485_v23  ;;  %v1051_v23 = vpack.c.bf16 %v1035_v6, %v1035_v6  ;;  %v1291_v35 = vunpack.c.l.b16 %v1083_v19  ;;  %v3197_v19 = vld [vmem:[%s5486_s2 + $0x68] sm:$0xf0] }
 0x11a   :  { %v743_v36 = vmax.f32 %v507_v10, %v685_v28 }
 0x11b   :  { %v805_v39 = vld [vmem:[#allocation4 + $0x60] ss:$2 sm:$0xff]  ;;  %v837_v40 = vld [vmem:[#allocation4 + $0x61] ss:$2 sm:$0xff]  ;;  %v1148_v12 = vunpack.c.l.b16 %v988_v44  ;;  %v1243_v28 = vunpack.c.l.b16 %v1051_v23 }
 0x11c   :  { %v4562_v38 = vmax.f32 %v805_v39, %v837_v40  ;;  %775 = vst [vmem:[#allocation4 + $0x70] sm:$0xff] %v743_v36  ;;  %1781 = vmatmul.bf16.gmra.mxu1 %v4558_v37 }
 0x11d   :  { %1830 = vmatmul.bf16.gmra.mxu3 %v4560_v42 }
 0x11e   :  { %878 = vst [vmem:[#allocation2 + $0x30] sm:$0xff] %v4562_v38 }
 0x11f   :  { %v597_v47 = vpop.f32.mrf.mxu2 }
 0x120   :  { %v687_v51 = vadd.f32 %v4523_v49, %v597_v47  ;;  %v4569_v53 = vpop.f32.mrf.mxu3  ;;  %v422_v54 = vpop.f32.mrf.mxu0  ;;  %v1020_v49 = vpack.c.bf16 %v1004_v24, %v1004_v24  ;;  %v4609_v47 = vpack.c.b16 %v1291_v35, %v1290_v43 }
 0x121   :  { %v4571_v58 = vpop.f32.mrf.mxu1  ;;  %v512_v1 = vadd.f32 %v4525_v60, %v422_v54  ;;  %v4589_v60 = vpack.c.b16 %v1149_v50, %v1148_v12  ;;  %v1068_v50 = vld [vmem:[#allocation2 + $0x23] sm:$0xff] }
 0x122   :  { %v744_v59 = vmax.f32 %v509_v48, %v687_v51  ;;  %v1196_v15 = vunpack.c.l.b16 %v1020_v49  ;;  %v1036_v49 = vld [vmem:[#allocation2 + $0x22] sm:$0xff] }
 0x123   :  { %1874 = vmatmul.bf16.vlgmr.msrb.gmra.mxu0 %v4573_v41  ;;  %v1052_v8 = vpack.c.bf16 %v1036_v49, %v1036_v49 }
 0x124   :  { %776 = vst [vmem:[#allocation4 + $0x78] sm:$0xff] %v744_v59  ;;  %1923 = vmatmul.bf16.vlgmr.msrb.gmra.mxu2 %v4575_v61 }
 0x125   :  { %v1005_v62 = vld [vmem:[#allocation2 + $0x29] sm:$0xff]  ;;  %v1244_v23 = vunpack.c.l.b16 %v1052_v8 }
 0x126   :  { %v1021_v4 = vpack.c.bf16 %v1005_v62, %v1005_v62  ;;  %v1037_v51 = vld [vmem:[#allocation2 + $0x2a] sm:$0xff] }
 0x127   :  { %v600_v7 = vpop.f32.mrf.mxu2  ;;  %v1069_v57 = vld [vmem:[#allocation2 + $0x2b] sm:$0xff] }
 0x128   :  { %v690_v9 = vadd.f32 %v4544_v11, %v600_v7  ;;  %v4585_v27 = vpop.f32.mrf.mxu3  ;;  %v424_v52 = vpop.f32.mrf.mxu0  ;;  %v1197_v16 = vunpack.c.l.b16 %v1021_v4  ;;  %v1050_v11 = vpack.c.bf16 %v1034_v17, %v1034_v17 }
 0x129   :  { %v4587_v3 = vpop.f32.mrf.mxu1  ;;  %v514_v36 = vadd.f32 %v4546_v13, %v424_v52  ;;  %v990_v13 = vpack.c.bf16 %v4562_v38, %v4562_v38  ;;  %v1085_v38 = vpack.c.bf16 %v1069_v57, %v1069_v57 }
 0x12a   :  { %v745_v18 = vmax.f32 %v512_v1, %v690_v9  ;;  %v4591_v10 = vpack.c.b16 %v1197_v16, %v1196_v15  ;;  %v1242_v34 = vunpack.c.l.b16 %v1050_v11  ;;  %v1053_v1 = vpack.c.bf16 %v1037_v51, %v1037_v51  ;;  %v3459_v15 = vld [vmem:[%s5486_s2 + $0x270] sm:$0xf]  ;;  %v3820_v16 = vld [vmem:[%s5486_s2 + $0x274] sm:$0xf0] }
 0x12b   :  { %v807_v21 = vld [vmem:[#allocation4 + $0x70] ss:$2 sm:$0xff]  ;;  %v839_v20 = vld [vmem:[#allocation4 + $0x71] ss:$2 sm:$0xff]  ;;  %v1150_v44 = vunpack.c.l.b16 %v990_v13  ;;  %v1293_v12 = vunpack.c.l.b16 %v1085_v38  ;;  %v3460_v55 = vor.u32 %v3820_v16, %v3459_v15 }
 0x12c   :  { %v863_v25 = vmax.f32 %v807_v21, %v839_v20  ;;  %777 = vst [vmem:[#allocation4 + $0x80] sm:$0xff] %v745_v18  ;;  %1786 = vmatmul.bf16.gmra.mxu1 %v4589_v60  ;;  %v4607_v46 = vpack.c.b16 %v1243_v28, %v1242_v34  ;;  %v1245_v52 = vunpack.c.l.b16 %v1053_v1  ;;  %v3753_v18 = vld [vmem:[%s5486_s2 + $0x64] sm:$0xf] }
 0x12d   :  { %1835 = vmatmul.bf16.gmra.mxu3 %v4591_v10  ;;  %v3200_v28 = vor.u32 %v3753_v18, %v3197_v19  ;;  %1964 = vmatpush.bf16.msra.mxu1 %v3460_v55  ;;  %v3189_v55 = vld [vmem:[%s5486_s2 + $0x58] sm:$0xf0] }
 0x12e   :  { %879 = vst [vmem:[#allocation2 + $0x38] sm:$0xff] %v863_v25  ;;  %v991_v22 = vpack.c.bf16 %v863_v25, %v863_v25  ;;  %v4645_v30 = vpack.c.b16 %v1245_v52, %v1244_v23  ;;  %v3818_v52 = vld [vmem:[%s5486_s2 + $0x264] sm:$0xf0]  ;;  %v3751_v23 = vld [vmem:[%s5486_s2 + $0x54] sm:$0xf] }
 0x12f   :  { %v602_v33 = vpop.f32.mrf.mxu2  ;;  %2014 = vmatpush.bf16.msra.mxu3 %v3200_v28 }
 0x130   :  { %v692_v14 = vadd.f32 %v4554_v29, %v602_v33  ;;  %v4603_v39 = vpop.f32.mrf.mxu3  ;;  %v427_v40 = vpop.f32.mrf.mxu0  ;;  %v1151_v48 = vunpack.c.l.b16 %v991_v22 }
 0x131   :  { %v4605_v45 = vpop.f32.mrf.mxu1  ;;  %v517_v29 = vadd.f32 %v4556_v32, %v427_v40 }
 0x132   :  { %v746_v5 = vmax.f32 %v514_v36, %v692_v14  ;;  %v4621_v6 = vpack.c.b16 %v1151_v48, %v1150_v44 }
 0x133   :  { %1879 = vmatmul.bf16.gmra.mxu0 %v4607_v46 }
 0x134   :  { %778 = vst [vmem:[#allocation4 + $0x88] sm:$0xff] %v746_v5  ;;  %1928 = vmatmul.bf16.gmra.mxu2 %v4609_v47 }
 0x135   :  { %v1006_v31 = vld [vmem:[#allocation2 + $0x31] sm:$0xff] }
 0x136   :  { %v1038_v51 = vld [vmem:[#allocation2 + $0x32] sm:$0xff] }
 0x137   :  { %v605_v54 = vpop.f32.mrf.mxu2 }
 0x138   :  { %v695_v24 = vadd.f32 %v4569_v53, %v605_v54  ;;  %v4617_v59 = vpop.f32.mrf.mxu3  ;;  %v429_v63 = vpop.f32.mrf.mxu0  ;;  %v1084_v53 = vpack.c.bf16 %v1068_v50, %v1068_v50  ;;  %v1070_v54 = vld [vmem:[#allocation2 + $0x33] sm:$0xff]  ;;  %v1054_v50 = vpack.c.bf16 %v1038_v51, %v1038_v51 }
 0x139   :  { %v4619_v62 = vpop.f32.mrf.mxu1  ;;  %v519_v21 = vadd.f32 %v4571_v58, %v429_v63  ;;  %v1022_v58 = vpack.c.bf16 %v1006_v31, %v1006_v31 }
 0x13a   :  { %v747_v4 = vmax.f32 %v517_v29, %v695_v24  ;;  %v1292_v26 = vunpack.c.l.b16 %v1084_v53  ;;  %v3451_v53 = vld [vmem:[%s5486_s2 + $0x260] sm:$0xf]  ;;  %v1246_v15 = vunpack.c.l.b16 %v1054_v50 }
 0x13b   :  { %v809_v32 = vld [vmem:[#allocation4 + $0x80] ss:$2 sm:$0xff]  ;;  %v841_v7 = vld [vmem:[#allocation4 + $0x81] ss:$2 sm:$0xff]  ;;  %v1198_v29 = vunpack.c.l.b16 %v1022_v58 }
 0x13c   :  { %v4623_v9 = vmax.f32 %v809_v32, %v841_v7  ;;  %779 = vst [vmem:[#allocation4 + $0x90] sm:$0xff] %v747_v4  ;;  %1791 = vmatmul.bf16.gmra.mxu1 %v4621_v6  ;;  %v4647_v34 = vpack.c.b16 %v1293_v12, %v1292_v26  ;;  %v1086_v4 = vpack.c.bf16 %v1070_v54, %v1070_v54  ;;  %v3749_v54 = vld [vmem:[%s5486_s2 + $0x44] sm:$0xf] }
 0x13d   :  { %v3192_v26 = vor.u32 %v3751_v23, %v3189_v55 }
 0x13e   :  { %880 = vst [vmem:[#allocation2 + $0x40] sm:$0xff] %v4623_v9  ;;  %v1294_v16 = vunpack.c.l.b16 %v1086_v4 }
 0x13f   :  { %v607_v17 = vpop.f32.mrf.mxu2  ;;  %2015 = vmatpush.bf16.msra.mxu3 %v3192_v26 }
 0x140   :  { %v697_v20 = vadd.f32 %v4585_v27, %v607_v17  ;;  %v4641_v11 = vpop.f32.mrf.mxu3  ;;  %v432_v25 = vpop.f32.mrf.mxu0  ;;  %v3452_v17 = vor.u32 %v3818_v52, %v3451_v53 }
 0x141   :  { %v4643_v35 = vpop.f32.mrf.mxu1  ;;  %v522_v56 = vadd.f32 %v4587_v3, %v432_v25 }
 0x142   :  { %v748_v33 = vmax.f32 %v519_v21, %v697_v20  ;;  %1965 = vmatpush.bf16.msra.mxu1 %v3452_v17 }
 0x143   :  { %1884 = vmatmul.bf16.gmra.mxu0 %v4645_v30 }
 0x144   :  { %780 = vst [vmem:[#allocation4 + $0x98] sm:$0xff] %v748_v33  ;;  %1933 = vmatmul.bf16.gmra.mxu2 %v4647_v34 }
 0x145   :  { %v1007_v27 = vld [vmem:[#allocation2 + $0x39] sm:$0xff] }
 0x146   :  { %v1023_v36 = vpack.c.bf16 %v1007_v27, %v1007_v27  ;;  %v1039_v14 = vld [vmem:[#allocation2 + $0x3a] sm:$0xff] }
 0x147   :  { %v610_v40 = vpop.f32.mrf.mxu2  ;;  %v1071_v43 = vld [vmem:[#allocation2 + $0x3b] sm:$0xff]  ;;  %v1055_v24 = vpack.c.bf16 %v1039_v14, %v1039_v14 }
 0x148   :  { %v700_v5 = vadd.f32 %v4603_v39, %v610_v40  ;;  %v4653_v22 = vpop.f32.mrf.mxu3  ;;  %v434_v13 = vpop.f32.mrf.mxu0  ;;  %v1199_v48 = vunpack.c.l.b16 %v1023_v36  ;;  %v1087_v3 = vpack.c.bf16 %v1071_v43, %v1071_v43  ;;  %v992_v39 = vpack.c.bf16 %v4623_v9, %v4623_v9 }
 0x149   :  { %v4655_v57 = vpop.f32.mrf.mxu1  ;;  %v1247_v32 = vunpack.c.l.b16 %v1055_v24  ;;  %v524_v18 = vadd.f32 %v4605_v45, %v434_v13  ;;  %v3181_v24 = vld [vmem:[%s5486_s2 + $0x48] sm:$0xf0] }
 0x14a   :  { %v749_v63 = vmax.f32 %v522_v56, %v700_v5  ;;  %v4657_v44 = vpack.c.b16 %v1199_v48, %v1198_v29  ;;  %v1295_v7 = vunpack.c.l.b16 %v1087_v3  ;;  %v1152_v9 = vunpack.c.l.b16 %v992_v39  ;;  %v3443_v48 = vld [vmem:[%s5486_s2 + $0x250] sm:$0xf] }
 0x14b   :  { %v811_v49 = vld [vmem:[#allocation4 + $0x90] ss:$2 sm:$0xff]  ;;  %v843_v1 = vld [vmem:[#allocation4 + $0x91] ss:$2 sm:$0xff]  ;;  %v4678_v31 = vpack.c.b16 %v1247_v32, %v1246_v15 }
 0x14c   :  { %v865_v38 = vmax.f32 %v811_v49, %v843_v1  ;;  %781 = vst [vmem:[#allocation4 + $0xa0] sm:$0xff] %v749_v63  ;;  %1840 = vmatmul.bf16.gmra.mxu3 %v4657_v44  ;;  %v4680_v58 = vpack.c.b16 %v1295_v7, %v1294_v16 }
 0x14e   :  { %881 = vst [vmem:[#allocation2 + $0x48] sm:$0xff] %v865_v38  ;;  %v993_v8 = vpack.c.bf16 %v865_v38, %v865_v38  ;;  %v3184_v38 = vor.u32 %v3749_v54, %v3181_v24  ;;  %v3814_v54 = vld [vmem:[%s5486_s2 + $0x244] sm:$0xf0] }
 0x14f   :  { %v612_v12 = vpop.f32.mrf.mxu2 }
 0x150   :  { %v702_v19 = vadd.f32 %v4617_v59, %v612_v12  ;;  %v709_v21 = vpop.f32.mrf.mxu3  ;;  %v437_v20 = vpop.f32.mrf.mxu0  ;;  %v1153_v25 = vunpack.c.l.b16 %v993_v8  ;;  %2016 = vmatpush.bf16.msra.mxu3 %v3184_v38 }
 0x151   :  { %v4676_v28 = vpop.f32.mrf.mxu1  ;;  %v527_v45 = vadd.f32 %v4619_v62, %v437_v20  ;;  %v3816_v62 = vld [vmem:[%s5486_s2 + $0x254] sm:$0xf0] }
 0x152   :  { %v750_v33 = vmax.f32 %v524_v18, %v702_v19  ;;  %v4682_v27 = vpack.c.b16 %v1153_v25, %v1152_v9  ;;  %v3444_v51 = vor.u32 %v3816_v62, %v3443_v48 }
 0x153   :  { %1889 = vmatmul.bf16.gmra.mxu0 %v4678_v31 }
 0x154   :  { %782 = vst [vmem:[#allocation4 + $0xa8] sm:$0xff] %v750_v33  ;;  %1938 = vmatmul.bf16.gmra.mxu2 %v4680_v58  ;;  %1796 = vmatmul.bf16.gmra.mxu1 %v4682_v27 }
 0x155   :  { %v1008_v50 = vld [vmem:[#allocation2 + $0x41] sm:$0xff]  ;;  %1966 = vmatpush.bf16.msra.mxu1 %v3444_v51 }
 0x156   :  { %v1040_v4 = vld [vmem:[#allocation2 + $0x42] sm:$0xff]  ;;  %v1024_v8 = vpack.c.bf16 %v1008_v50, %v1008_v50 }
 0x157   :  { %v615_v59 = vpop.f32.mrf.mxu2  ;;  %v1072_v39 = vld [vmem:[#allocation2 + $0x43] sm:$0xff]  ;;  %v1056_v53 = vpack.c.bf16 %v1040_v4, %v1040_v4 }
 0x158   :  { %v705_v56 = vadd.f32 %v4641_v11, %v615_v59  ;;  %v4689_v36 = vpop.f32.mrf.mxu3  ;;  %v439_v14 = vpop.f32.mrf.mxu0  ;;  %v1088_v52 = vpack.c.bf16 %v1072_v39, %v1072_v39  ;;  %v1200_v55 = vunpack.c.l.b16 %v1024_v8  ;;  %v3435_v51 = vld [vmem:[%s5486_s2 + $0x240] sm:$0xf] }
 0x159   :  { %v4691_v40 = vpop.f32.mrf.mxu1  ;;  %v529_v63 = vadd.f32 %v4643_v35, %v439_v14  ;;  %v1248_v18 = vunpack.c.l.b16 %v1056_v53 }
 0x15a   :  { %v751_v43 = vmax.f32 %v527_v45, %v705_v56  ;;  %v1296_v19 = vunpack.c.l.b16 %v1088_v52 }
 0x15b   :  { %v813_v5 = vld [vmem:[#allocation4 + $0xa0] ss:$2 sm:$0xff]  ;;  %v845_v13 = vld [vmem:[#allocation4 + $0xa1] ss:$2 sm:$0xff] }
 0x15c   :  { %v866_v29 = vmax.f32 %v813_v5, %v845_v13  ;;  %783 = vst [vmem:[#allocation4 + $0xb0] sm:$0xff] %v751_v43 }
 0x15e   :  { %882 = vst [vmem:[#allocation2 + $0x50] sm:$0xff] %v866_v29  ;;  %v994_v62 = vpack.c.bf16 %v866_v29, %v866_v29 }
 0x15f   :  { %v617_v11 = vpop.f32.mrf.mxu2 }
 0x160   :  { %v707_v3 = vadd.f32 %v4653_v22, %v617_v11  ;;  %v4707_v49 = vpop.f32.mrf.mxu3  ;;  %v442_v1 = vpop.f32.mrf.mxu0  ;;  %v1154_v29 = vunpack.c.l.b16 %v994_v62 }
 0x161   :  { %v4709_v32 = vpop.f32.mrf.mxu1  ;;  %v532_v22 = vadd.f32 %v4655_v57, %v442_v1  ;;  %v3173_v1 = vld [vmem:[%s5486_s2 + $0x38] sm:$0xf0] }
 0x162   :  { %v752_v7 = vmax.f32 %v529_v63, %v707_v3  ;;  %v3436_v63 = vor.u32 %v3814_v54, %v3435_v51  ;;  %v3747_v3 = vld [vmem:[%s5486_s2 + $0x34] sm:$0xf] }
 0x163   :  { %v3176_v8 = vor.u32 %v3747_v3, %v3173_v1 }
 0x164   :  { %784 = vst [vmem:[#allocation4 + $0xb8] sm:$0xff] %v752_v7  ;;  %1967 = vmatpush.bf16.msra.mxu1 %v3436_v63 }
 0x165   :  { %v1009_v12 = vld [vmem:[#allocation2 + $0x49] sm:$0xff]  ;;  %2017 = vmatpush.bf16.msra.mxu3 %v3176_v8 }
 0x166   :  { %v1041_v35 = vld [vmem:[#allocation2 + $0x4a] sm:$0xff]  ;;  %v1025_v16 = vpack.c.bf16 %v1009_v12, %v1009_v12 }
 0x167   :  { %v1073_v15 = vld [vmem:[#allocation2 + $0x4b] sm:$0xff]  ;;  %v1057_v9 = vpack.c.bf16 %v1041_v35, %v1041_v35  ;;  %v620_v23 = vpop.f32.mrf.mxu2 }
 0x168   :  { %v1089_v17 = vpack.c.bf16 %v1073_v15, %v1073_v15  ;;  %v710_v20 = vadd.f32 %v709_v21, %v620_v23  ;;  %v716_v25 = vpop.f32.mrf.mxu3  ;;  %v444_v26 = vpop.f32.mrf.mxu0  ;;  %v1201_v33 = vunpack.c.l.b16 %v1025_v16 }
 0x169   :  { %v1249_v45 = vunpack.c.l.b16 %v1057_v9  ;;  %v4712_v56 = vpop.f32.mrf.mxu1  ;;  %v534_v50 = vadd.f32 %v4676_v28, %v444_v26  ;;  %v3165_v26 = vld [vmem:[%s5486_s2 + $0x28] sm:$0xf0] }
 0x16a   :  { %v1297_v59 = vunpack.c.l.b16 %v1089_v17  ;;  %v753_v14 = vmax.f32 %v532_v22, %v710_v20  ;;  %v4714_v43 = vpack.c.b16 %v1201_v33, %v1200_v55  ;;  %v3745_v20 = vld [vmem:[%s5486_s2 + $0x24] sm:$0xf] }
 0x16b   :  { %v4716_v5 = vpack.c.b16 %v1249_v45, %v1248_v18  ;;  %v815_v13 = vld [vmem:[#allocation4 + $0xb0] ss:$2 sm:$0xff]  ;;  %v847_v48 = vld [vmem:[#allocation4 + $0xb1] ss:$2 sm:$0xff] }
 0x16c   :  { %v4718_v57 = vpack.c.b16 %v1297_v59, %v1296_v19  ;;  %v867_v11 = vmax.f32 %v815_v13, %v847_v48  ;;  %785 = vst [vmem:[#allocation4 + $0xc0] sm:$0xff] %v753_v14  ;;  %1845 = vmatmul.bf16.gmra.mxu3 %v4714_v43 }
 0x16d   :  { %1894 = vmatmul.bf16.gmra.mxu0 %v4716_v5 }
 0x16e   :  { %1943 = vmatmul.bf16.gmra.mxu2 %v4718_v57  ;;  %883 = vst [vmem:[#allocation2 + $0x58] sm:$0xff] %v867_v11  ;;  %v995_v21 = vpack.c.bf16 %v867_v11, %v867_v11  ;;  %v3168_v11 = vor.u32 %v3745_v20, %v3165_v26 }
 0x16f   :  { %v622_v24 = vpop.f32.mrf.mxu2 }
 0x170   :  { %v712_v4 = vadd.f32 %v4689_v36, %v622_v24  ;;  %v719_v39 = vpop.f32.mrf.mxu3  ;;  %v447_v38 = vpop.f32.mrf.mxu0  ;;  %v1155_v7 = vunpack.c.l.b16 %v995_v21  ;;  %2018 = vmatpush.bf16.msra.mxu3 %v3168_v11  ;;  %v3810_v11 = vld [vmem:[%s5486_s2 + $0x224] sm:$0xf0] }
 0x171   :  { %v4737_v53 = vpop.f32.mrf.mxu1  ;;  %v537_v35 = vadd.f32 %v4691_v40, %v447_v38  ;;  %v3427_v40 = vld [vmem:[%s5486_s2 + $0x230] sm:$0xf] }
 0x172   :  { %v754_v52 = vmax.f32 %v534_v50, %v712_v4  ;;  %v4739_v12 = vpack.c.b16 %v1155_v7, %v1154_v29 }
 0x174   :  { %786 = vst [vmem:[#allocation4 + $0xc8] sm:$0xff] %v754_v52  ;;  %1801 = vmatmul.bf16.gmra.mxu1 %v4739_v12 }
 0x175   :  { %v1010_v13 = vld [vmem:[#allocation2 + $0x51] sm:$0xff] }
 0x176   :  { %v1042_v48 = vld [vmem:[#allocation2 + $0x52] sm:$0xff]  ;;  %v1026_v54 = vpack.c.bf16 %v1010_v13, %v1010_v13  ;;  %v3333_v13 = vld [vmem:[%s5486_s2 + $0x178] sm:$0xf0] }
 0x177   :  { %v625_v15 = vpop.f32.mrf.mxu2  ;;  %v1074_v62 = vld [vmem:[#allocation2 + $0x53] sm:$0xff]  ;;  %v1058_v24 = vpack.c.bf16 %v1042_v48, %v1042_v48 }
 0x178   :  { %v715_v28 = vadd.f32 %v4707_v49, %v625_v15  ;;  %v4744_v36 = vpop.f32.mrf.mxu3  ;;  %v449_v22 = vpop.f32.mrf.mxu0  ;;  %v3812_v49 = vld [vmem:[%s5486_s2 + $0x234] sm:$0xf0]  ;;  %v1090_v29 = vpack.c.bf16 %v1074_v62, %v1074_v62  ;;  %v1202_v7 = vunpack.c.l.b16 %v1026_v54  ;;  %v3419_v62 = vld [vmem:[%s5486_s2 + $0x220] sm:$0xf] }
 0x179   :  { %v4746_v16 = vpop.f32.mrf.mxu1  ;;  %v3428_v19 = vor.u32 %v3812_v49, %v3427_v40  ;;  %v539_v33 = vadd.f32 %v4709_v32, %v449_v22  ;;  %v1250_v8 = vunpack.c.l.b16 %v1058_v24 }
 0x17a   :  { %v755_v9 = vmax.f32 %v537_v35, %v715_v28  ;;  %v1298_v52 = vunpack.c.l.b16 %v1090_v29  ;;  %v3420_v29 = vor.u32 %v3810_v11, %v3419_v62  ;;  %v3765_v62 = vld [vmem:[%s5486_s2 + $0xc4] sm:$0xf]  ;;  %v3245_v11 = vld [vmem:[%s5486_s2 + $0xc8] sm:$0xf0] }
 0x17b   :  { %v817_v17 = vld [vmem:[#allocation4 + $0xc0] ss:$2 sm:$0xff]  ;;  %v849_v23 = vld [vmem:[#allocation4 + $0xc1] ss:$2 sm:$0xff]  ;;  %1968 = vmatpush.bf16.msra.mxu1 %v3428_v19 }
 0x17c   :  { %v4748_v55 = vmax.f32 %v817_v17, %v849_v23  ;;  %787 = vst [vmem:[#allocation4 + $0xd0] sm:$0xff] %v755_v9 }
 0x17e   :  { %884 = vst [vmem:[#allocation2 + $0x60] sm:$0xff] %v4748_v55  ;;  %v996_v26 = vpack.c.bf16 %v4748_v55, %v4748_v55 }
 0x17f   :  { %v627_v18 = vpop.f32.mrf.mxu2  ;;  %1969 = vmatpush.bf16.msra.mxu1 %v3420_v29 }
 0x180   :  { %v717_v45 = vadd.f32 %v716_v25, %v627_v18  ;;  %v4764_v59 = vpop.f32.mrf.mxu3  ;;  %v452_v14 = vpop.f32.mrf.mxu0  ;;  %v1156_v24 = vunpack.c.l.b16 %v996_v26  ;;  %v3253_v26 = vld [vmem:[%s5486_s2 + $0xd8] sm:$0xf0] }
 0x181   :  { %v4766_v21 = vpop.f32.mrf.mxu1  ;;  %v542_v25 = vadd.f32 %v4712_v56, %v452_v14  ;;  %v3787_v14 = vld [vmem:[%s5486_s2 + $0x174] sm:$0xf] }
 0x182   :  { %v756_v51 = vmax.f32 %v539_v33, %v717_v45  ;;  %v3269_v45 = vld [vmem:[%s5486_s2 + $0xf8] sm:$0xf0] }
 0x184   :  { %788 = vst [vmem:[#allocation4 + $0xd8] sm:$0xff] %v756_v51  ;;  %v3336_v51 = vor.u32 %v3787_v14, %v3333_v13  ;;  %v3881_v14 = vmov 0.0  }
 0x185   :  { %v1011_v63 = vld [vmem:[#allocation2 + $0x59] sm:$0xff]  ;;  %27 = vst [vmem:[#allocation2 + $0x80] sm:$0xff] %v3881_v14 }
 0x186   :  { %v1043_v3 = vld [vmem:[#allocation2 + $0x5a] sm:$0xff]  ;;  %v1027_v1 = vpack.c.bf16 %v1011_v63, %v1011_v63  ;;  %v3743_v63 = vld [vmem:[%s5486_s2 + $0x14] sm:$0xf]  ;;  %2111 = vmatpush.bf16.msra.mxu2 %v3336_v51  ;;  %v3781_v51 = vld [vmem:[%s5486_s2 + $0x144] sm:$0xf] }
 0x187   :  { %v1075_v32 = vld [vmem:[#allocation2 + $0x5b] sm:$0xff]  ;;  %v1059_v50 = vpack.c.bf16 %v1043_v3, %v1043_v3  ;;  %v630_v38 = vpop.f32.mrf.mxu2 }
 0x188   :  { %v1091_v4 = vpack.c.bf16 %v1075_v32, %v1075_v32  ;;  %v720_v35 = vadd.f32 %v719_v39, %v630_v38  ;;  %v4769_v15 = vpop.f32.mrf.mxu3  ;;  %v454_v28 = vpop.f32.mrf.mxu0  ;;  %v1203_v22 = vunpack.c.l.b16 %v1027_v1  ;;  %v3771_v39 = vld [vmem:[%s5486_s2 + $0xf4] sm:$0xf]  ;;  %v3157_v3 = vld [vmem:[%s5486_s2 + $0x18] sm:$0xf0]  ;;  %v3769_v32 = vld [vmem:[%s5486_s2 + $0xe4] sm:$0xf] }
 0x189   :  { %v1251_v9 = vunpack.c.l.b16 %v1059_v50  ;;  %v1777_v23 = vpop.f32.mrf.mxu1  ;;  %v3272_v55 = vor.u32 %v3771_v39, %v3269_v45  ;;  %v3783_v39 = vld [vmem:[%s5486_s2 + $0x154] sm:$0xf]  ;;  %v3403_v14 = vld [vmem:[%s5486_s2 + $0x200] sm:$0xf] }
 0x18a   :  { %v1299_v17 = vunpack.c.l.b16 %v1091_v4  ;;  %v757_v40 = vmax.f32 %v542_v25, %v720_v35  ;;  %v4771_v49 = vpack.c.b16 %v1203_v22, %v1202_v7  ;;  %v544_v25 = vadd.f32 %v4737_v53, %v454_v28  ;;  %v3325_v35 = vld [vmem:[%s5486_s2 + $0x168] sm:$0xf0]  ;;  %v3411_v28 = vld [vmem:[%s5486_s2 + $0x210] sm:$0xf]  ;;  %v3808_v22 = vld [vmem:[%s5486_s2 + $0x214] sm:$0xf0] }
 0x18b   :  { %v4773_v18 = vpack.c.b16 %v1251_v9, %v1250_v8  ;;  %v819_v19 = vld [vmem:[#allocation4 + $0xd0] ss:$2 sm:$0xff]  ;;  %v851_v20 = vld [vmem:[#allocation4 + $0xd1] ss:$2 sm:$0xff]  ;;  %2062 = vmatpush.bf16.msra.mxu0 %v3272_v55  ;;  %v3160_v7 = vor.u32 %v3743_v63, %v3157_v3  ;;  %v3261_v8 = vld [vmem:[%s5486_s2 + $0xe8] sm:$0xf0]  ;;  %v3248_v63 = vor.u32 %v3765_v62, %v3245_v11 }
 0x18c   :  { %v4775_v56 = vpack.c.b16 %v1299_v17, %v1298_v52  ;;  %v869_v33 = vmax.f32 %v819_v19, %v851_v20  ;;  %789 = vst [vmem:[#allocation4 + $0xe0] sm:$0xff] %v757_v40  ;;  %1850 = vmatmul.bf16.gmra.mxu3 %v4771_v49  ;;  %v3785_v52 = vld [vmem:[%s5486_s2 + $0x164] sm:$0xf]  ;;  %v3264_v9 = vor.u32 %v3769_v32, %v3261_v8  ;;  %v3767_v40 = vld [vmem:[%s5486_s2 + $0xd4] sm:$0xf] }
 0x18d   :  { %1899 = vmatmul.bf16.gmra.mxu0 %v4773_v18  ;;  %v3328_v17 = vor.u32 %v3785_v52, %v3325_v35  ;;  %2019 = vmatpush.bf16.msra.mxu3 %v3160_v7  ;;  %v3412_v20 = vor.u32 %v3808_v22, %v3411_v28  ;;  %v3256_v45 = vor.u32 %v3767_v40, %v3253_v26  ;;  %v3779_v8 = vld [vmem:[%s5486_s2 + $0x134] sm:$0xf]  ;;  %v3301_v52 = vld [vmem:[%s5486_s2 + $0x138] sm:$0xf0]  ;;  %v3741_v35 = vld [vmem:[%s5486_s2 + $0x4] sm:$0xf] }
 0x18e   :  { %1948 = vmatmul.bf16.gmra.mxu2 %v4775_v56  ;;  %885 = vst [vmem:[#allocation2 + $0x68] sm:$0xff] %v869_v33  ;;  %v997_v48 = vpack.c.bf16 %v869_v33, %v869_v33  ;;  %v3317_v33 = vld [vmem:[%s5486_s2 + $0x158] sm:$0xf0]  ;;  %v3149_v28 = vld [vmem:[%s5486_s2 + $0x8] sm:$0xf0]  ;;  %v3304_v22 = vor.u32 %v3779_v8, %v3301_v52 }
 0x18f   :  { %v632_v54 = vpop.f32.mrf.mxu2  ;;  %2063 = vmatpush.bf16.msra.mxu0 %v3264_v9  ;;  %2112 = vmatpush.bf16.msra.mxu2 %v3328_v17  ;;  %v3320_v55 = vor.u32 %v3783_v39, %v3317_v33  ;;  %v3229_v62 = vld [vmem:[%s5486_s2 + $0xa8] sm:$0xf0]  ;;  %v3777_v11 = vld [vmem:[%s5486_s2 + $0x124] sm:$0xf] }
 0x190   :  { %v722_v1 = vadd.f32 %v4744_v36, %v632_v54  ;;  %v1826_v50 = vpop.f32.mrf.mxu3  ;;  %v457_v4 = vpop.f32.mrf.mxu0  ;;  %v1157_v38 = vunpack.c.l.b16 %v997_v48  ;;  %1970 = vmatpush.bf16.msra.mxu1 %v3412_v20  ;;  %v3152_v20 = vor.u32 %v3741_v35, %v3149_v28 }
 0x191   :  { %v4820_v53 = vadd.f32 %v1826_v50, %v1777_v23  ;;  %v4822_v36 = vpop.f32.mrf.mxu1  ;;  %v547_v13 = vadd.f32 %v4746_v16, %v457_v4  ;;  %v3309_v16 = vld [vmem:[%s5486_s2 + $0x148] sm:$0xf0] }
 0x192   :  { %v758_v19 = vmax.f32 %v544_v25, %v722_v1  ;;  %v4833_v23 = vpack.c.b16 %v1157_v38, %v1156_v24  ;;  %v3312_v3 = vor.u32 %v3781_v51, %v3309_v16  ;;  %v3237_v38 = vld [vmem:[%s5486_s2 + $0xb8] sm:$0xf0]  ;;  %2020 = vmatpush.bf16.msra.mxu3 %v3152_v20  ;;  %v3293_v51 = vld [vmem:[%s5486_s2 + $0x128] sm:$0xf0] }
 0x193   :  { %2064 = vmatpush.bf16.msra.mxu0 %v3256_v45  ;;  %2113 = vmatpush.bf16.msra.mxu2 %v3320_v55  ;;  %v3806_v55 = vld [vmem:[%s5486_s2 + $0x204] sm:$0xf0]  ;;  %v3296_v16 = vor.u32 %v3777_v11, %v3293_v51  ;;  %v3277_v11 = vld [vmem:[%s5486_s2 + $0x108] sm:$0xf0] }
 0x194   :  { %790 = vst [vmem:[#allocation4 + $0xe8] sm:$0xff] %v758_v19  ;;  %1806 = vmatmul.bf16.gmra.mxu1 %v4833_v23 }
 0x195   :  { %v1012_v17 = vld [vmem:[#allocation2 + $0x61] sm:$0xff] }
 0x196   :  { %v1044_v40 = vld [vmem:[#allocation2 + $0x62] sm:$0xff] }
 0x197   :  { %v635_v48 = vpop.f32.mrf.mxu2  ;;  %2065 = vmatpush.bf16.msra.mxu0 %v3248_v63  ;;  %2114 = vmatpush.bf16.msra.mxu2 %v3312_v3  ;;  %v1076_v19 = vld [vmem:[#allocation2 + $0x63] sm:$0xff]  ;;  %v3221_v63 = vld [vmem:[%s5486_s2 + $0x98] sm:$0xf0]  ;;  %v3775_v3 = vld [vmem:[%s5486_s2 + $0x114] sm:$0xf] }
 0x198   :  { %v725_v54 = vadd.f32 %v4764_v59, %v635_v48  ;;  %v4856_v24 = vpop.f32.mrf.mxu3  ;;  %v459_v29 = vpop.f32.mrf.mxu0  ;;  %v3763_v59 = vld [vmem:[%s5486_s2 + $0xb4] sm:$0xf] }
 0x199   :  { %v1782_v50 = vpop.f32.mrf.mxu1  ;;  %v3240_v7 = vor.u32 %v3763_v59, %v3237_v38  ;;  %v549_v26 = vadd.f32 %v4766_v21, %v459_v29 }
 0x19a   :  { %v759_v32 = vmax.f32 %v547_v13, %v725_v54  ;;  %v3761_v13 = vld [vmem:[%s5486_s2 + $0xa4] sm:$0xf] }
 0x19b   :  { %v821_v25 = vld [vmem:[#allocation4 + $0xe0] ss:$2 sm:$0xff]  ;;  %v853_v1 = vld [vmem:[#allocation4 + $0xe1] ss:$2 sm:$0xff]  ;;  %2066 = vmatpush.bf16.msra.mxu0 %v3240_v7  ;;  %2115 = vmatpush.bf16.msra.mxu2 %v3304_v22  ;;  %v3232_v29 = vor.u32 %v3761_v13, %v3229_v62  ;;  %v3757_v13 = vld [vmem:[%s5486_s2 + $0x84] sm:$0xf] }
 0x19c   :  { %v4861_v4 = vmax.f32 %v821_v25, %v853_v1  ;;  %791 = vst [vmem:[#allocation4 + $0xf0] sm:$0xff] %v759_v32  ;;  %v1028_v32 = vpack.c.bf16 %v1012_v17, %v1012_v17  ;;  %v1060_v25 = vpack.c.bf16 %v1044_v40, %v1044_v40  ;;  %v1092_v1 = vpack.c.bf16 %v1076_v19, %v1076_v19 }
 0x19e   :  { %886 = vst [vmem:[#allocation2 + $0x70] sm:$0xff] %v4861_v4  ;;  %v1204_v40 = vunpack.c.l.b16 %v1028_v32  ;;  %v1252_v19 = vunpack.c.l.b16 %v1060_v25  ;;  %v1300_v20 = vunpack.c.l.b16 %v1092_v1  ;;  %v998_v32 = vpack.c.bf16 %v4861_v4, %v4861_v4  ;;  %v3819_v1 = vld [vmem:[%s5486_s2 + $0x274] sm:$0xf] }
 0x19f   :  { %v637_v9 = vpop.f32.mrf.mxu2  ;;  %2067 = vmatpush.bf16.msra.mxu0 %v3232_v29  ;;  %2116 = vmatpush.bf16.msra.mxu2 %v3296_v16 }
 0x1a0   :  { %v727_v39 = vadd.f32 %v4769_v15, %v637_v9  ;;  %v1831_v33 = vpop.f32.mrf.mxu3  ;;  %v1875_v45 = vpop.f32.mrf.mxu0  ;;  %v3404_v15 = vor.u32 %v3806_v55, %v3403_v14 }
 0x1a1   :  { %v4893_v48 = vadd.f32 %v1831_v33, %v1782_v50  ;;  %v1876_v21 = vadd.f32 %v1875_v45, %v4820_v53  ;;  %v3759_v53 = vld [vmem:[%s5486_s2 + $0x94] sm:$0xf]  ;;  %v3285_v50 = vld [vmem:[%s5486_s2 + $0x118] sm:$0xf0]  ;;  %v4917_v7 = vpop.f32.mrf.mxu1 }
 0x1a2   :  { %v760_v54 = vmax.f32 %v549_v26, %v727_v39  ;;  %1971 = vmatpush.bf16.msra.mxu1 %v3404_v15  ;;  %v3224_v59 = vor.u32 %v3759_v53, %v3221_v63  ;;  %v3288_v38 = vor.u32 %v3775_v3, %v3285_v50  ;;  %v3213_v15 = vld [vmem:[%s5486_s2 + $0x88] sm:$0xf0]  ;;  %v3461_v50 = vld [vmem:[%s5486_s2 + $0x278] sm:$0xf0] }
 0x1a3   :  { %v3216_v62 = vor.u32 %v3757_v13, %v3213_v15 }
 0x1a4   :  { %792 = vst [vmem:[#allocation4 + $0xf8] sm:$0xff] %v760_v54  ;;  %2068 = vmatpush.bf16.msra.mxu0 %v3224_v59  ;;  %2117 = vmatpush.bf16.msra.mxu2 %v3288_v38 }
 0x1a5   :  { %v1013_v8 = vld [vmem:[#allocation2 + $0x69] sm:$0xff] }
 0x1a6   :  { %v1045_v52 = vld [vmem:[#allocation2 + $0x6a] sm:$0xff]  ;;  %v1029_v28 = vpack.c.bf16 %v1013_v8, %v1013_v8  ;;  %v3464_v8 = vor.u32 %v3819_v1, %v3461_v50 }
 0x1a7   :  { %v1077_v35 = vld [vmem:[#allocation2 + $0x6b] sm:$0xff]  ;;  %v1061_v22 = vpack.c.bf16 %v1045_v52, %v1045_v52  ;;  %v1924_v17 = vpop.f32.mrf.mxu2 }
 0x1a8   :  { %v1093_v9 = vpack.c.bf16 %v1077_v35, %v1077_v35  ;;  %v4919_v26 = vpop.f32.mrf.mxu3  ;;  %v4921_v39 = vadd.f32 %v1924_v17, %v1876_v21  ;;  %v4923_v33 = vpop.f32.mrf.mxu0  ;;  %v1205_v45 = vunpack.c.l.b16 %v1029_v28  ;;  %v3773_v21 = vld [vmem:[%s5486_s2 + $0x104] sm:$0xf]  ;;  %2069 = vmatpush.bf16.msra.mxu0 %v3216_v62  ;;  %v1158_v35 = vunpack.c.l.b16 %v998_v32  ;;  %2209 = vmatpush.bf16.msrb.mxu3 %v3464_v8  ;;  %v1097_v32 = vld [vmem:[#allocation2 + $0xc] sm:$0xff] }
 0x1a9   :  { %v1253_v14 = vunpack.c.l.b16 %v1061_v22  ;;  %v3280_v16 = vor.u32 %v3773_v21, %v3277_v11  ;;  %v1787_v59 = vpop.f32.mrf.mxu1  ;;  %v3803_v22 = vld [vmem:[%s5486_s2 + $0x1f4] sm:$0xf] }
 0x1aa   :  { %v1301_v55 = vunpack.c.l.b16 %v1093_v9  ;;  %v4937_v51 = vpack.c.b16 %v1205_v45, %v1204_v40  ;;  %v3397_v9 = vld [vmem:[%s5486_s2 + $0x1f8] sm:$0xf0] }
 0x1ab   :  { %v4939_v54 = vpack.c.b16 %v1253_v14, %v1252_v19  ;;  %v823_v53 = vld [vmem:[#allocation4 + $0xf0] ss:$2 sm:$0xff]  ;;  %v855_v63 = vld [vmem:[#allocation4 + $0xf1] ss:$2 sm:$0xff]  ;;  %2118 = vmatpush.bf16.msra.mxu2 %v3280_v16  ;;  %v3400_v19 = vor.u32 %v3803_v22, %v3397_v9  ;;  %v1113_v9 = vpack.c.bf16 %v1097_v32, %v1097_v32 }
 0x1ac   :  { %v4941_v29 = vpack.c.b16 %v1301_v55, %v1300_v20  ;;  %v871_v3 = vmax.f32 %v823_v53, %v855_v63  ;;  %1855 = vmatmul.bf16.gmra.mxu3 %v4937_v51 }
 0x1ad   :  { %1904 = vmatmul.bf16.gmra.mxu0 %v4939_v54  ;;  %2160 = vmatpush.bf16.msrb.mxu1 %v3400_v19 }
 0x1ae   :  { %1953 = vmatmul.bf16.gmra.mxu2 %v4941_v29  ;;  %887 = vst [vmem:[#allocation2 + $0x78] sm:$0xff] %v871_v3  ;;  %v999_v25 = vpack.c.bf16 %v871_v3, %v871_v3 }
 0x1af   :  { %v4954_v38 = vpop.f32.mrf.mxu2 }
 0x1b0   :  { %v1836_v52 = vpop.f32.mrf.mxu3  ;;  %v1880_v4 = vpop.f32.mrf.mxu0  ;;  %v1159_v28 = vunpack.c.l.b16 %v999_v25 }
 0x1b1   :  { %v1837_v17 = vadd.f32 %v1836_v52, %v1787_v59  ;;  %v1881_v40 = vadd.f32 %v1880_v4, %v4893_v48  ;;  %v4995_v32 = vpop.f32.mrf.mxu1 }
 0x1b2   :  { %v4963_v20 = vpack.c.b16 %v1159_v28, %v1158_v35  ;;  %v1096_v35 = vld [vmem:[#allocation2 + $0x4] sm:$0xff] }
 0x1b4   :  { %1811 = vmatmul.bf16.gmra.mxu1 %v4963_v20 }
 0x1b5   :  { %v1014_v45 = vld [vmem:[#allocation2 + $0x71] sm:$0xff]  ;;  %v1015_v14 = vld [vmem:[#allocation2 + $0x79] sm:$0xff] }
 0x1b6   :  { %v1046_v55 = vld [vmem:[#allocation2 + $0x72] sm:$0xff]  ;;  %v1030_v13 = vpack.c.bf16 %v1014_v45, %v1014_v45  ;;  %v1031_v15 = vpack.c.bf16 %v1015_v14, %v1015_v14  ;;  %v1047_v21 = vld [vmem:[#allocation2 + $0x7a] sm:$0xff]  ;;  %v1337_v14 = vunpack.c.l.b16 %v1113_v9 }
 0x1b7   :  { %v1062_v62 = vpack.c.bf16 %v1046_v55, %v1046_v55  ;;  %v1078_v11 = vld [vmem:[#allocation2 + $0x73] sm:$0xff]  ;;  %v1079_v16 = vld [vmem:[#allocation2 + $0x7b] sm:$0xff]  ;;  %v1929_v53 = vpop.f32.mrf.mxu2  ;;  %v1063_v63 = vpack.c.bf16 %v1047_v21, %v1047_v21  ;;  %v3817_v55 = vld [vmem:[%s5486_s2 + $0x264] sm:$0xf] }
 0x1b8   :  { %v1094_v3 = vpack.c.bf16 %v1078_v11, %v1078_v11  ;;  %v1095_v48 = vpack.c.bf16 %v1079_v16, %v1079_v16  ;;  %v4966_v25 = vadd.f32 %v1929_v53, %v1881_v40  ;;  %v4968_v1 = vpop.f32.mrf.mxu0  ;;  %v1206_v50 = vunpack.c.l.b16 %v1030_v13  ;;  %v3453_v13 = vld [vmem:[%s5486_s2 + $0x268] sm:$0xf0]  ;;  %v3801_v16 = vld [vmem:[%s5486_s2 + $0x1e4] sm:$0xf] }
 0x1b9   :  { %v1207_v59 = vunpack.c.l.b16 %v1031_v15  ;;  %v1254_v8 = vunpack.c.l.b16 %v1062_v62  ;;  %v1255_v52 = vunpack.c.l.b16 %v1063_v63  ;;  %v1112_v40 = vpack.c.bf16 %v1096_v35, %v1096_v35  ;;  %v3389_v53 = vld [vmem:[%s5486_s2 + $0x1e8] sm:$0xf0]  ;;  %v1098_v35 = vld [vmem:[#allocation2 + $0x14] sm:$0xff]  ;;  %v1792_v9 = vpop.f32.mrf.mxu1 }
 0x1ba   :  { %v1302_v4 = vunpack.c.l.b16 %v1094_v3  ;;  %v1303_v22 = vunpack.c.l.b16 %v1095_v48  ;;  %v3456_v21 = vor.u32 %v3817_v55, %v3453_v13  ;;  %v3392_v3 = vor.u32 %v3801_v16, %v3389_v53  ;;  %v3445_v55 = vld [vmem:[%s5486_s2 + $0x258] sm:$0xf0] }
 0x1bb   :  { %v4970_v28 = vpack.c.b16 %v1207_v59, %v1206_v50  ;;  %v4972_v19 = vpack.c.b16 %v1255_v52, %v1254_v8  ;;  %v1336_v11 = vunpack.c.l.b16 %v1112_v40  ;;  %v4998_v50 = vpop.f32.mrf.mxu3  ;;  %v1099_v8 = vld [vmem:[#allocation2 + $0x1c] sm:$0xff] }
 0x1bc   :  { %v4975_v45 = vpack.c.b16 %v1303_v22, %v1302_v4  ;;  %2210 = vmatpush.bf16.msrb.mxu3 %v3456_v21  ;;  %2161 = vmatpush.bf16.msrb.mxu1 %v3392_v3  ;;  %v1115_v22 = vpack.c.bf16 %v1099_v8, %v1099_v8  ;;  %v1101_v8 = vld [vmem:[#allocation2 + $0x2c] sm:$0xff] }
 0x1bd   :  { %1860 = vmatmul.bf16.gmra.mxu3 %v4970_v28  ;;  %1909 = vmatmul.bf16.gmra.mxu0 %v4972_v19  ;;  %v4993_v48 = vpack.c.b16 %v1337_v14, %v1336_v11  ;;  %v3815_v14 = vld [vmem:[%s5486_s2 + $0x254] sm:$0xf] }
 0x1be   :  { %1958 = vmatmul.bf16.gmra.mxu2 %v4975_v45  ;;  %v1339_v40 = vunpack.c.l.b16 %v1115_v22  ;;  %v1100_v22 = vld [vmem:[#allocation2 + $0x24] sm:$0xff] }
 0x1bf   :  { %v4985_v15 = vpop.f32.mrf.mxu2 }
 0x1c0   :  { %v1885_v62 = vpop.f32.mrf.mxu0 }
 0x1c1   :  { %v1886_v63 = vadd.f32 %v1885_v62, %v1837_v17  ;;  %v1114_v17 = vpack.c.bf16 %v1098_v35, %v1098_v35  ;;  %v3448_v62 = vor.u32 %v3815_v14, %v3445_v55  ;;  %v3813_v14 = vld [vmem:[%s5486_s2 + $0x244] sm:$0xf]  ;;  %v3437_v55 = vld [vmem:[%s5486_s2 + $0x248] sm:$0xf0] }
 0x1c3   :  { %v1338_v16 = vunpack.c.l.b16 %v1114_v17  ;;  %2211 = vmatpush.bf16.msrb.mxu3 %v3448_v62  ;;  %v1117_v17 = vpack.c.bf16 %v1101_v8, %v1101_v8  ;;  %v3440_v62 = vor.u32 %v3813_v14, %v3437_v55 }
 0x1c4   :  { %1972 = vmatmul.bf16.vlgmr.msra.gmra.mxu1 %v4993_v48 }
 0x1c5   :  { %v5015_v53 = vpack.c.b16 %v1339_v40, %v1338_v16  ;;  %v1341_v40 = vunpack.c.l.b16 %v1117_v17  ;;  %v3811_v17 = vld [vmem:[%s5486_s2 + $0x234] sm:$0xf] }
 0x1c7   :  { %v1934_v59 = vpop.f32.mrf.mxu2  ;;  %2212 = vmatpush.bf16.msrb.mxu3 %v3440_v62 }
 0x1c8   :  { %v5000_v52 = vadd.f32 %v1934_v59, %v1886_v63  ;;  %v5002_v4 = vpop.f32.mrf.mxu0  ;;  %v3381_v63 = vld [vmem:[%s5486_s2 + $0x1d8] sm:$0xf0] }
 0x1cd   :  { %2021 = vmatmul.bf16.vlgmr.msra.gmra.mxu3 %v4527_v0  ;;  %2070 = vmatmul.bf16.vlgmr.msra.gmra.mxu0 %v4529_v2 }
 0x1ce   :  { %2119 = vmatmul.bf16.vlgmr.msra.gmra.mxu2 %v4573_v41  ;;  %v3799_v41 = vld [vmem:[%s5486_s2 + $0x1d4] sm:$0xf] }
 0x1cf   :  { %v1841_v13 = vpop.f32.mrf.mxu3  ;;  %v5013_v21 = vpop.f32.mrf.mxu2  ;;  %v3384_v3 = vor.u32 %v3799_v41, %v3381_v63  ;;  %v1102_v63 = vld [vmem:[#allocation2 + $0x34] sm:$0xff] }
 0x1d0   :  { %v1842_v0 = vadd.f32 %v1841_v13, %v1792_v9  ;;  %v1890_v11 = vpop.f32.mrf.mxu0  ;;  %v1116_v9 = vpack.c.bf16 %v1100_v22, %v1100_v22  ;;  %v3797_v13 = vld [vmem:[%s5486_s2 + $0x1c4] sm:$0xf]  ;;  %v1118_v8 = vpack.c.bf16 %v1102_v63, %v1102_v63 }
 0x1d1   :  { %2162 = vmatpush.bf16.msrb.mxu1 %v3384_v3 }
 0x1d2   :  { %v1891_v2 = vadd.f32 %v1890_v11, %v1842_v0  ;;  %v5044_v11 = vpop.f32.mrf.mxu1  ;;  %v1342_v62 = vunpack.c.l.b16 %v1118_v8  ;;  %v1104_v8 = vld [vmem:[#allocation2 + $0x44] sm:$0xff] }
 0x1d4   :  { %1977 = vmatmul.bf16.gmra.mxu1 %v5015_v53 }
 0x1d7   :  { %v1939_v59 = vpop.f32.mrf.mxu2  ;;  %v5046_v16 = vpop.f32.mrf.mxu3 }
 0x1d8   :  { %v5024_v35 = vadd.f32 %v1939_v59, %v1891_v2  ;;  %v1103_v2 = vld [vmem:[#allocation2 + $0x3c] sm:$0xff]  ;;  %v5048_v41 = vpop.f32.mrf.mxu0 }
 0x1d9   :  { %v1119_v3 = vpack.c.bf16 %v1103_v2, %v1103_v2  ;;  %v3365_v2 = vld [vmem:[%s5486_s2 + $0x1b8] sm:$0xf0] }
 0x1db   :  { %v1343_v22 = vunpack.c.l.b16 %v1119_v3  ;;  %v1105_v3 = vld [vmem:[#allocation2 + $0x4c] sm:$0xff] }
 0x1dd   :  { %2026 = vmatmul.bf16.gmra.mxu3 %v4558_v37  ;;  %2075 = vmatmul.bf16.gmra.mxu0 %v4560_v42  ;;  %v3373_v37 = vld [vmem:[%s5486_s2 + $0x1c8] sm:$0xf0]  ;;  %v1340_v42 = vunpack.c.l.b16 %v1116_v9  ;;  %v3429_v9 = vld [vmem:[%s5486_s2 + $0x238] sm:$0xf0] }
 0x1de   :  { %2124 = vmatmul.bf16.gmra.mxu2 %v4607_v46  ;;  %v3376_v46 = vor.u32 %v3797_v13, %v3373_v37  ;;  %v3432_v55 = vor.u32 %v3811_v17, %v3429_v9  ;;  %v1121_v17 = vpack.c.bf16 %v1105_v3, %v1105_v3 }
 0x1df   :  { %v5041_v0 = vpack.c.b16 %v1341_v40, %v1340_v42  ;;  %v5050_v59 = vpop.f32.mrf.mxu2  ;;  %v1797_v40 = vpop.f32.mrf.mxu1 }
 0x1e0   :  { %2163 = vmatpush.bf16.msrb.mxu1 %v3376_v46  ;;  %2213 = vmatpush.bf16.msrb.mxu3 %v3432_v55  ;;  %v3795_v46 = vld [vmem:[%s5486_s2 + $0x1b4] sm:$0xf]  ;;  %v1345_v9 = vunpack.c.l.b16 %v1121_v17  ;;  %v3793_v55 = vld [vmem:[%s5486_s2 + $0x1a4] sm:$0xf] }
 0x1e1   :  { %v3368_v63 = vor.u32 %v3795_v46, %v3365_v2  ;;  %v1106_v2 = vld [vmem:[#allocation2 + $0x54] sm:$0xff] }
 0x1e4   :  { %1982 = vmatmul.bf16.gmra.mxu1 %v5041_v0 }
 0x1e5   :  { %2164 = vmatpush.bf16.msrb.mxu1 %v3368_v63 }
 0x1ed   :  { %2031 = vmatmul.bf16.gmra.mxu3 %v4589_v60  ;;  %2080 = vmatmul.bf16.gmra.mxu0 %v4591_v10  ;;  %v1895_v60 = vpop.f32.mrf.mxu0  ;;  %v5061_v10 = vpack.c.b16 %v1343_v22, %v1342_v62  ;;  %v1120_v22 = vpack.c.bf16 %v1104_v8, %v1104_v8  ;;  %v1122_v8 = vpack.c.bf16 %v1106_v2, %v1106_v2  ;;  %v3349_v2 = vld [vmem:[%s5486_s2 + $0x198] sm:$0xf0] }
 0x1ee   :  { %2129 = vmatmul.bf16.gmra.mxu2 %v4645_v30 }
 0x1ef   :  { %v1846_v14 = vpop.f32.mrf.mxu3 }
 0x1f0   :  { %v1847_v13 = vadd.f32 %v1846_v14, %v1797_v40  ;;  %v3809_v40 = vld [vmem:[%s5486_s2 + $0x224] sm:$0xf]  ;;  %v3421_v14 = vld [vmem:[%s5486_s2 + $0x228] sm:$0xf0] }
 0x1f1   :  { %v1944_v30 = vpop.f32.mrf.mxu2 }
 0x1f2   :  { %v1896_v37 = vadd.f32 %v1895_v60, %v1847_v13  ;;  %v3424_v13 = vor.u32 %v3809_v40, %v3421_v14  ;;  %v5090_v60 = vpop.f32.mrf.mxu1  ;;  %v3413_v40 = vld [vmem:[%s5486_s2 + $0x218] sm:$0xf0] }
 0x1f4   :  { %v5063_v42 = vadd.f32 %v1944_v30, %v1896_v37  ;;  %1987 = vmatmul.bf16.gmra.mxu1 %v5061_v10  ;;  %2214 = vmatpush.bf16.msrb.mxu3 %v3424_v13  ;;  %v1107_v30 = vld [vmem:[#allocation2 + $0x5c] sm:$0xff] }
 0x1f5   :  { %v5094_v46 = vpop.f32.mrf.mxu0  ;;  %v1123_v63 = vpack.c.bf16 %v1107_v30, %v1107_v30  ;;  %v3791_v30 = vld [vmem:[%s5486_s2 + $0x194] sm:$0xf] }
 0x1f7   :  { %v5092_v37 = vpop.f32.mrf.mxu3 }
 0x1f9   :  { %v5096_v3 = vpop.f32.mrf.mxu2 }
 0x1fa   :  { %v1802_v17 = vpop.f32.mrf.mxu1 }
 0x1fd   :  { %2036 = vmatmul.bf16.gmra.mxu3 %v4621_v6  ;;  %2085 = vmatmul.bf16.gmra.mxu0 %v4657_v44  ;;  %v3357_v6 = vld [vmem:[%s5486_s2 + $0x1a8] sm:$0xf0]  ;;  %v1344_v44 = vunpack.c.l.b16 %v1120_v22  ;;  %v1347_v22 = vunpack.c.l.b16 %v1123_v63  ;;  %v3352_v63 = vor.u32 %v3791_v30, %v3349_v2 }
 0x1fe   :  { %2134 = vmatmul.bf16.gmra.mxu2 %v4678_v31  ;;  %v3360_v31 = vor.u32 %v3793_v55, %v3357_v6  ;;  %v1346_v6 = vunpack.c.l.b16 %v1122_v8 }
 0x1ff   :  { %v5087_v62 = vpack.c.b16 %v1345_v9, %v1344_v44  ;;  %v3807_v9 = vld [vmem:[%s5486_s2 + $0x214] sm:$0xf] }
 0x200   :  { %2165 = vmatpush.bf16.msrb.mxu1 %v3360_v31  ;;  %v3416_v55 = vor.u32 %v3807_v9, %v3413_v40  ;;  %v5107_v31 = vpack.c.b16 %v1347_v22, %v1346_v6  ;;  %v1108_v22 = vld [vmem:[#allocation2 + $0x64] sm:$0xff] }
 0x201   :  { %v1124_v40 = vpack.c.bf16 %v1108_v22, %v1108_v22 }
 0x202   :  { %2215 = vmatpush.bf16.msrb.mxu3 %v3416_v55  ;;  %v5118_v8 = vpop.f32.mrf.mxu1  ;;  %v3805_v55 = vld [vmem:[%s5486_s2 + $0x204] sm:$0xf] }
 0x203   :  { %5492 = vst [vmem:[#allocation5_spill] sm:$0xff] %v5118_v8 }
 0x204   :  { %1992 = vmatmul.bf16.gmra.mxu1 %v5087_v62 }
 0x205   :  { %2166 = vmatpush.bf16.msrb.mxu1 %v3352_v63  ;;  %v1110_v63 = vld [vmem:[#allocation2 + $0x74] sm:$0xff] }
 0x20d   :  { %2041 = vmatmul.bf16.gmra.mxu3 %v4682_v27  ;;  %2090 = vmatmul.bf16.gmra.mxu0 %v4714_v43  ;;  %v1900_v27 = vpop.f32.mrf.mxu0 }
 0x20e   :  { %2139 = vmatmul.bf16.gmra.mxu2 %v4716_v5 }
 0x20f   :  { %v1851_v14 = vpop.f32.mrf.mxu3 }
 0x210   :  { %v1852_v13 = vadd.f32 %v1851_v14, %v1802_v17  ;;  %v1109_v17 = vld [vmem:[#allocation2 + $0x6c] sm:$0xff] }
 0x211   :  { %v1949_v43 = vpop.f32.mrf.mxu2  ;;  %v1125_v9 = vpack.c.bf16 %v1109_v17, %v1109_v17  ;;  %v1807_v6 = vpop.f32.mrf.mxu1  ;;  %v1111_v17 = vld [vmem:[#allocation2 + $0x7c] sm:$0xff] }
 0x212   :  { %v1901_v44 = vadd.f32 %v1900_v27, %v1852_v13  ;;  %v3405_v13 = vld [vmem:[%s5486_s2 + $0x208] sm:$0xf0] }
 0x213   :  { %v1349_v14 = vunpack.c.l.b16 %v1125_v9  ;;  %v3408_v27 = vor.u32 %v3805_v55, %v3405_v13 }
 0x214   :  { %v5109_v5 = vadd.f32 %v1949_v43, %v1901_v44  ;;  %1997 = vmatmul.bf16.gmra.mxu1 %v5107_v31  ;;  %v1348_v44 = vunpack.c.l.b16 %v1124_v40  ;;  %v1126_v40 = vpack.c.bf16 %v1110_v63, %v1110_v63 }
 0x215   :  { %2216 = vmatpush.bf16.msrb.mxu3 %v3408_v27 }
 0x216   :  { %v5129_v43 = vpack.c.b16 %v1349_v14, %v1348_v44  ;;  %v1127_v14 = vpack.c.bf16 %v1111_v17, %v1111_v17  ;;  %v1350_v13 = vunpack.c.l.b16 %v1126_v40 }
 0x217   :  { %v5140_v2 = vpop.f32.mrf.mxu3 }
 0x218   :  { %5494 = vst [vmem:[#allocation7_spill] sm:$0xff] %v5140_v2  ;;  %v1351_v27 = vunpack.c.l.b16 %v1127_v14 }
 0x219   :  { %v5142_v22 = vpop.f32.mrf.mxu2  ;;  %v1809_v9 = vpop.f32.mrf.mxu1 }
 0x21a   :  { %5495 = vst [vmem:[#allocation8_spill] sm:$0xff] %v5142_v22  ;;  %v5147_v2 = vpack.c.b16 %v1351_v27, %v1350_v13 }
 0x21d   :  { %2046 = vmatmul.bf16.gmra.mxu3 %v4739_v12  ;;  %2095 = vmatmul.bf16.gmra.mxu0 %v4771_v49  ;;  %v3789_v12 = vld [vmem:[%s5486_s2 + $0x184] sm:$0xf]  ;;  %v3341_v49 = vld [vmem:[%s5486_s2 + $0x188] sm:$0xf0] }
 0x21e   :  { %2144 = vmatmul.bf16.gmra.mxu2 %v4773_v18  ;;  %v5137_v18 = vpop.f32.mrf.mxu0  ;;  %v3344_v30 = vor.u32 %v3789_v12, %v3341_v49 }
 0x21f   :  { %5493 = vst [vmem:[#allocation6_spill] sm:$0xff] %v5137_v18 }
 0x220   :  { %2167 = vmatpush.bf16.msrb.mxu1 %v3344_v30 }
 0x224   :  { %2002 = vmatmul.bf16.gmra.mxu1 %v5129_v43 }
 0x22a   :  { %v1905_v55 = vpop.f32.mrf.mxu0 }
 0x22d   :  { %2051 = vmatmul.bf16.gmra.mxu3 %v4833_v23  ;;  %2100 = vmatmul.bf16.gmra.mxu0 %v4937_v51 }
 0x22e   :  { %2149 = vmatmul.bf16.gmra.mxu2 %v4939_v54 }
 0x22f   :  { %v1856_v44 = vpop.f32.mrf.mxu3 }
 0x230   :  { %v1857_v12 = vadd.f32 %v1856_v44, %v1807_v6 }
 0x231   :  { %v1954_v49 = vpop.f32.mrf.mxu2  ;;  %v1812_v30 = vpop.f32.mrf.mxu1 }
 0x232   :  { %v1906_v18 = vadd.f32 %v1905_v55, %v1857_v12  ;;  %v5152_v63 = vpop.f32.mrf.mxu0 }
 0x234   :  { %v5149_v22 = vadd.f32 %v1954_v49, %v1906_v18  ;;  %2007 = vmatmul.bf16.gmra.mxu1 %v5147_v2 }
 0x237   :  { %v1858_v23 = vpop.f32.mrf.mxu3 }
 0x238   :  { %v1859_v17 = vadd.f32 %v1858_v23, %v1809_v9 }
 0x239   :  { %v5154_v51 = vpop.f32.mrf.mxu2  ;;  %v1814_v54 = vpop.f32.mrf.mxu1 }
 0x23a   :  { %v1910_v6 = vpop.f32.mrf.mxu0 }
 0x23d   :  { %2056 = vmatmul.bf16.gmra.mxu3 %v4963_v20  ;;  %2105 = vmatmul.bf16.gmra.mxu0 %v4970_v28 }
 0x23e   :  { %2154 = vmatmul.bf16.gmra.mxu2 %v4972_v19 }
 0x240   :  { %v1861_v40 = vpop.f32.mrf.mxu3 }
 0x241   :  { %v1862_v14 = vadd.f32 %v1861_v40, %v1812_v30  ;;  %v1959_v18 = vpop.f32.mrf.mxu2  ;;  %v1973_v55 = vpop.f32.mrf.mxu1 }
 0x242   :  { %v5160_v27 = vadd.f32 %v1973_v55, %v4921_v39  ;;  %v1912_v49 = vpop.f32.mrf.mxu0 }
 0x243   :  { %v1911_v13 = vadd.f32 %v1910_v6, %v1862_v14 }
 0x244   :  { %2168 = vmatmul.bf16.vlgmr.msrb.gmra.mxu1 %v4575_v61 }
 0x245   :  { %v1960_v44 = vadd.f32 %v1959_v18, %v1911_v13 }
 0x248   :  { %v1863_v9 = vpop.f32.mrf.mxu3 }
 0x249   :  { %v1864_v12 = vadd.f32 %v1863_v9, %v1814_v54  ;;  %v5163_v20 = vpop.f32.mrf.mxu1  ;;  %v1961_v23 = vpop.f32.mrf.mxu2 }
 0x24b   :  { %v1913_v28 = vadd.f32 %v1912_v49, %v1864_v12 }
 0x24d   :  { %v1962_v19 = vadd.f32 %v1961_v23, %v1913_v28  ;;  %2217 = vmatmul.bf16.vlgmr.msrb.gmra.mxu3 %v4993_v48 }
 0x250   :  { %v5166_v30 = vpop.f32.mrf.mxu3 }
 0x251   :  { %v1978_v40 = vpop.f32.mrf.mxu1 }
 0x252   :  { %v5169_v6 = vadd.f32 %v1978_v40, %v4966_v25 }
 0x254   :  { %2173 = vmatmul.bf16.gmra.mxu1 %v4609_v47 }
 0x258   :  { %v5172_v39 = vpop.f32.mrf.mxu3 }
 0x259   :  { %v5174_v61 = vpop.f32.mrf.mxu1 }
 0x25d   :  { %2222 = vmatmul.bf16.gmra.mxu3 %v5015_v53 }
 0x260   :  { %v5177_v54 = vpop.f32.mrf.mxu3 }
 0x261   :  { %v1983_v14 = vpop.f32.mrf.mxu1 }
 0x262   :  { %v5180_v18 = vadd.f32 %v1983_v14, %v5000_v52  ;;  %v2071_v14 = vpop.f32.mrf.mxu0 }
 0x264   :  { %2178 = vmatmul.bf16.gmra.mxu1 %v4647_v34 }
 0x268   :  { %v5183_v48 = vpop.f32.mrf.mxu3 }
 0x269   :  { %v5185_v25 = vpop.f32.mrf.mxu1 }
 0x26d   :  { %2227 = vmatmul.bf16.gmra.mxu3 %v5041_v0 }
 0x270   :  { %v5188_v47 = vpop.f32.mrf.mxu3 }
 0x271   :  { %v1988_v55 = vpop.f32.mrf.mxu1 }
 0x272   :  { %v5191_v13 = vadd.f32 %v1988_v55, %v5024_v35 }
 0x274   :  { %2183 = vmatmul.bf16.gmra.mxu1 %v4680_v58 }
 0x278   :  { %v5194_v53 = vpop.f32.mrf.mxu3 }
 0x279   :  { %v5196_v52 = vpop.f32.mrf.mxu1 }
 0x27d   :  { %2232 = vmatmul.bf16.gmra.mxu3 %v5061_v10 }
 0x280   :  { %v5199_v34 = vpop.f32.mrf.mxu3 }
 0x281   :  { %v1993_v9 = vpop.f32.mrf.mxu1 }
 0x282   :  { %v5202_v12 = vadd.f32 %v1993_v9, %v5063_v42 }
 0x284   :  { %2188 = vmatmul.bf16.gmra.mxu1 %v4718_v57 }
 0x288   :  { %v5205_v0 = vpop.f32.mrf.mxu3 }
 0x289   :  { %v5207_v35 = vpop.f32.mrf.mxu1 }
 0x28d   :  { %2237 = vmatmul.bf16.gmra.mxu3 %v5087_v62  ;;  %v1908_v62 = vadd.f32 %v5152_v63, %v1859_v17 }
 0x290   :  { %v5210_v58 = vpop.f32.mrf.mxu3 }
 0x291   :  { %v1998_v49 = vpop.f32.mrf.mxu1 }
 0x292   :  { %v5213_v28 = vadd.f32 %v1998_v49, %v5109_v5  ;;  %v2120_v49 = vpop.f32.mrf.mxu2 }
 0x294   :  { %5496 = vst [vmem:[#allocation9_spill] sm:$0xff] %v5213_v28  ;;  %2193 = vmatmul.bf16.gmra.mxu1 %v4775_v56  ;;  %v1957_v56 = vadd.f32 %v5154_v51, %v1908_v62  ;;  %v1829_v28 = vadd.f32 %v4856_v24, %v4822_v36 }
 0x298   :  { %v5216_v10 = vpop.f32.mrf.mxu3 }
 0x299   :  { %v5218_v42 = vpop.f32.mrf.mxu1 }
 0x29a   :  { %5497 = vst [vmem:[#allocation10_spill] sm:$0xff] %v5218_v42 }
 0x29d   :  { %2242 = vmatmul.bf16.gmra.mxu3 %v5107_v31 }
 0x2a0   :  { %v5221_v57 = vpop.f32.mrf.mxu3 }
 0x2a1   :  { %v2003_v23 = vpop.f32.mrf.mxu1 }
 0x2a2   :  { %v5224_v40 = vadd.f32 %v2003_v23, %v5149_v22  ;;  %v2073_v23 = vpop.f32.mrf.mxu0 }
 0x2a4   :  { %5498 = vst [vmem:[#allocation11_spill] sm:$0xff] %v5224_v40  ;;  %2198 = vmatmul.bf16.gmra.mxu1 %v4941_v29  ;;  %v2122_v29 = vpop.f32.mrf.mxu2  ;;  %v2074_v40 = vadd.f32 %v2073_v23, %v5172_v39  ;;  %v3836_v39 = vld [vmem:[%s5487_s3 + $0x78] sm:$0xff]  ;;  %v3827_v23 = vld [vmem:[%s5487_s3 + $0x30] sm:$0xff] }
 0x2a5   :  { %2688 = vmatpush.bf16.msrb.mxu2 %v3836_v39 }
 0x2a6   :  { %v2123_v8 = vadd.f32 %v2122_v29, %v2074_v40 }
 0x2a8   :  { %v5228_v5 = vpop.f32.mrf.mxu3 }
 0x2a9   :  { %5499 = vst [vmem:[#allocation12_spill] sm:$0xff] %v5228_v5  ;;  %v2005_v55 = vpop.f32.mrf.mxu1 }
 0x2aa   :  { %v5231_v9 = vadd.f32 %v2005_v55, %v1957_v56  ;;  %v2076_v62 = vpop.f32.mrf.mxu0 }
 0x2ab   :  { %v2077_v24 = vadd.f32 %v2076_v62, %v5177_v54 }
 0x2ac   :  { %5500 = vst [vmem:[#allocation13_spill] sm:$0xff] %v5231_v9 }
 0x2ad   :  { %2247 = vmatmul.bf16.gmra.mxu3 %v5129_v43  ;;  %v2125_v43 = vpop.f32.mrf.mxu2 }
 0x2b0   :  { %v5234_v31 = vpop.f32.mrf.mxu3 }
 0x2b1   :  { %5501 = vst [vmem:[#allocation14_spill] sm:$0xff] %v5234_v31  ;;  %v2008_v42 = vpop.f32.mrf.mxu1 }
 0x2b2   :  { %v5236_v22 = vadd.f32 %v2008_v42, %v1960_v44  ;;  %v3828_v44 = vld [vmem:[%s5487_s3 + $0x38] sm:$0xff]  ;;  %v2078_v42 = vpop.f32.mrf.mxu0 }
 0x2b3   :  { %2675 = vmatpush.bf16.msrb.mxu0 %v3828_v44 }
 0x2b4   :  { %5502 = vst [vmem:[#allocation15_spill] sm:$0xff] %v5236_v22  ;;  %2203 = vmatmul.bf16.gmra.mxu1 %v4975_v45  ;;  %v2072_v45 = vadd.f32 %v2071_v14, %v5166_v30 }
 0x2b7   :  { %2676 = vmatpush.bf16.msrb.mxu0 %v3827_v23 }
 0x2b8   :  { %v5239_v63 = vpop.f32.mrf.mxu3 }
 0x2b9   :  { %5503 = vst [vmem:[#allocation16_spill] sm:$0xff] %v5239_v63  ;;  %v2010_v17 = vpop.f32.mrf.mxu1 }
 0x2ba   :  { %v5241_v51 = vadd.f32 %v2010_v17, %v1962_v19  ;;  %v2127_v19 = vpop.f32.mrf.mxu2  ;;  %v2121_v17 = vadd.f32 %v2120_v49, %v2072_v45  ;;  %v2081_v63 = vpop.f32.mrf.mxu0 }
 0x2bc   :  { %5504 = vst [vmem:[#allocation17_spill] sm:$0xff] %v5241_v51 }
 0x2bd   :  { %2252 = vmatmul.bf16.gmra.mxu3 %v5147_v2 }
 0x2c0   :  { %v5244_v56 = vpop.f32.mrf.mxu3 }
 0x2c1   :  { %5505 = vst [vmem:[#allocation18_spill] sm:$0xff] %v5244_v56  ;;  %v2169_v55 = vpop.f32.mrf.mxu1 }
 0x2c2   :  { %v2170_v51 = vadd.f32 %v2169_v55, %v2121_v17  ;;  %v2130_v30 = vpop.f32.mrf.mxu2 }
 0x2c8   :  { %v5249_v22 = vpop.f32.mrf.mxu3 }
 0x2c9   :  { %5506 = vst [vmem:[#allocation19_spill] sm:$0xff] %v5249_v22  ;;  %v2171_v9 = vpop.f32.mrf.mxu1  ;;  %v1878_v22 = vadd.f32 %v4923_v33, %v1829_v28 }
 0x2ca   :  { %v2172_v49 = vadd.f32 %v2171_v9, %v2123_v8  ;;  %v2126_v8 = vadd.f32 %v2125_v43, %v2077_v24  ;;  %v2132_v40 = vpop.f32.mrf.mxu2 }
 0x2cb   :  { %v1927_v14 = vadd.f32 %v4954_v38, %v1878_v22  ;;  %v2083_v38 = vpop.f32.mrf.mxu0  ;;  %v2079_v22 = vadd.f32 %v2078_v42, %v5183_v48  ;;  %v3835_v48 = vld [vmem:[%s5487_s3 + $0x70] sm:$0xff] }
 0x2cc   :  { %2689 = vmatpush.bf16.msrb.mxu2 %v3835_v48 }
 0x2cd   :  { %v1976_v36 = vadd.f32 %v5163_v20, %v1927_v14  ;;  %v1834_v20 = vadd.f32 %v4919_v26, %v4917_v7  ;;  %v2128_v45 = vadd.f32 %v2127_v19, %v2079_v22  ;;  %v3826_v7 = vld [vmem:[%s5487_s3 + $0x28] sm:$0xff] }
 0x2ce   :  { %2677 = vmatpush.bf16.msrb.mxu0 %v3826_v7 }
 0x2cf   :  { %v1883_v44 = vadd.f32 %v4968_v1, %v1834_v20  ;;  %v2082_v1 = vadd.f32 %v2081_v63, %v5188_v47 }
 0x2d0   :  { %v2218_v2 = vpop.f32.mrf.mxu3 }
 0x2d1   :  { %v2219_v56 = vadd.f32 %v2218_v2, %v2170_v51  ;;  %v2174_v31 = vpop.f32.mrf.mxu1 }
 0x2d2   :  { %v2135_v42 = vpop.f32.mrf.mxu2 }
 0x2d3   :  { %v2258_v5 = vmax.f32 %v5160_v27, %v2219_v56  ;;  %v2086_v43 = vpop.f32.mrf.mxu0 }
 0x2d5   :  { %2274 = vst [vmem:[#allocation4] sm:$0xff] %v2258_v5  ;;  %v2175_v5 = vadd.f32 %v2174_v31, %v2126_v8  ;;  %v1932_v31 = vadd.f32 %v4985_v15, %v1883_v44 }
 0x2d8   :  { %v2220_v51 = vpop.f32.mrf.mxu3 }
 0x2d9   :  { %v2221_v33 = vadd.f32 %v2220_v51, %v2172_v49  ;;  %v2176_v27 = vpop.f32.mrf.mxu1  ;;  %v2131_v49 = vadd.f32 %v2130_v30, %v2082_v1 }
 0x2da   :  { %v2177_v2 = vadd.f32 %v2176_v27, %v2128_v45  ;;  %v2137_v27 = vpop.f32.mrf.mxu2 }
 0x2db   :  { %v2259_v28 = vmax.f32 %v1976_v36, %v2221_v33  ;;  %v2088_v23 = vpop.f32.mrf.mxu0  ;;  %v2084_v36 = vadd.f32 %v2083_v38, %v5194_v53  ;;  %v3834_v53 = vld [vmem:[%s5487_s3 + $0x68] sm:$0xff] }
 0x2dc   :  { %2690 = vmatpush.bf16.msrb.mxu2 %v3834_v53  ;;  %v2089_v44 = vadd.f32 %v2088_v23, %v5205_v0 }
 0x2dd   :  { %2275 = vst [vmem:[#allocation4 + $0x8] sm:$0xff] %v2259_v28 }
 0x2de   :  { %v2138_v48 = vadd.f32 %v2137_v27, %v2089_v44  ;;  %v3822_v44 = vld [vmem:[%s5487_s3 + $0x8] sm:$0xff] }
 0x2e0   :  { %v2223_v9 = vpop.f32.mrf.mxu3 }
 0x2e1   :  { %v2224_v29 = vadd.f32 %v2223_v9, %v2175_v5  ;;  %v2179_v56 = vpop.f32.mrf.mxu1  ;;  %v2133_v5 = vadd.f32 %v2132_v40, %v2084_v36 }
 0x2e2   :  { %v2180_v39 = vadd.f32 %v2179_v56, %v2131_v49  ;;  %v2140_v20 = vpop.f32.mrf.mxu2  ;;  %v1849_v49 = vadd.f32 %v5092_v37, %v5090_v60  ;;  %v3832_v37 = vld [vmem:[%s5487_s3 + $0x58] sm:$0xff] }
 0x2e3   :  { %v2260_v54 = vmax.f32 %v5169_v6, %v2224_v29  ;;  %v1981_v6 = vadd.f32 %v5174_v61, %v1932_v31  ;;  %v1839_v61 = vadd.f32 %v4998_v50, %v4995_v32  ;;  %v3825_v32 = vld [vmem:[%s5487_s3 + $0x20] sm:$0xff]  ;;  %v2091_v40 = vpop.f32.mrf.mxu0 }
 0x2e4   :  { %v2290_v62 = vld [vmem:[#allocation4] ss:$2 sm:$0xff]  ;;  %v2305_v55 = vld [vmem:[#allocation4 + $0x1] ss:$2 sm:$0xff]  ;;  %2678 = vmatpush.bf16.msrb.mxu0 %v3825_v32 }
 0x2e5   :  { %v2313_v17 = vmax.f32 %v2290_v62, %v2305_v55  ;;  %2276 = vst [vmem:[#allocation4 + $0x10] sm:$0xff] %v2260_v54  ;;  %v1888_v8 = vadd.f32 %v5002_v4, %v1839_v61  ;;  %v2087_v4 = vadd.f32 %v2086_v43, %v5199_v34  ;;  %v1844_v55 = vadd.f32 %v5046_v16, %v5044_v11  ;;  %v3833_v11 = vld [vmem:[%s5487_s3 + $0x60] sm:$0xff]  ;;  %v3824_v16 = vld [vmem:[%s5487_s3 + $0x18] sm:$0xff]  ;;  %v5507_v32 = vld [vmem:[#allocation5_spill] sm:$0xff] }
 0x2e6   :  { %2691 = vmatpush.bf16.msrb.mxu2 %v3833_v11 }
 0x2e7   :  { %2321 = vst [vmem:[#allocation3] sm:$0xff] %v2313_v17  ;;  %v1937_v9 = vadd.f32 %v5013_v21, %v1888_v8  ;;  %v2136_v56 = vadd.f32 %v2135_v42, %v2087_v4 }
 0x2e8   :  { %v2225_v26 = vpop.f32.mrf.mxu3  ;;  %2679 = vmatpush.bf16.msrb.mxu0 %v3824_v16  ;;  %v5514_v16 = vld [vmem:[#allocation14_spill] sm:$0xff] }
 0x2e9   :  { %v2226_v19 = vadd.f32 %v2225_v26, %v2177_v2  ;;  %v2181_v15 = vpop.f32.mrf.mxu1  ;;  %v1893_v2 = vadd.f32 %v5048_v41, %v1844_v55  ;;  %v2092_v41 = vadd.f32 %v2091_v40, %v5210_v58  ;;  %v1898_v58 = vadd.f32 %v5094_v46, %v1849_v49  ;;  %v5509_v40 = vld [vmem:[#allocation12_spill] sm:$0xff] }
 0x2ea   :  { %v2182_v22 = vadd.f32 %v2181_v15, %v2133_v5  ;;  %2692 = vmatpush.bf16.msrb.mxu2 %v3832_v37 }
 0x2eb   :  { %v2261_v14 = vmax.f32 %v1981_v6, %v2226_v19  ;;  %v2093_v17 = vpop.f32.mrf.mxu0  ;;  %v1942_v26 = vadd.f32 %v5050_v59, %v1893_v2  ;;  %v2142_v6 = vpop.f32.mrf.mxu2  ;;  %v2141_v15 = vadd.f32 %v2140_v20, %v2092_v41 }
 0x2ed   :  { %2277 = vst [vmem:[#allocation4 + $0x18] sm:$0xff] %v2261_v14  ;;  %v1991_v0 = vadd.f32 %v5196_v52, %v1942_v26  ;;  %v3844_v26 = vld [vmem:[%s5487_s3 + $0xb8] sm:$0xff] }
 0x2f0   :  { %v2228_v51 = vpop.f32.mrf.mxu3 }
 0x2f1   :  { %v2229_v24 = vadd.f32 %v2228_v51, %v2180_v39  ;;  %v2184_v33 = vpop.f32.mrf.mxu1  ;;  %v2094_v51 = vadd.f32 %v2093_v17, %v5216_v10  ;;  %v3823_v10 = vld [vmem:[%s5487_s3 + $0x10] sm:$0xff] }
 0x2f2   :  { %v2185_v54 = vadd.f32 %v2184_v33, %v2136_v56  ;;  %2680 = vmatpush.bf16.msrb.mxu0 %v3823_v10  ;;  %v3852_v10 = vld [vmem:[%s5487_s3 + $0xf8] sm:$0xff] }
 0x2f3   :  { %v2262_v47 = vmax.f32 %v5180_v18, %v2229_v24  ;;  %v1986_v18 = vadd.f32 %v5185_v25, %v1937_v9  ;;  %v2096_v14 = vpop.f32.mrf.mxu0  ;;  %v2145_v36 = vpop.f32.mrf.mxu2 }
 0x2f4   :  { %v2292_v63 = vld [vmem:[#allocation4 + $0x10] ss:$2 sm:$0xff]  ;;  %v2306_v28 = vld [vmem:[#allocation4 + $0x11] ss:$2 sm:$0xff]  ;;  %v2097_v5 = vadd.f32 %v2096_v14, %v5221_v57  ;;  %v5511_v57 = vld [vmem:[#allocation9_spill] sm:$0xff] }
 0x2f5   :  { %v2314_v30 = vmax.f32 %v2292_v63, %v2306_v28  ;;  %2278 = vst [vmem:[#allocation4 + $0x20] sm:$0xff] %v2262_v47  ;;  %v2143_v47 = vadd.f32 %v2142_v6, %v2094_v51  ;;  %v1947_v28 = vadd.f32 %v5096_v3, %v1898_v58  ;;  %v5516_v58 = vld [vmem:[#allocation11_spill] sm:$0xff] }
 0x2f6   :  { %v2146_v53 = vadd.f32 %v2145_v36, %v2097_v5  ;;  %2681 = vmatpush.bf16.msrb.mxu0 %v3822_v44  ;;  %v3851_v5 = vld [vmem:[%s5487_s3 + $0xf0] sm:$0xff]  ;;  %v3837_v44 = vld [vmem:[%s5487_s3 + $0x80] sm:$0xff] }
 0x2f7   :  { %2322 = vst [vmem:[#allocation3 + $0x8] sm:$0xff] %v2314_v30 }
 0x2f8   :  { %v2230_v50 = vpop.f32.mrf.mxu3 }
 0x2f9   :  { %v2231_v38 = vadd.f32 %v2230_v50, %v2182_v22  ;;  %v2186_v21 = vpop.f32.mrf.mxu1  ;;  %v5508_v50 = vld [vmem:[#allocation7_spill] sm:$0xff] }
 0x2fa   :  { %v2187_v1 = vadd.f32 %v2186_v21, %v2138_v48  ;;  %v3831_v48 = vld [vmem:[%s5487_s3 + $0x50] sm:$0xff] }
 0x2fb   :  { %v2263_v29 = vmax.f32 %v1986_v18, %v2231_v38  ;;  %v2098_v46 = vpop.f32.mrf.mxu0  ;;  %v2147_v3 = vpop.f32.mrf.mxu2  ;;  %v1854_v18 = vadd.f32 %v5508_v50, %v5507_v32  ;;  %2693 = vmatpush.bf16.msrb.mxu2 %v3831_v48  ;;  %v5518_v32 = vld [vmem:[#allocation13_spill] sm:$0xff] }
 0x2fc   :  { %v2099_v21 = vadd.f32 %v2098_v46, %v5509_v40 }
 0x2fd   :  { %2279 = vst [vmem:[#allocation4 + $0x28] sm:$0xff] %v2263_v29 }
 0x300   :  { %v2233_v62 = vpop.f32.mrf.mxu3 }
 0x301   :  { %v2234_v45 = vadd.f32 %v2233_v62, %v2185_v54  ;;  %v2189_v25 = vpop.f32.mrf.mxu1 }
 0x302   :  { %v2190_v39 = vadd.f32 %v2189_v25, %v2141_v15 }
 0x303   :  { %v2264_v34 = vmax.f32 %v5191_v13, %v2234_v45  ;;  %v2101_v56 = vpop.f32.mrf.mxu0  ;;  %v2148_v45 = vadd.f32 %v2147_v3, %v2099_v21  ;;  %v2150_v25 = vpop.f32.mrf.mxu2  ;;  %v3838_v21 = vld [vmem:[%s5487_s3 + $0x88] sm:$0xff] }
 0x304   :  { %v2294_v43 = vld [vmem:[#allocation4 + $0x20] ss:$2 sm:$0xff]  ;;  %v2307_v31 = vld [vmem:[#allocation4 + $0x21] ss:$2 sm:$0xff] }
 0x305   :  { %v2315_v7 = vmax.f32 %v2294_v43, %v2307_v31  ;;  %2280 = vst [vmem:[#allocation4 + $0x30] sm:$0xff] %v2264_v34  ;;  %v5512_v43 = vld [vmem:[#allocation8_spill] sm:$0xff] }
 0x307   :  { %2323 = vst [vmem:[#allocation3 + $0x10] sm:$0xff] %v2315_v7  ;;  %v3821_v7 = vld [vmem:[%s5487_s3] sm:$0xff] }
 0x308   :  { %v2235_v13 = vpop.f32.mrf.mxu3  ;;  %2682 = vmatpush.bf16.msrb.mxu0 %v3821_v7 }
 0x309   :  { %v2236_v42 = vadd.f32 %v2235_v13, %v2187_v1  ;;  %v2191_v59 = vpop.f32.mrf.mxu1  ;;  %v5513_v1 = vld [vmem:[#allocation10_spill] sm:$0xff]  ;;  %v2102_v13 = vadd.f32 %v2101_v56, %v5514_v16  ;;  %v3846_v16 = vld [vmem:[%s5487_s3 + $0xc8] sm:$0xff] }
 0x30a   :  { %v2192_v60 = vadd.f32 %v2191_v59, %v2143_v47 }
 0x30b   :  { %v2265_v19 = vmax.f32 %v1991_v0, %v2236_v42  ;;  %v2103_v42 = vpop.f32.mrf.mxu0  ;;  %v2151_v59 = vadd.f32 %v2150_v25, %v2102_v13  ;;  %v2152_v15 = vpop.f32.mrf.mxu2  ;;  %v3845_v13 = vld [vmem:[%s5487_s3 + $0xc0] sm:$0xff] }
 0x30c   :  { %2701 = vmatpush.bf16.msra.mxu0 %v3844_v26  ;;  %v3847_v26 = vld [vmem:[%s5487_s3 + $0xd0] sm:$0xff] }
 0x30d   :  { %2281 = vst [vmem:[#allocation4 + $0x38] sm:$0xff] %v2265_v19  ;;  %v3843_v19 = vld [vmem:[%s5487_s3 + $0xb0] sm:$0xff] }
 0x310   :  { %v2238_v23 = vpop.f32.mrf.mxu3  ;;  %2702 = vmatpush.bf16.msra.mxu0 %v3843_v19 }
 0x311   :  { %v2239_v24 = vadd.f32 %v2238_v23, %v2190_v39  ;;  %v2194_v52 = vpop.f32.mrf.mxu1  ;;  %v5515_v23 = vld [vmem:[#allocation16_spill] sm:$0xff] }
 0x312   :  { %v2195_v4 = vadd.f32 %v2194_v52, %v2146_v53  ;;  %v2104_v51 = vadd.f32 %v2103_v42, %v5515_v23  ;;  %v3842_v52 = vld [vmem:[%s5487_s3 + $0xa8] sm:$0xff]  ;;  %v3860_v23 = vld [vmem:[%s5487_s3 + $0x138] sm:$0xff] }
 0x313   :  { %v2266_v33 = vmax.f32 %v5202_v12, %v2239_v24  ;;  %v1996_v12 = vadd.f32 %v5207_v35, %v1947_v28  ;;  %v5510_v35 = vld [vmem:[#allocation6_spill] sm:$0xff]  ;;  %v3830_v24 = vld [vmem:[%s5487_s3 + $0x48] sm:$0xff]  ;;  %v3829_v28 = vld [vmem:[%s5487_s3 + $0x40] sm:$0xff]  ;;  %v2106_v37 = vpop.f32.mrf.mxu0 }
 0x314   :  { %v2296_v61 = vld [vmem:[#allocation4 + $0x30] ss:$2 sm:$0xff]  ;;  %v2308_v27 = vld [vmem:[#allocation4 + $0x31] ss:$2 sm:$0xff]  ;;  %v1903_v20 = vadd.f32 %v5510_v35, %v1854_v18  ;;  %2694 = vmatpush.bf16.msrb.mxu2 %v3830_v24  ;;  %2703 = vmatpush.bf16.msra.mxu0 %v3842_v52  ;;  %v2153_v47 = vadd.f32 %v2152_v15, %v2104_v51  ;;  %v3839_v18 = vld [vmem:[%s5487_s3 + $0x90] sm:$0xff] }
 0x315   :  { %v2316_v63 = vmax.f32 %v2296_v61, %v2308_v27  ;;  %2282 = vst [vmem:[#allocation4 + $0x40] sm:$0xff] %v2266_v33  ;;  %v3849_v35 = vld [vmem:[%s5487_s3 + $0xe0] sm:$0xff]  ;;  %v3859_v24 = vld [vmem:[%s5487_s3 + $0x130] sm:$0xff]  ;;  %v3858_v52 = vld [vmem:[%s5487_s3 + $0x128] sm:$0xff] }
 0x316   :  { %v1952_v31 = vadd.f32 %v5512_v43, %v1903_v20  ;;  %v5519_v20 = vld [vmem:[#allocation19_spill] sm:$0xff] }
 0x317   :  { %2324 = vst [vmem:[#allocation3 + $0x18] sm:$0xff] %v2316_v63  ;;  %v3848_v43 = vld [vmem:[%s5487_s3 + $0xd8] sm:$0xff] }
 0x318   :  { %v2240_v8 = vpop.f32.mrf.mxu3  ;;  %v2001_v11 = vadd.f32 %v5513_v1, %v1952_v31  ;;  %2695 = vmatpush.bf16.msrb.mxu2 %v3829_v28  ;;  %v5521_v1 = vld [vmem:[#allocation17_spill] sm:$0xff] }
 0x319   :  { %v2241_v30 = vadd.f32 %v2240_v8, %v2192_v60  ;;  %v2196_v22 = vpop.f32.mrf.mxu1  ;;  %v3841_v60 = vld [vmem:[%s5487_s3 + $0xa0] sm:$0xff]  ;;  %v3840_v8 = vld [vmem:[%s5487_s3 + $0x98] sm:$0xff] }
 0x31a   :  { %v2197_v2 = vadd.f32 %v2196_v22, %v2148_v45  ;;  %2704 = vmatpush.bf16.msra.mxu0 %v3841_v60  ;;  %v2155_v22 = vpop.f32.mrf.mxu2  ;;  %v3856_v60 = vld [vmem:[%s5487_s3 + $0x118] sm:$0xff] }
 0x31b   :  { %v2267_v9 = vmax.f32 %v1996_v12, %v2241_v30  ;;  %v5517_v30 = vld [vmem:[#allocation18_spill] sm:$0xff] }
 0x31c   :  { %2714 = vmatpush.bf16.msra.mxu2 %v3852_v10  ;;  %v2107_v3 = vadd.f32 %v2106_v37, %v5517_v30 }
 0x31d   :  { %2283 = vst [vmem:[#allocation4 + $0x48] sm:$0xff] %v2267_v9 }
 0x31e   :  { %2705 = vmatpush.bf16.msra.mxu0 %v3840_v8  ;;  %v2334_v19 = vld [vmem:[#allocation3 + $0x1] ss:$8 sm:$0xf]  ;;  %v2349_v30 = vld [vmem:[#allocation3 + $0x4] ss:$8 sm:$0xf] }
 0x31f   :  { %v3854_v8 = vld [vmem:[%s5487_s3 + $0x108] sm:$0xff] }
 0x320   :  { %v2243_v38 = vpop.f32.mrf.mxu3  ;;  %2715 = vmatpush.bf16.msra.mxu2 %v3851_v5  ;;  %v3853_v5 = vld [vmem:[%s5487_s3 + $0x100] sm:$0xff] }
 0x321   :  { %v2244_v29 = vadd.f32 %v2243_v38, %v2195_v4  ;;  %v2199_v17 = vpop.f32.mrf.mxu1  ;;  %v3850_v4 = vld [vmem:[%s5487_s3 + $0xe8] sm:$0xff]  ;;  %v2156_v38 = vadd.f32 %v2155_v22, %v2107_v3  ;;  %v3868_v22 = vld [vmem:[%s5489_s4 + $0x38] sm:$0xff] }
 0x322   :  { %v2200_v14 = vadd.f32 %v2199_v17, %v2151_v59  ;;  %2706 = vmatpush.bf16.msra.mxu0 %v3839_v18  ;;  %v2157_v45 = vpop.f32.mrf.mxu2  ;;  %v2329_v59 = vld [vmem:[#allocation3] ss:$8 sm:$0xf] }
 0x323   :  { %v2268_v54 = vmax.f32 %v5511_v57, %v2244_v29  ;;  %v2108_v29 = vpop.f32.mrf.mxu0  ;;  %v3864_v18 = vld [vmem:[%s5489_s4 + $0x18] sm:$0xff] }
 0x324   :  { %v2298_v62 = vld [vmem:[#allocation4 + $0x40] ss:$2 sm:$0xff]  ;;  %v2309_v55 = vld [vmem:[#allocation4 + $0x41] ss:$2 sm:$0xff]  ;;  %2716 = vmatpush.bf16.msra.mxu2 %v3850_v4  ;;  %v2109_v57 = vadd.f32 %v2108_v29, %v5519_v20 }
 0x325   :  { %v2317_v34 = vmax.f32 %v2298_v62, %v2309_v55  ;;  %2284 = vst [vmem:[#allocation4 + $0x50] sm:$0xff] %v2268_v54  ;;  %v5520_v62 = vld [vmem:[#allocation15_spill] sm:$0xff]  ;;  %v3863_v4 = vld [vmem:[%s5489_s4 + $0x10] sm:$0xff] }
 0x326   :  { %2707 = vmatpush.bf16.msra.mxu0 %v3838_v21  ;;  %v2158_v31 = vadd.f32 %v2157_v45, %v2109_v57  ;;  %v3861_v21 = vld [vmem:[%s5489_s4] sm:$0xff]  ;;  %v3875_v20 = vld [vmem:[%s5490_s5 + $0x30] sm:$0xff] }
 0x327   :  { %2325 = vst [vmem:[#allocation3 + $0x20] sm:$0xff] %v2317_v34 }
 0x328   :  { %v2245_v6 = vpop.f32.mrf.mxu3  ;;  %2717 = vmatpush.bf16.msra.mxu2 %v3849_v35  ;;  %v3876_v35 = vld [vmem:[%s5490_s5 + $0x38] sm:$0xff] }
 0x329   :  { %v2246_v0 = vadd.f32 %v2245_v6, %v2197_v2  ;;  %v2201_v39 = vpop.f32.mrf.mxu1 }
 0x32a   :  { %v2202_v46 = vadd.f32 %v2201_v39, %v2153_v47  ;;  %2708 = vmatpush.bf16.msra.mxu0 %v3837_v44  ;;  %v2344_v47 = vld [vmem:[#allocation3 + $0x3] ss:$8 sm:$0xf]  ;;  %v3878_v44 = vld [vmem:[%s5488_s6] ss:$0 sm:$0xff] }
 0x32b   :  { %v2269_v41 = vmax.f32 %v2001_v11, %v2246_v0 }
 0x32c   :  { %2718 = vmatpush.bf16.msra.mxu2 %v3848_v43  ;;  %v3871_v43 = vld [vmem:[%s5490_s5 + $0x10] sm:$0xff] }
 0x32d   :  { %2285 = vst [vmem:[#allocation4 + $0x58] sm:$0xff] %v2269_v41 }
 0x330   :  { %v2248_v49 = vpop.f32.mrf.mxu3  ;;  %2719 = vmatpush.bf16.msra.mxu2 %v3847_v26 }
 0x331   :  { %v2249_v36 = vadd.f32 %v2248_v49, %v2200_v14  ;;  %v2204_v53 = vpop.f32.mrf.mxu1 }
 0x332   :  { %v2205_v40 = vadd.f32 %v2204_v53, %v2156_v38  ;;  %v3867_v53 = vld [vmem:[%s5489_s4 + $0x30] sm:$0xff]  ;;  %v3862_v38 = vld [vmem:[%s5489_s4 + $0x8] sm:$0xff] }
 0x333   :  { %v2270_v33 = vmax.f32 %v5516_v58, %v2249_v36 }
 0x334   :  { %v2300_v61 = vld [vmem:[#allocation4 + $0x50] ss:$2 sm:$0xff]  ;;  %v2310_v27 = vld [vmem:[#allocation4 + $0x51] ss:$2 sm:$0xff]  ;;  %2720 = vmatpush.bf16.msra.mxu2 %v3846_v16 }
 0x335   :  { %v2318_v63 = vmax.f32 %v2300_v61, %v2310_v27  ;;  %2286 = vst [vmem:[#allocation4 + $0x60] sm:$0xff] %v2270_v33  ;;  %v2339_v61 = vld [vmem:[#allocation3 + $0x2] ss:$8 sm:$0xf] }
 0x336   :  { %v3857_v27 = vld [vmem:[%s5487_s3 + $0x120] sm:$0xff] }
 0x337   :  { %2326 = vst [vmem:[#allocation3 + $0x28] sm:$0xff] %v2318_v63 }
 0x338   :  { %v2250_v12 = vpop.f32.mrf.mxu3  ;;  %2721 = vmatpush.bf16.msra.mxu2 %v3845_v13  ;;  %v3869_v13 = vld [vmem:[%s5490_s5] sm:$0xff] }
 0x339   :  { %v2251_v9 = vadd.f32 %v2250_v12, %v2202_v46  ;;  %v2206_v17 = vpop.f32.mrf.mxu1  ;;  %v3855_v46 = vld [vmem:[%s5487_s3 + $0x110] sm:$0xff] }
 0x33a   :  { %v2207_v48 = vadd.f32 %v2206_v17, %v2158_v31 }
 0x33b   :  { %v2271_v50 = vmax.f32 %v5518_v32, %v2251_v9  ;;  %v3866_v32 = vld [vmem:[%s5489_s4 + $0x28] sm:$0xff] }
 0x33d   :  { %2287 = vst [vmem:[#allocation4 + $0x68] sm:$0xff] %v2271_v50  ;;  %v3865_v50 = vld [vmem:[%s5489_s4 + $0x20] sm:$0xff] }
 0x340   :  { %v2253_v56 = vpop.f32.mrf.mxu3 }
 0x341   :  { %v2254_v54 = vadd.f32 %v2253_v56, %v2205_v40 }
 0x343   :  { %v2272_v55 = vmax.f32 %v5520_v62, %v2254_v54  ;;  %v3874_v54 = vld [vmem:[%s5490_s5 + $0x28] sm:$0xff] }
 0x344   :  { %v2302_v25 = vld [vmem:[#allocation4 + $0x60] ss:$2 sm:$0xff]  ;;  %v2311_v34 = vld [vmem:[#allocation4 + $0x61] ss:$2 sm:$0xff] }
 0x345   :  { %v2319_v2 = vmax.f32 %v2302_v25, %v2311_v34  ;;  %2288 = vst [vmem:[#allocation4 + $0x70] sm:$0xff] %v2272_v55  ;;  %v3873_v55 = vld [vmem:[%s5490_s5 + $0x20] sm:$0xff]  ;;  %v3872_v25 = vld [vmem:[%s5490_s5 + $0x18] sm:$0xff] }
 0x347   :  { %2327 = vst [vmem:[#allocation3 + $0x30] sm:$0xff] %v2319_v2 }
 0x348   :  { %v2255_v7 = vpop.f32.mrf.mxu3 }
 0x349   :  { %v2256_v6 = vadd.f32 %v2255_v7, %v2207_v48  ;;  %v3870_v7 = vld [vmem:[%s5490_s5 + $0x8] sm:$0xff] }
 0x34b   :  { %v2273_v11 = vmax.f32 %v5521_v1, %v2256_v6 }
 0x34d   :  { %2289 = vst [vmem:[#allocation4 + $0x78] sm:$0xff] %v2273_v11 }
 0x354   :  { %v2304_v0 = vld [vmem:[#allocation4 + $0x70] ss:$2 sm:$0xff]  ;;  %v2312_v41 = vld [vmem:[#allocation4 + $0x71] ss:$2 sm:$0xff] }
 0x355   :  { %v2320_v42 = vmax.f32 %v2304_v0, %v2312_v41  ;;  %v3879_v0 = vld [vmem:[%s5488_s6 + $0x1] ss:$0 sm:$0xff] }
 0x357   :  { %2328 = vst [vmem:[#allocation3 + $0x38] sm:$0xff] %v2320_v42 }
 0x35e   :  { %v2330_v15 = vld [vmem:[#allocation3] ss:$8 sm:$0xf0]  ;;  %v2335_v14 = vld [vmem:[#allocation3 + $0x1] ss:$8 sm:$0xf0] }
 0x35f   :  { %v2331_v49 = vor.u32 %v2330_v15, %v2329_v59  ;;  %v2336_v39 = vor.u32 %v2335_v14, %v2334_v19  ;;  %v2340_v58 = vld [vmem:[#allocation3 + $0x2] ss:$8 sm:$0xf0]  ;;  %v2345_v33 = vld [vmem:[#allocation3 + $0x3] ss:$8 sm:$0xf0] }
 0x360   :  { %v2341_v63 = vor.u32 %v2340_v58, %v2339_v61  ;;  %v2346_v28 = vor.u32 %v2345_v33, %v2344_v47  ;;  %v2350_v12 = vld [vmem:[#allocation3 + $0x4] ss:$8 sm:$0xf0]  ;;  %v3880_v15 = vld [vmem:[%s5488_s6 + $0x2] ss:$0 sm:$0xff] }
 0x361   :  { %v2332_v51 = vpack.c.bf16 %v2331_v49, %v2331_v49  ;;  %v2337_v36 = vpack.c.bf16 %v2336_v39, %v2336_v39  ;;  %v2351_v3 = vor.u32 %v2350_v12, %v2349_v30 }
 0x362   :  { %v2342_v37 = vpack.c.bf16 %v2341_v63, %v2341_v63  ;;  %v2347_v10 = vpack.c.bf16 %v2346_v28, %v2346_v28 }
 0x363   :  { %2683 = vmatmul.bf16.vlgmr.msrb.gmra.mxu0 %v2332_v51  ;;  %2696 = vmatmul.bf16.vlgmr.msrb.gmra.mxu2 %v2337_v36  ;;  %v2352_v9 = vpack.c.bf16 %v2351_v3, %v2351_v3 }
 0x364   :  { %2727 = vmatpush.bf16.msrb.mxu0 %v3860_v23  ;;  %2807 = vmatpush.bf16.msrb.mxu2 %v3868_v22 }
 0x368   :  { %2728 = vmatpush.bf16.msrb.mxu0 %v3859_v24  ;;  %2808 = vmatpush.bf16.msrb.mxu2 %v3867_v53 }
 0x36c   :  { %2729 = vmatpush.bf16.msrb.mxu0 %v3858_v52  ;;  %2809 = vmatpush.bf16.msrb.mxu2 %v3866_v32 }
 0x370   :  { %2730 = vmatpush.bf16.msrb.mxu0 %v3857_v27  ;;  %2810 = vmatpush.bf16.msrb.mxu2 %v3865_v50 }
 0x373   :  { %2709 = vmatmul.bf16.vlgmr.msra.gmra.mxu0 %v2342_v37  ;;  %2722 = vmatmul.bf16.vlgmr.msra.gmra.mxu2 %v2347_v10 }
 0x374   :  { %2731 = vmatpush.bf16.msrb.mxu0 %v3856_v60  ;;  %2811 = vmatpush.bf16.msrb.mxu2 %v3864_v18 }
 0x378   :  { %2732 = vmatpush.bf16.msrb.mxu0 %v3855_v46  ;;  %2812 = vmatpush.bf16.msrb.mxu2 %v3863_v4 }
 0x37c   :  { %2733 = vmatpush.bf16.msrb.mxu0 %v3854_v8  ;;  %2813 = vmatpush.bf16.msrb.mxu2 %v3862_v38 }
 0x380   :  { %2734 = vmatpush.bf16.msrb.mxu0 %v3853_v5  ;;  %2814 = vmatpush.bf16.msrb.mxu2 %v3861_v21 }
 0x383   :  { %2735 = vmatmul.bf16.vlgmr.msrb.gmra.mxu0 %v2352_v9 }
 0x384   :  { %2887 = vmatpush.bf16.msra.mxu0 %v3876_v35 }
 0x388   :  { %2888 = vmatpush.bf16.msra.mxu0 %v3875_v20 }
 0x38c   :  { %2889 = vmatpush.bf16.msra.mxu0 %v3874_v54 }
 0x390   :  { %2890 = vmatpush.bf16.msra.mxu0 %v3873_v55 }
 0x394   :  { %2891 = vmatpush.bf16.msra.mxu0 %v3872_v25 }
 0x398   :  { %2892 = vmatpush.bf16.msra.mxu0 %v3871_v43 }
 0x39c   :  { %2893 = vmatpush.bf16.msra.mxu0 %v3870_v7 }
 0x3a0   :  { %2894 = vmatpush.bf16.msra.mxu0 %v3869_v13 }
 0x3e0   :  { %v2684_v40 = vpop.f32.mrf.mxu0 }
 0x3e1   :  { %v2685_v17 = vadd.f32 %v3878_v44, %v2684_v40 }
 0x3e6   :  { %v2697_v29 = vpop.f32.mrf.mxu2 }
 0x3e7   :  { %v2698_v31 = vadd.f32 %v2697_v29, %v2685_v17 }
 0x3e8   :  { %v2686_v56 = vpop.f32.mrf.mxu0 }
 0x3ee   :  { %v2699_v57 = vpop.f32.mrf.mxu2 }
 0x3f0   :  { %v2710_v62 = vpop.f32.mrf.mxu0 }
 0x3f1   :  { %v2711_v2 = vadd.f32 %v2710_v62, %v2698_v31 }
 0x3f6   :  { %v2723_v45 = vpop.f32.mrf.mxu2 }
 0x3f7   :  { %v2724_v26 = vadd.f32 %v2723_v45, %v2711_v2 }
 0x3f8   :  { %v2712_v34 = vpop.f32.mrf.mxu0 }
 0x3fe   :  { %v2725_v48 = vpop.f32.mrf.mxu2 }
 0x400   :  { %v2736_v6 = vpop.f32.mrf.mxu0 }
 0x401   :  { %v2737_v1 = vadd.f32 %v2736_v6, %v2724_v26 }
 0x403   :  { %v2740_v11 = vpack.c.bf16 %v2737_v1, %v2737_v1 }
 0x405   :  { %2815 = vmatmul.bf16.vlgmr.msrb.gmra.mxu2 %v2740_v11 }
 0x408   :  { %v2738_v16 = vpop.f32.mrf.mxu0 }
 0x488   :  { %v2816_v41 = vpop.f32.mrf.mxu2 }
 0x489   :  { %v2817_v42 = vadd.f32 %v3879_v0, %v2816_v41 }
 0x48b   :  { %v2820_v59 = vpack.c.bf16 %v2817_v42, %v2817_v42 }
 0x48d   :  { %2895 = vmatmul.bf16.vlgmr.msra.gmra.mxu0 %v2820_v59 }
 0x490   :  { %v2818_v19 = vpop.f32.mrf.mxu2 }
 0x50a   :  { %v2896_v14 = vpop.f32.mrf.mxu0 }
 0x50b   :  { %v2897_v49 = vadd.f32 %v3880_v15, %v2896_v14 }
 0x50d   :  { %2900 = vst [vmem:[%s5491_s7] sm:$0xff] %v2897_v49 }
 0x512   :  { %v2898_v39 = vpop.f32.mrf.mxu0 }

</bundles_post_ra>
